<compile_context>
chip_gen: v5e
topology: v5e:2x2
jax: 0.10.0
libtpu: 0.0.40
codegen_flags: <defaults>
</compile_context>

<pallas_src>
import functools

import jax
import jax.numpy as jnp
from jax.experimental import pallas as pl
from jax.experimental.pallas import tpu as pltpu


# ----------------------------------------------------------------------------
# Hardware-aware helpers
# ----------------------------------------------------------------------------

def _vmem_limit_bytes():
    """Generation-aware scoped-VMEM limit: ~half of physical VMEM
    (64 MiB on v5e/v6e which have 128 MiB, 32 MiB on v7x which has 64 MiB)."""
    try:
        cap = int(pltpu.get_tpu_info().vmem_capacity_bytes)
    except Exception:                       # pragma: no cover - query unavailable
        cap = 64 * 1024 * 1024
    return int(min(cap // 2, 64 * 1024 * 1024))


def _pick_lane_tile(L, bytes_per_lane, budget_bytes, min_steps=4):
    """Pick a lane (flattened-spatial) tile size for a (N, C, L) layout.

    Largest multiple-of-128 divisor of L that fits `budget_bytes`, capped so that
    at least `min_steps` steps remain along L when that still allows a >=512-lane
    tile (keeps the BlockSpec pipeline deep enough to hide DMA on v7x's 2-TC /
    64-MiB layout).  The full-extent fallback is guarded against the budget."""
    if L % 128 != 0:
        if L * bytes_per_lane > budget_bytes:
            raise NotImplementedError(
                "non-128-aligned lane extent exceeds the VMEM budget; pad the "
                "spatial extent to a multiple of 128")
        return L
    cap = max(128, (budget_bytes // bytes_per_lane) // 128 * 128)
    target = min(L, cap)
    if L // min_steps >= 512:
        target = min(target, (L // min_steps) // 128 * 128)
    best = 128
    for cand in range(128, target + 1, 128):
        if L % cand == 0:
            best = cand
    return best


# ----------------------------------------------------------------------------
# Pallas kernels
# ----------------------------------------------------------------------------

def _aspp_fused_kernel(x_ref, w1_ref, t1_ref, w3_ref, t3_ref, w13_ref, t13_ref,
                       img_ref, o_ref, *, H, W, halo, rates):
    """One image per grid step.  Computes, entirely in VMEM:

        relu(BN3(conv_1x1_3(concat[ relu(BN(conv_1x1_1(x))),
                                    relu(BN(conv_3x3_r(x))) for r in rates,
                                    broadcast(image_branch) ])))

    x_ref holds the flattened (Cin, H*W) image with `halo` zero columns on each
    side.  Each dilated-3x3 tap is a shifted lane-slice of this resident tile
    (the zero halo handles the row boundary, a VPU mask zeroes W-boundary wrap).
    BN scales are folded into the weights; the image/pool branch arrives
    pre-reduced as a per-image bias vector (img_ref)."""
    HW = H * W
    f32 = jnp.float32

    # flat-pixel column index, for masking taps that cross the W boundary
    col = jax.lax.broadcasted_iota(jnp.int32, (1, HW), 1) % W

    def mm(w, v):                            # (Co, K) @ (K, HW) on the MXU, f32 acc
        return jnp.dot(w, v, preferred_element_type=f32)

    w13 = w13_ref[...]                       # (5, c_mid, c_mid), bf16, VMEM-resident

    # ---- branch 0: conv_1x1_1 + BN + ReLU -----------------------------------
    x_in = x_ref[0, :, halo:halo + HW]                           # (Cin, HW) bf16
    b = jnp.maximum(mm(w1_ref[...], x_in) + t1_ref[...], 0.0)
    acc = mm(w13[0], b.astype(x_in.dtype))                       # conv_1x1_3 partial

    # ---- branches 1..len(rates): dilated 3x3 convs (K=Cin per tap dot) ------
    for k, d in enumerate(rates):
        bk = None
        for ky in range(3):
            for kx in range(3):
                dy, dx = (ky - 1) * d, (kx - 1) * d
                s = dy * W + dx
                xt = x_ref[0, :, halo + s:halo + s + HW]         # shifted tap (Cin, HW)
                contrib = mm(w3_ref[k * 9 + ky * 3 + kx], xt)
                if dx != 0:                                      # mask W-boundary wrap
                    keep = jnp.logical_and(col + dx >= 0, col + dx < W)
                    contrib = jnp.where(keep, contrib, 0.0)
                bk = contrib if bk is None else bk + contrib
        bk = jnp.maximum(bk + t3_ref[k], 0.0)
        acc = acc + mm(w13[1 + k], bk.astype(x_in.dtype))

    # ---- image-pool branch (spatially constant bias) + conv_1x1_3 epilogue --
    o_ref[0] = jnp.maximum(acc + img_ref[0] + t13_ref[...], 0.0).astype(o_ref.dtype)


def _final_conv_kernel(a_ref, b_ref, c_ref, wa_ref, wb_ref, wc_ref, bias_ref, o_ref):
    """conv_1x1_4 over the virtual channel-concat [up(out), up(x_64), x_128]:
    the weight is split into three chunks accumulated here, so the big
    full-resolution concats never touch HBM."""
    acc = jnp.dot(wa_ref[...], a_ref[0], preferred_element_type=jnp.float32)
    acc = acc + jnp.dot(wb_ref[...], b_ref[0], preferred_element_type=jnp.float32)
    acc = acc + jnp.dot(wc_ref[...], c_ref[0], preferred_element_type=jnp.float32)
    o_ref[0] = (acc + bias_ref[...]).astype(o_ref.dtype)


# ----------------------------------------------------------------------------
# Pallas wrappers
# ----------------------------------------------------------------------------

def aspp_head(x_pad, pw1, pt1, pw3, pt3, pw13, pt13, img_bias, *, H, W, halo, rates):
    """Fused ASPP head: (N, Cin, HW+2*halo) bf16 -> (N, c_mid, HW) bf16."""
    N, Cin, HWp = x_pad.shape
    HW = H * W
    c_mid = pw1.shape[0]
    n_taps = pw3.shape[0]
    n_rates = len(rates)
    kernel = functools.partial(_aspp_fused_kernel, H=H, W=W, halo=halo,
                               rates=tuple(rates))
    return pl.pallas_call(
        kernel,
        out_shape=jax.ShapeDtypeStruct((N, c_mid, HW), jnp.bfloat16),
        grid_spec=pltpu.PrefetchScalarGridSpec(
            num_scalar_prefetch=0,
            grid=(N,),
            in_specs=[
                pl.BlockSpec((1, Cin, HWp), lambda n: (n, 0, 0)),
                pl.BlockSpec((c_mid, Cin), lambda n: (0, 0)),
                pl.BlockSpec((c_mid, 1), lambda n: (0, 0)),
                pl.BlockSpec((n_taps, c_mid, Cin), lambda n: (0, 0, 0)),
                pl.BlockSpec((n_rates, c_mid, 1), lambda n: (0, 0, 0)),
                pl.BlockSpec((5, c_mid, c_mid), lambda n: (0, 0, 0)),
                pl.BlockSpec((c_mid, 1), lambda n: (0, 0)),
                pl.BlockSpec((1, c_mid, 1), lambda n: (n, 0, 0)),
            ],
            out_specs=pl.BlockSpec((1, c_mid, HW), lambda n: (n, 0, 0)),
        ),
        compiler_params=pltpu.CompilerParams(
            dimension_semantics=("parallel",),
            vmem_limit_bytes=_vmem_limit_bytes()),
    )(x_pad, pw1, pt1, pw3, pt3, pw13, pt13, img_bias)


def final_conv1x1(a, b, c, wa, wb, wc, bias):
    """y = wa@a + wb@b + wc@c + bias, all (N, C, L) lane-dense, f32 output."""
    N, Ca, L = a.shape
    Cb, Cc, Cout = b.shape[1], c.shape[1], wa.shape[0]
    # double-buffered bf16 inputs + f32 output bytes per lane of tile
    bytes_per_lane = 2 * (2 * (Ca + Cb + Cc) + 4 * Cout)
    TL = _pick_lane_tile(L, bytes_per_lane, _vmem_limit_bytes() // 2)
    grid = (N, L // TL)
    return pl.pallas_call(
        _final_conv_kernel,
        out_shape=jax.ShapeDtypeStruct((N, Cout, L), jnp.float32),
        grid_spec=pltpu.PrefetchScalarGridSpec(
            num_scalar_prefetch=0,
            grid=grid,
            in_specs=[
                pl.BlockSpec((1, Ca, TL), lambda n, l: (n, 0, l)),
                pl.BlockSpec((1, Cb, TL), lambda n, l: (n, 0, l)),
                pl.BlockSpec((1, Cc, TL), lambda n, l: (n, 0, l)),
                pl.BlockSpec((Cout, Ca), lambda n, l: (0, 0)),
                pl.BlockSpec((Cout, Cb), lambda n, l: (0, 0)),
                pl.BlockSpec((Cout, Cc), lambda n, l: (0, 0)),
                pl.BlockSpec((Cout, 1), lambda n, l: (0, 0)),
            ],
            out_specs=pl.BlockSpec((1, Cout, TL), lambda n, l: (n, 0, l)),
        ),
        compiler_params=pltpu.CompilerParams(
            dimension_semantics=("parallel", "parallel"),
            vmem_limit_bytes=_vmem_limit_bytes()),
    )(a, b, c, wa, wb, wc, bias)


# ----------------------------------------------------------------------------
# Model
# ----------------------------------------------------------------------------

def _fold_bn(gamma, beta, mean, var, eps=1e-5):
    scale = gamma / jnp.sqrt(var + eps)
    shift = beta - mean * scale
    return scale, shift


class RefineNetPallas:
    """RefineNet forward: ASPP head -> 2x bilinear upsamples with skips -> 1x1 output conv.

    The deprecated spec leaves every layer undefined (empty __init__), so the standard
    ASPP-style instantiation is used (1x1 / dilated-3x3 convs + BN + ReLU, global avg
    pool branch, parameter-free bilinear 2x upsamples, final biased 1x1 conv, concat=True)."""

    def __init__(self, key, c_in=32, c_mid=32, c_64=16, c_128=16, c_out=16,
                 rates=(2, 4, 6)):
        self.c_in, self.c_mid = c_in, c_mid
        self.c_64, self.c_128, self.c_out = c_64, c_128, c_out
        self.rates = tuple(rates)
        self.concat = True

        keys = iter(jax.random.split(key, 64))

        def conv_w(shape, fan_in):
            return jax.random.normal(next(keys), shape, jnp.float32) / jnp.sqrt(fan_in)

        def bn(c):
            gamma = 1.0 + 0.1 * jax.random.normal(next(keys), (c,), jnp.float32)
            beta = 0.1 * jax.random.normal(next(keys), (c,), jnp.float32)
            mean = 0.1 * jax.random.normal(next(keys), (c,), jnp.float32)
            var = 1.0 + 0.1 * jax.random.uniform(next(keys), (c,), jnp.float32)
            return _fold_bn(gamma, beta, mean, var)

        # raw (reference) parameters ------------------------------------------
        self.w11 = conv_w((c_mid, c_in), c_in)
        self.s11, self.t11 = bn(c_mid)

        self.w3, self.s3, self.t3 = [], [], []
        for _ in self.rates:
            self.w3.append(conv_w((c_mid, c_in, 3, 3), 9 * c_in))
            s, t = bn(c_mid)
            self.s3.append(s)
            self.t3.append(t)

        self.w12 = conv_w((c_mid, c_in), c_in)
        self.s12, self.t12 = bn(c_mid)

        self.w13 = conv_w((c_mid, 5 * c_mid), 5 * c_mid)
        self.s13, self.t13 = bn(c_mid)

        c_final_in = c_mid + c_64 + c_128
        self.w14 = conv_w((c_out, c_final_in), c_final_in)
        self.bias14 = 0.1 * jax.random.normal(next(keys), (c_out,), jnp.float32)

        self._build_pallas_params()

    def _build_pallas_params(self):
        """Fold BN scales into the weights once at init; stack per-tap / per-branch
        weight chunks; keep HBM-side weights in bf16 (shifts stay f32)."""
        bf16 = jnp.bfloat16
        c_mid = self.c_mid

        self.pw1 = (self.s11[:, None] * self.w11).astype(bf16)
        self.pt1 = self.t11.reshape(c_mid, 1)

        taps = []
        for k in range(len(self.rates)):
            wf = self.s3[k][:, None, None, None] * self.w3[k]     # (c_mid, c_in, 3, 3)
            for ky in range(3):
                for kx in range(3):
                    taps.append(wf[:, :, ky, kx])
        self.pw3 = jnp.stack(taps).astype(bf16)                   # (9*rates, c_mid, c_in)
        self.pt3 = jnp.stack([t.reshape(c_mid, 1) for t in self.t3])

        w13f = self.s13[:, None] * self.w13                       # (c_mid, 5*c_mid)
        self.pw13 = jnp.stack(
            [w13f[:, j * c_mid:(j + 1) * c_mid] for j in range(5)]).astype(bf16)
        self.pt13 = self.t13.reshape(c_mid, 1)

        # image-pool branch weights stay f32 (tiny host-side matvec per image)
        self.pw12 = self.s12[:, None] * self.w12                  # (c_mid, c_in)
        self.pw13_img = w13f[:, 4 * c_mid:5 * c_mid]              # (c_mid, c_mid)

        self.pw14a = self.w14[:, :c_mid].astype(bf16)
        self.pw14b = self.w14[:, c_mid:c_mid + self.c_64].astype(bf16)
        self.pw14c = self.w14[:, c_mid + self.c_64:].astype(bf16)
        self.pbias14 = self.bias14.reshape(self.c_out, 1)

    def __call__(self, x, mask, entire_mask, x_high_feature,
                 x_128=None, x_64=None, x_32=None, x_16=None):
        # NOTE: x / mask / entire_mask / x_32 / x_16 are accepted but never read,
        # exactly like the reference forward (x is immediately overwritten).
        bf16 = jnp.bfloat16
        N, Cin, H, W = x_high_feature.shape
        HW = H * W
        c_mid = self.c_mid
        halo = max(self.rates) * (W + 1)      # covers the largest flat tap shift d*W + d

        # --- image-pool branch (tiny): GAP -> conv_1x1_2+BN+ReLU; its bilinear
        # upsample from 1x1 is a constant map, so its conv_1x1_3 contribution is a
        # per-image bias vector consumed by the fused ASPP kernel (no broadcast).
        pooled = jnp.mean(x_high_feature, axis=(2, 3))                       # (N, Cin)
        img = jnp.maximum(pooled @ self.pw12.T + self.t12[None, :], 0.0)     # (N, c_mid)
        img_bias = (img @ self.pw13_img.T)[:, :, None]                       # (N, c_mid, 1)

        # --- fused ASPP head: x read from HBM exactly once per image -----------
        xf = x_high_feature.reshape(N, Cin, HW).astype(bf16)
        x_pad = jnp.pad(xf, ((0, 0), (0, 0), (halo, halo)))
        out = aspp_head(x_pad, self.pw1, self.pt1, self.pw3, self.pt3,
                        self.pw13, self.pt13, img_bias,
                        H=H, W=W, halo=halo, rates=self.rates)
        out = out.reshape(N, c_mid, H, W)

        # --- decoder ------------------------------------------------------------
        # TODO(synk): bilinear 2x upsamples stay on jax.image.resize (XLA).
        # Channel-concat commutes with per-channel bilinear resize, so `out` and the
        # x_64 skip are upsampled separately and the big concats never hit HBM; the
        # final Pallas kernel accumulates the three w14 chunks instead. (concat=True)
        out_up = jax.image.resize(out, (N, c_mid, 2 * H, 2 * W), method="bilinear")
        out_up = jax.image.resize(out_up, (N, c_mid, 4 * H, 4 * W), method="bilinear")
        x64_up = jax.image.resize(x_64.astype(bf16), (N, self.c_64, 4 * H, 4 * W),
                                  method="bilinear")

        L4 = 16 * HW
        y = final_conv1x1(out_up.astype(bf16).reshape(N, c_mid, L4),
                          x64_up.astype(bf16).reshape(N, self.c_64, L4),
                          x_128.astype(bf16).reshape(N, self.c_128, L4),
                          self.pw14a, self.pw14b, self.pw14c, self.pbias14)
        return y.reshape(N, self.c_out, 4 * H, 4 * W)


# ----------------------------------------------------------------------------
# Pure-JAX (f32) reference of the same forward, for validation
# ----------------------------------------------------------------------------

def _reference_forward(m, x_high_feature, x_128, x_64):
    P = jax.lax.Precision.HIGHEST

    def conv1x1(x, w, s, t, relu=True):
        y = jnp.einsum("nchw,oc->nohw", x, w, precision=P)
        y = y * s[None, :, None, None] + t[None, :, None, None]
        return jnp.maximum(y, 0.0) if relu else y

    def conv3x3(x, w, s, t, d):
        y = jax.lax.conv_general_dilated(
            x, w, (1, 1), [(d, d), (d, d)], rhs_dilation=(d, d),
            dimension_numbers=("NCHW", "OIHW", "NCHW"), precision=P)
        y = y * s[None, :, None, None] + t[None, :, None, None]
        return jnp.maximum(y, 0.0)

    N, Cin, H, W = x_high_feature.shape
    outs = [conv1x1(x_high_feature, m.w11, m.s11, m.t11)]
    for w3, s, t, r in zip(m.w3, m.s3, m.t3, m.rates):
        outs.append(conv3x3(x_high_feature, w3, s, t, r))

    pooled = jnp.mean(x_high_feature, axis=(2, 3), keepdims=True)
    img = conv1x1(pooled, m.w12, m.s12, m.t12)
    outs.append(jnp.broadcast_to(img, (N, m.c_mid, H, W)))  # bilinear from 1x1 == broadcast

    out = conv1x1(jnp.concatenate(outs, axis=1), m.w13, m.s13, m.t13)

    xu = jax.image.resize(out, (N, m.c_mid, 2 * H, 2 * W), method="bilinear")
    xu = jnp.concatenate([xu, x_64], axis=1)
    xu = jax.image.resize(xu, (N, xu.shape[1], 4 * H, 4 * W), method="bilinear")
    xcat = jnp.concatenate([xu, x_128], axis=1)
    return conv1x1(xcat, m.w14, jnp.ones((m.c_out,), jnp.float32), m.bias14, relu=False)


# ----------------------------------------------------------------------------
# Demo
# ----------------------------------------------------------------------------

if __name__ == "__main__":
    key = jax.random.PRNGKey(0)
    k_model, k_in = jax.random.split(key)

    N, Cin, H, W = 2, 32, 16, 16
    c_mid, c_64, c_128, c_out = 32, 16, 16, 16

    model = RefineNetPallas(k_model, c_in=Cin, c_mid=c_mid, c_64=c_64,
                            c_128=c_128, c_out=c_out, rates=(2, 4, 6))

    ks = jax.random.split(k_in, 6)
    x = jax.random.normal(ks[0], (N, 3, 4 * H, 4 * W), jnp.float32)                   # unused
    mask = jax.random.uniform(ks[1], (N, 1, 4 * H, 4 * W), dtype=jnp.float32)         # unused
    entire_mask = jax.random.uniform(ks[2], (N, 1, 4 * H, 4 * W), dtype=jnp.float32)  # unused
    x_high_feature = jax.random.normal(ks[3], (N, Cin, H, W), jnp.float32)
    x_64 = jax.random.normal(ks[4], (N, c_64, 2 * H, 2 * W), jnp.float32)
    x_128 = jax.random.normal(ks[5], (N, c_128, 4 * H, 4 * W), jnp.float32)

    fwd = jax.jit(model.__call__)
    y = fwd(x, mask, entire_mask, x_high_feature, x_128=x_128, x_64=x_64)
    y = jax.block_until_ready(y)

    y_ref = jax.block_until_ready(_reference_forward(model, x_high_feature, x_128, x_64))

    assert y.shape == (N, c_out, 4 * H, 4 * W), y.shape
    # bf16 activations/weights on the Pallas path vs. an f32 reference: loose but
    # bug-catching tolerance (structural errors are O(0.1-1)).
    assert jnp.allclose(y, y_ref, rtol=3e-2, atol=3e-2), float(jnp.max(jnp.abs(y - y_ref)))

    print("KERNEL_OK")
</pallas_src>

<mosaic_0001>
module attributes {stable_mosaic.version = 11 : i64} {
  func.func @_aspp_fused_kernel(%arg0: i32, %arg1: memref<1x32x460xbf16, #tpu.memory_space<vmem>>, %arg2: memref<32x32xbf16, #tpu.memory_space<vmem>>, %arg3: memref<32x1xf32, #tpu.memory_space<vmem>>, %arg4: memref<27x32x32xbf16, #tpu.memory_space<vmem>>, %arg5: memref<3x32x1xf32, #tpu.memory_space<vmem>>, %arg6: memref<5x32x32xbf16, #tpu.memory_space<vmem>>, %arg7: memref<32x1xf32, #tpu.memory_space<vmem>>, %arg8: memref<1x32x1xf32, #tpu.memory_space<vmem>>, %arg9: memref<1x32x256xbf16, #tpu.memory_space<vmem>>) attributes {dimension_semantics = [#tpu.dimension_semantics<parallel>], iteration_bounds = array<i64: 2>, scalar_prefetch = 0 : i64, scratch_operands = 0 : i64, tpu.core_type = #tpu.core_type<tc>, window_params = [{transform_indices = @transform_0, window_bounds = array<i64: 1, 32, 460>}, {pipeline_mode = #tpu.pipeline_mode<synchronous>, transform_indices = @transform_1, window_bounds = array<i64: 32, 32>}, {pipeline_mode = #tpu.pipeline_mode<synchronous>, transform_indices = @transform_2, window_bounds = array<i64: 32, 1>}, {pipeline_mode = #tpu.pipeline_mode<synchronous>, transform_indices = @transform_3, window_bounds = array<i64: 27, 32, 32>}, {pipeline_mode = #tpu.pipeline_mode<synchronous>, transform_indices = @transform_4, window_bounds = array<i64: 3, 32, 1>}, {pipeline_mode = #tpu.pipeline_mode<synchronous>, transform_indices = @transform_5, window_bounds = array<i64: 5, 32, 32>}, {pipeline_mode = #tpu.pipeline_mode<synchronous>, transform_indices = @transform_6, window_bounds = array<i64: 32, 1>}, {transform_indices = @transform_7, window_bounds = array<i64: 1, 32, 1>}, {transform_indices = @transform_8, window_bounds = array<i64: 1, 32, 256>}]} {
    %0 = tpu.iota {dimensions = array<i32: 1>} : vector<1x256xi32>
    %c16_i32 = arith.constant 16 : i32
    %c0_i32 = arith.constant 0 : i32
    %1 = arith.cmpi eq, %c16_i32, %c0_i32 : i32
    %c1_i32 = arith.constant 1 : i32
    %2 = arith.select %1, %c1_i32, %c16_i32 : i32
    %3 = vector.broadcast %2 : i32 to vector<1x256xi32>
    %4 = arith.remsi %0, %3 : vector<1x256xi32>
    %c0_i32_0 = arith.constant 0 : i32
    %5 = vector.broadcast %c0_i32_0 : i32 to vector<1x256xi32>
    %6 = arith.cmpi ne, %4, %5 : vector<1x256xi32>
    %c0_i32_1 = arith.constant 0 : i32
    %7 = vector.broadcast %c0_i32_1 : i32 to vector<1x256xi32>
    %8 = arith.cmpi slt, %4, %7 : vector<1x256xi32>
    %c0_i32_2 = arith.constant 0 : i32
    %9 = arith.cmpi slt, %2, %c0_i32_2 : i32
    %10 = vector.broadcast %9 : i1 to vector<1x256xi1>
    %11 = vector.broadcast %10 : vector<1x256xi1> to vector<1x256xi1>
    %12 = arith.xori %8, %11 : vector<1x256xi1>
    %13 = arith.andi %12, %6 : vector<1x256xi1>
    %14 = vector.broadcast %2 : i32 to vector<1x256xi32>
    %15 = arith.addi %4, %14 : vector<1x256xi32>
    %16 = arith.select %13, %15, %4 : vector<1x256xi1>, vector<1x256xi32>
    %c0 = arith.constant 0 : index
    %c0_3 = arith.constant 0 : index
    %c0_4 = arith.constant 0 : index
    %17 = vector.load %arg6[%c0, %c0_3, %c0_4] : memref<5x32x32xbf16, #tpu.memory_space<vmem>>, vector<5x32x32xbf16>
    %c0_5 = arith.constant 0 : index
    %c0_6 = arith.constant 0 : index
    %c102 = arith.constant 102 : index
    %18 = vector.load %arg1[%c0_5, %c0_6, %c102] : memref<1x32x460xbf16, #tpu.memory_space<vmem>>, vector<1x32x256xbf16>
    %19 = vector.shape_cast %18 : vector<1x32x256xbf16> to vector<32x256xbf16>
    %c0_7 = arith.constant 0 : index
    %c0_8 = arith.constant 0 : index
    %20 = vector.load %arg2[%c0_7, %c0_8] : memref<32x32xbf16, #tpu.memory_space<vmem>>, vector<32x32xbf16>
    %cst = arith.constant dense<0.000000e+00> : vector<32x256xf32>
    %21 = tpu.matmul %20, %19, %cst {dimension_numbers = #tpu.dot_dimension_numbers<[1], [0], [0], [1], [0, 0, 1, 1], [], []>} : vector<32x32xbf16>, vector<32x256xbf16>, vector<32x256xf32> -> vector<32x256xf32>
    %c0_9 = arith.constant 0 : index
    %c0_10 = arith.constant 0 : index
    %22 = vector.load %arg3[%c0_9, %c0_10] : memref<32x1xf32, #tpu.memory_space<vmem>>, vector<32x1xf32>
    %23 = vector.broadcast %22 : vector<32x1xf32> to vector<32x256xf32>
    %24 = arith.addf %21, %23 : vector<32x256xf32>
    %cst_11 = arith.constant 0.000000e+00 : f32
    %25 = vector.broadcast %cst_11 : f32 to vector<32x256xf32>
    %26 = arith.maximumf %24, %25 : vector<32x256xf32>
    %27 = vector.extract_strided_slice %17 {offsets = [0, 0, 0], sizes = [1, 32, 32], strides = [1, 1, 1]} : vector<5x32x32xbf16> to vector<1x32x32xbf16>
    %28 = vector.shape_cast %27 : vector<1x32x32xbf16> to vector<32x32xbf16>
    %29 = arith.truncf %26 : vector<32x256xf32> to vector<32x256xbf16>
    %cst_12 = arith.constant dense<0.000000e+00> : vector<32x256xf32>
    %30 = tpu.matmul %28, %29, %cst_12 {dimension_numbers = #tpu.dot_dimension_numbers<[1], [0], [0], [1], [0, 0, 1, 1], [], []>} : vector<32x32xbf16>, vector<32x256xbf16>, vector<32x256xf32> -> vector<32x256xf32>
    %c0_13 = arith.constant 0 : index
    %c0_14 = arith.constant 0 : index
    %c68 = arith.constant 68 : index
    %31 = vector.load %arg1[%c0_13, %c0_14, %c68] : memref<1x32x460xbf16, #tpu.memory_space<vmem>>, vector<1x32x256xbf16>
    %32 = vector.shape_cast %31 : vector<1x32x256xbf16> to vector<32x256xbf16>
    %c0_15 = arith.constant 0 : index
    %c0_16 = arith.constant 0 : index
    %c0_17 = arith.constant 0 : index
    %33 = vector.load %arg4[%c0_15, %c0_16, %c0_17] : memref<27x32x32xbf16, #tpu.memory_space<vmem>>, vector<1x32x32xbf16>
    %34 = vector.shape_cast %33 : vector<1x32x32xbf16> to vector<32x32xbf16>
    %cst_18 = arith.constant dense<0.000000e+00> : vector<32x256xf32>
    %35 = tpu.matmul %34, %32, %cst_18 {dimension_numbers = #tpu.dot_dimension_numbers<[1], [0], [0], [1], [0, 0, 1, 1], [], []>} : vector<32x32xbf16>, vector<32x256xbf16>, vector<32x256xf32> -> vector<32x256xf32>
    %c-2_i32 = arith.constant -2 : i32
    %36 = vector.broadcast %c-2_i32 : i32 to vector<1x256xi32>
    %37 = arith.addi %16, %36 : vector<1x256xi32>
    %c0_i32_19 = arith.constant 0 : i32
    %38 = vector.broadcast %c0_i32_19 : i32 to vector<1x256xi32>
    %39 = arith.cmpi sge, %37, %38 : vector<1x256xi32>
    %c-2_i32_20 = arith.constant -2 : i32
    %40 = vector.broadcast %c-2_i32_20 : i32 to vector<1x256xi32>
    %41 = arith.addi %16, %40 : vector<1x256xi32>
    %c16_i32_21 = arith.constant 16 : i32
    %42 = vector.broadcast %c16_i32_21 : i32 to vector<1x256xi32>
    %43 = arith.cmpi slt, %41, %42 : vector<1x256xi32>
    %44 = arith.andi %39, %43 : vector<1x256xi1>
    %cst_22 = arith.constant 0.000000e+00 : f32
    %45 = vector.shape_cast %44 : vector<1x256xi1> to vector<1x256xi1>
    %46 = vector.broadcast %45 : vector<1x256xi1> to vector<32x256xi1>
    %47 = vector.broadcast %cst_22 : f32 to vector<32x256xf32>
    %48 = arith.select %46, %35, %47 : vector<32x256xi1>, vector<32x256xf32>
    %c0_23 = arith.constant 0 : index
    %c0_24 = arith.constant 0 : index
    %c70 = arith.constant 70 : index
    %49 = vector.load %arg1[%c0_23, %c0_24, %c70] : memref<1x32x460xbf16, #tpu.memory_space<vmem>>, vector<1x32x256xbf16>
    %50 = vector.shape_cast %49 : vector<1x32x256xbf16> to vector<32x256xbf16>
    %c1 = arith.constant 1 : index
    %c0_25 = arith.constant 0 : index
    %c0_26 = arith.constant 0 : index
    %51 = vector.load %arg4[%c1, %c0_25, %c0_26] : memref<27x32x32xbf16, #tpu.memory_space<vmem>>, vector<1x32x32xbf16>
    %52 = vector.shape_cast %51 : vector<1x32x32xbf16> to vector<32x32xbf16>
    %cst_27 = arith.constant dense<0.000000e+00> : vector<32x256xf32>
    %53 = tpu.matmul %52, %50, %cst_27 {dimension_numbers = #tpu.dot_dimension_numbers<[1], [0], [0], [1], [0, 0, 1, 1], [], []>} : vector<32x32xbf16>, vector<32x256xbf16>, vector<32x256xf32> -> vector<32x256xf32>
    %54 = arith.addf %48, %53 : vector<32x256xf32>
    %c0_28 = arith.constant 0 : index
    %c0_29 = arith.constant 0 : index
    %c72 = arith.constant 72 : index
    %55 = vector.load %arg1[%c0_28, %c0_29, %c72] : memref<1x32x460xbf16, #tpu.memory_space<vmem>>, vector<1x32x256xbf16>
    %56 = vector.shape_cast %55 : vector<1x32x256xbf16> to vector<32x256xbf16>
    %c2 = arith.constant 2 : index
    %c0_30 = arith.constant 0 : index
    %c0_31 = arith.constant 0 : index
    %57 = vector.load %arg4[%c2, %c0_30, %c0_31] : memref<27x32x32xbf16, #tpu.memory_space<vmem>>, vector<1x32x32xbf16>
    %58 = vector.shape_cast %57 : vector<1x32x32xbf16> to vector<32x32xbf16>
    %cst_32 = arith.constant dense<0.000000e+00> : vector<32x256xf32>
    %59 = tpu.matmul %58, %56, %cst_32 {dimension_numbers = #tpu.dot_dimension_numbers<[1], [0], [0], [1], [0, 0, 1, 1], [], []>} : vector<32x32xbf16>, vector<32x256xbf16>, vector<32x256xf32> -> vector<32x256xf32>
    %c2_i32 = arith.constant 2 : i32
    %60 = vector.broadcast %c2_i32 : i32 to vector<1x256xi32>
    %61 = arith.addi %16, %60 : vector<1x256xi32>
    %c0_i32_33 = arith.constant 0 : i32
    %62 = vector.broadcast %c0_i32_33 : i32 to vector<1x256xi32>
    %63 = arith.cmpi sge, %61, %62 : vector<1x256xi32>
    %c2_i32_34 = arith.constant 2 : i32
    %64 = vector.broadcast %c2_i32_34 : i32 to vector<1x256xi32>
    %65 = arith.addi %16, %64 : vector<1x256xi32>
    %c16_i32_35 = arith.constant 16 : i32
    %66 = vector.broadcast %c16_i32_35 : i32 to vector<1x256xi32>
    %67 = arith.cmpi slt, %65, %66 : vector<1x256xi32>
    %68 = arith.andi %63, %67 : vector<1x256xi1>
    %cst_36 = arith.constant 0.000000e+00 : f32
    %69 = vector.shape_cast %68 : vector<1x256xi1> to vector<1x256xi1>
    %70 = vector.broadcast %69 : vector<1x256xi1> to vector<32x256xi1>
    %71 = vector.broadcast %cst_36 : f32 to vector<32x256xf32>
    %72 = arith.select %70, %59, %71 : vector<32x256xi1>, vector<32x256xf32>
    %73 = arith.addf %54, %72 : vector<32x256xf32>
    %c0_37 = arith.constant 0 : index
    %c0_38 = arith.constant 0 : index
    %c100 = arith.constant 100 : index
    %74 = vector.load %arg1[%c0_37, %c0_38, %c100] : memref<1x32x460xbf16, #tpu.memory_space<vmem>>, vector<1x32x256xbf16>
    %75 = vector.shape_cast %74 : vector<1x32x256xbf16> to vector<32x256xbf16>
    %c3 = arith.constant 3 : index
    %c0_39 = arith.constant 0 : index
    %c0_40 = arith.constant 0 : index
    %76 = vector.load %arg4[%c3, %c0_39, %c0_40] : memref<27x32x32xbf16, #tpu.memory_space<vmem>>, vector<1x32x32xbf16>
    %77 = vector.shape_cast %76 : vector<1x32x32xbf16> to vector<32x32xbf16>
    %cst_41 = arith.constant dense<0.000000e+00> : vector<32x256xf32>
    %78 = tpu.matmul %77, %75, %cst_41 {dimension_numbers = #tpu.dot_dimension_numbers<[1], [0], [0], [1], [0, 0, 1, 1], [], []>} : vector<32x32xbf16>, vector<32x256xbf16>, vector<32x256xf32> -> vector<32x256xf32>
    %c-2_i32_42 = arith.constant -2 : i32
    %79 = vector.broadcast %c-2_i32_42 : i32 to vector<1x256xi32>
    %80 = arith.addi %16, %79 : vector<1x256xi32>
    %c0_i32_43 = arith.constant 0 : i32
    %81 = vector.broadcast %c0_i32_43 : i32 to vector<1x256xi32>
    %82 = arith.cmpi sge, %80, %81 : vector<1x256xi32>
    %c-2_i32_44 = arith.constant -2 : i32
    %83 = vector.broadcast %c-2_i32_44 : i32 to vector<1x256xi32>
    %84 = arith.addi %16, %83 : vector<1x256xi32>
    %c16_i32_45 = arith.constant 16 : i32
    %85 = vector.broadcast %c16_i32_45 : i32 to vector<1x256xi32>
    %86 = arith.cmpi slt, %84, %85 : vector<1x256xi32>
    %87 = arith.andi %82, %86 : vector<1x256xi1>
    %cst_46 = arith.constant 0.000000e+00 : f32
    %88 = vector.shape_cast %87 : vector<1x256xi1> to vector<1x256xi1>
    %89 = vector.broadcast %88 : vector<1x256xi1> to vector<32x256xi1>
    %90 = vector.broadcast %cst_46 : f32 to vector<32x256xf32>
    %91 = arith.select %89, %78, %90 : vector<32x256xi1>, vector<32x256xf32>
    %92 = arith.addf %73, %91 : vector<32x256xf32>
    %c0_47 = arith.constant 0 : index
    %c0_48 = arith.constant 0 : index
    %c102_49 = arith.constant 102 : index
    %93 = vector.load %arg1[%c0_47, %c0_48, %c102_49] : memref<1x32x460xbf16, #tpu.memory_space<vmem>>, vector<1x32x256xbf16>
    %94 = vector.shape_cast %93 : vector<1x32x256xbf16> to vector<32x256xbf16>
    %c4 = arith.constant 4 : index
    %c0_50 = arith.constant 0 : index
    %c0_51 = arith.constant 0 : index
    %95 = vector.load %arg4[%c4, %c0_50, %c0_51] : memref<27x32x32xbf16, #tpu.memory_space<vmem>>, vector<1x32x32xbf16>
    %96 = vector.shape_cast %95 : vector<1x32x32xbf16> to vector<32x32xbf16>
    %cst_52 = arith.constant dense<0.000000e+00> : vector<32x256xf32>
    %97 = tpu.matmul %96, %94, %cst_52 {dimension_numbers = #tpu.dot_dimension_numbers<[1], [0], [0], [1], [0, 0, 1, 1], [], []>} : vector<32x32xbf16>, vector<32x256xbf16>, vector<32x256xf32> -> vector<32x256xf32>
    %98 = arith.addf %92, %97 : vector<32x256xf32>
    %c0_53 = arith.constant 0 : index
    %c0_54 = arith.constant 0 : index
    %c104 = arith.constant 104 : index
    %99 = vector.load %arg1[%c0_53, %c0_54, %c104] : memref<1x32x460xbf16, #tpu.memory_space<vmem>>, vector<1x32x256xbf16>
    %100 = vector.shape_cast %99 : vector<1x32x256xbf16> to vector<32x256xbf16>
    %c5 = arith.constant 5 : index
    %c0_55 = arith.constant 0 : index
    %c0_56 = arith.constant 0 : index
    %101 = vector.load %arg4[%c5, %c0_55, %c0_56] : memref<27x32x32xbf16, #tpu.memory_space<vmem>>, vector<1x32x32xbf16>
    %102 = vector.shape_cast %101 : vector<1x32x32xbf16> to vector<32x32xbf16>
    %cst_57 = arith.constant dense<0.000000e+00> : vector<32x256xf32>
    %103 = tpu.matmul %102, %100, %cst_57 {dimension_numbers = #tpu.dot_dimension_numbers<[1], [0], [0], [1], [0, 0, 1, 1], [], []>} : vector<32x32xbf16>, vector<32x256xbf16>, vector<32x256xf32> -> vector<32x256xf32>
    %c2_i32_58 = arith.constant 2 : i32
    %104 = vector.broadcast %c2_i32_58 : i32 to vector<1x256xi32>
    %105 = arith.addi %16, %104 : vector<1x256xi32>
    %c0_i32_59 = arith.constant 0 : i32
    %106 = vector.broadcast %c0_i32_59 : i32 to vector<1x256xi32>
    %107 = arith.cmpi sge, %105, %106 : vector<1x256xi32>
    %c2_i32_60 = arith.constant 2 : i32
    %108 = vector.broadcast %c2_i32_60 : i32 to vector<1x256xi32>
    %109 = arith.addi %16, %108 : vector<1x256xi32>
    %c16_i32_61 = arith.constant 16 : i32
    %110 = vector.broadcast %c16_i32_61 : i32 to vector<1x256xi32>
    %111 = arith.cmpi slt, %109, %110 : vector<1x256xi32>
    %112 = arith.andi %107, %111 : vector<1x256xi1>
    %cst_62 = arith.constant 0.000000e+00 : f32
    %113 = vector.shape_cast %112 : vector<1x256xi1> to vector<1x256xi1>
    %114 = vector.broadcast %113 : vector<1x256xi1> to vector<32x256xi1>
    %115 = vector.broadcast %cst_62 : f32 to vector<32x256xf32>
    %116 = arith.select %114, %103, %115 : vector<32x256xi1>, vector<32x256xf32>
    %117 = arith.addf %98, %116 : vector<32x256xf32>
    %c0_63 = arith.constant 0 : index
    %c0_64 = arith.constant 0 : index
    %c132 = arith.constant 132 : index
    %118 = vector.load %arg1[%c0_63, %c0_64, %c132] : memref<1x32x460xbf16, #tpu.memory_space<vmem>>, vector<1x32x256xbf16>
    %119 = vector.shape_cast %118 : vector<1x32x256xbf16> to vector<32x256xbf16>
    %c6 = arith.constant 6 : index
    %c0_65 = arith.constant 0 : index
    %c0_66 = arith.constant 0 : index
    %120 = vector.load %arg4[%c6, %c0_65, %c0_66] : memref<27x32x32xbf16, #tpu.memory_space<vmem>>, vector<1x32x32xbf16>
    %121 = vector.shape_cast %120 : vector<1x32x32xbf16> to vector<32x32xbf16>
    %cst_67 = arith.constant dense<0.000000e+00> : vector<32x256xf32>
    %122 = tpu.matmul %121, %119, %cst_67 {dimension_numbers = #tpu.dot_dimension_numbers<[1], [0], [0], [1], [0, 0, 1, 1], [], []>} : vector<32x32xbf16>, vector<32x256xbf16>, vector<32x256xf32> -> vector<32x256xf32>
    %c-2_i32_68 = arith.constant -2 : i32
    %123 = vector.broadcast %c-2_i32_68 : i32 to vector<1x256xi32>
    %124 = arith.addi %16, %123 : vector<1x256xi32>
    %c0_i32_69 = arith.constant 0 : i32
    %125 = vector.broadcast %c0_i32_69 : i32 to vector<1x256xi32>
    %126 = arith.cmpi sge, %124, %125 : vector<1x256xi32>
    %c-2_i32_70 = arith.constant -2 : i32
    %127 = vector.broadcast %c-2_i32_70 : i32 to vector<1x256xi32>
    %128 = arith.addi %16, %127 : vector<1x256xi32>
    %c16_i32_71 = arith.constant 16 : i32
    %129 = vector.broadcast %c16_i32_71 : i32 to vector<1x256xi32>
    %130 = arith.cmpi slt, %128, %129 : vector<1x256xi32>
    %131 = arith.andi %126, %130 : vector<1x256xi1>
    %cst_72 = arith.constant 0.000000e+00 : f32
    %132 = vector.shape_cast %131 : vector<1x256xi1> to vector<1x256xi1>
    %133 = vector.broadcast %132 : vector<1x256xi1> to vector<32x256xi1>
    %134 = vector.broadcast %cst_72 : f32 to vector<32x256xf32>
    %135 = arith.select %133, %122, %134 : vector<32x256xi1>, vector<32x256xf32>
    %136 = arith.addf %117, %135 : vector<32x256xf32>
    %c0_73 = arith.constant 0 : index
    %c0_74 = arith.constant 0 : index
    %c134 = arith.constant 134 : index
    %137 = vector.load %arg1[%c0_73, %c0_74, %c134] : memref<1x32x460xbf16, #tpu.memory_space<vmem>>, vector<1x32x256xbf16>
    %138 = vector.shape_cast %137 : vector<1x32x256xbf16> to vector<32x256xbf16>
    %c7 = arith.constant 7 : index
    %c0_75 = arith.constant 0 : index
    %c0_76 = arith.constant 0 : index
    %139 = vector.load %arg4[%c7, %c0_75, %c0_76] : memref<27x32x32xbf16, #tpu.memory_space<vmem>>, vector<1x32x32xbf16>
    %140 = vector.shape_cast %139 : vector<1x32x32xbf16> to vector<32x32xbf16>
    %cst_77 = arith.constant dense<0.000000e+00> : vector<32x256xf32>
    %141 = tpu.matmul %140, %138, %cst_77 {dimension_numbers = #tpu.dot_dimension_numbers<[1], [0], [0], [1], [0, 0, 1, 1], [], []>} : vector<32x32xbf16>, vector<32x256xbf16>, vector<32x256xf32> -> vector<32x256xf32>
    %142 = arith.addf %136, %141 : vector<32x256xf32>
    %c0_78 = arith.constant 0 : index
    %c0_79 = arith.constant 0 : index
    %c136 = arith.constant 136 : index
    %143 = vector.load %arg1[%c0_78, %c0_79, %c136] : memref<1x32x460xbf16, #tpu.memory_space<vmem>>, vector<1x32x256xbf16>
    %144 = vector.shape_cast %143 : vector<1x32x256xbf16> to vector<32x256xbf16>
    %c8 = arith.constant 8 : index
    %c0_80 = arith.constant 0 : index
    %c0_81 = arith.constant 0 : index
    %145 = vector.load %arg4[%c8, %c0_80, %c0_81] : memref<27x32x32xbf16, #tpu.memory_space<vmem>>, vector<1x32x32xbf16>
    %146 = vector.shape_cast %145 : vector<1x32x32xbf16> to vector<32x32xbf16>
    %cst_82 = arith.constant dense<0.000000e+00> : vector<32x256xf32>
    %147 = tpu.matmul %146, %144, %cst_82 {dimension_numbers = #tpu.dot_dimension_numbers<[1], [0], [0], [1], [0, 0, 1, 1], [], []>} : vector<32x32xbf16>, vector<32x256xbf16>, vector<32x256xf32> -> vector<32x256xf32>
    %c2_i32_83 = arith.constant 2 : i32
    %148 = vector.broadcast %c2_i32_83 : i32 to vector<1x256xi32>
    %149 = arith.addi %16, %148 : vector<1x256xi32>
    %c0_i32_84 = arith.constant 0 : i32
    %150 = vector.broadcast %c0_i32_84 : i32 to vector<1x256xi32>
    %151 = arith.cmpi sge, %149, %150 : vector<1x256xi32>
    %c2_i32_85 = arith.constant 2 : i32
    %152 = vector.broadcast %c2_i32_85 : i32 to vector<1x256xi32>
    %153 = arith.addi %16, %152 : vector<1x256xi32>
    %c16_i32_86 = arith.constant 16 : i32
    %154 = vector.broadcast %c16_i32_86 : i32 to vector<1x256xi32>
    %155 = arith.cmpi slt, %153, %154 : vector<1x256xi32>
    %156 = arith.andi %151, %155 : vector<1x256xi1>
    %cst_87 = arith.constant 0.000000e+00 : f32
    %157 = vector.shape_cast %156 : vector<1x256xi1> to vector<1x256xi1>
    %158 = vector.broadcast %157 : vector<1x256xi1> to vector<32x256xi1>
    %159 = vector.broadcast %cst_87 : f32 to vector<32x256xf32>
    %160 = arith.select %158, %147, %159 : vector<32x256xi1>, vector<32x256xf32>
    %161 = arith.addf %142, %160 : vector<32x256xf32>
    %c0_88 = arith.constant 0 : index
    %c0_89 = arith.constant 0 : index
    %c0_90 = arith.constant 0 : index
    %162 = vector.load %arg5[%c0_88, %c0_89, %c0_90] : memref<3x32x1xf32, #tpu.memory_space<vmem>>, vector<1x32x1xf32>
    %163 = vector.shape_cast %162 : vector<1x32x1xf32> to vector<32x1xf32>
    %164 = vector.broadcast %163 : vector<32x1xf32> to vector<32x256xf32>
    %165 = arith.addf %161, %164 : vector<32x256xf32>
    %cst_91 = arith.constant 0.000000e+00 : f32
    %166 = vector.broadcast %cst_91 : f32 to vector<32x256xf32>
    %167 = arith.maximumf %165, %166 : vector<32x256xf32>
    %168 = vector.extract_strided_slice %17 {offsets = [1, 0, 0], sizes = [1, 32, 32], strides = [1, 1, 1]} : vector<5x32x32xbf16> to vector<1x32x32xbf16>
    %169 = vector.shape_cast %168 : vector<1x32x32xbf16> to vector<32x32xbf16>
    %170 = arith.truncf %167 : vector<32x256xf32> to vector<32x256xbf16>
    %cst_92 = arith.constant dense<0.000000e+00> : vector<32x256xf32>
    %171 = tpu.matmul %169, %170, %cst_92 {dimension_numbers = #tpu.dot_dimension_numbers<[1], [0], [0], [1], [0, 0, 1, 1], [], []>} : vector<32x32xbf16>, vector<32x256xbf16>, vector<32x256xf32> -> vector<32x256xf32>
    %172 = arith.addf %30, %171 : vector<32x256xf32>
    %c0_93 = arith.constant 0 : index
    %c0_94 = arith.constant 0 : index
    %c34 = arith.constant 34 : index
    %173 = vector.load %arg1[%c0_93, %c0_94, %c34] : memref<1x32x460xbf16, #tpu.memory_space<vmem>>, vector<1x32x256xbf16>
    %174 = vector.shape_cast %173 : vector<1x32x256xbf16> to vector<32x256xbf16>
    %c9 = arith.constant 9 : index
    %c0_95 = arith.constant 0 : index
    %c0_96 = arith.constant 0 : index
    %175 = vector.load %arg4[%c9, %c0_95, %c0_96] : memref<27x32x32xbf16, #tpu.memory_space<vmem>>, vector<1x32x32xbf16>
    %176 = vector.shape_cast %175 : vector<1x32x32xbf16> to vector<32x32xbf16>
    %cst_97 = arith.constant dense<0.000000e+00> : vector<32x256xf32>
    %177 = tpu.matmul %176, %174, %cst_97 {dimension_numbers = #tpu.dot_dimension_numbers<[1], [0], [0], [1], [0, 0, 1, 1], [], []>} : vector<32x32xbf16>, vector<32x256xbf16>, vector<32x256xf32> -> vector<32x256xf32>
    %c-4_i32 = arith.constant -4 : i32
    %178 = vector.broadcast %c-4_i32 : i32 to vector<1x256xi32>
    %179 = arith.addi %16, %178 : vector<1x256xi32>
    %c0_i32_98 = arith.constant 0 : i32
    %180 = vector.broadcast %c0_i32_98 : i32 to vector<1x256xi32>
    %181 = arith.cmpi sge, %179, %180 : vector<1x256xi32>
    %c-4_i32_99 = arith.constant -4 : i32
    %182 = vector.broadcast %c-4_i32_99 : i32 to vector<1x256xi32>
    %183 = arith.addi %16, %182 : vector<1x256xi32>
    %c16_i32_100 = arith.constant 16 : i32
    %184 = vector.broadcast %c16_i32_100 : i32 to vector<1x256xi32>
    %185 = arith.cmpi slt, %183, %184 : vector<1x256xi32>
    %186 = arith.andi %181, %185 : vector<1x256xi1>
    %cst_101 = arith.constant 0.000000e+00 : f32
    %187 = vector.shape_cast %186 : vector<1x256xi1> to vector<1x256xi1>
    %188 = vector.broadcast %187 : vector<1x256xi1> to vector<32x256xi1>
    %189 = vector.broadcast %cst_101 : f32 to vector<32x256xf32>
    %190 = arith.select %188, %177, %189 : vector<32x256xi1>, vector<32x256xf32>
    %c0_102 = arith.constant 0 : index
    %c0_103 = arith.constant 0 : index
    %c38 = arith.constant 38 : index
    %191 = vector.load %arg1[%c0_102, %c0_103, %c38] : memref<1x32x460xbf16, #tpu.memory_space<vmem>>, vector<1x32x256xbf16>
    %192 = vector.shape_cast %191 : vector<1x32x256xbf16> to vector<32x256xbf16>
    %c10 = arith.constant 10 : index
    %c0_104 = arith.constant 0 : index
    %c0_105 = arith.constant 0 : index
    %193 = vector.load %arg4[%c10, %c0_104, %c0_105] : memref<27x32x32xbf16, #tpu.memory_space<vmem>>, vector<1x32x32xbf16>
    %194 = vector.shape_cast %193 : vector<1x32x32xbf16> to vector<32x32xbf16>
    %cst_106 = arith.constant dense<0.000000e+00> : vector<32x256xf32>
    %195 = tpu.matmul %194, %192, %cst_106 {dimension_numbers = #tpu.dot_dimension_numbers<[1], [0], [0], [1], [0, 0, 1, 1], [], []>} : vector<32x32xbf16>, vector<32x256xbf16>, vector<32x256xf32> -> vector<32x256xf32>
    %196 = arith.addf %190, %195 : vector<32x256xf32>
    %c0_107 = arith.constant 0 : index
    %c0_108 = arith.constant 0 : index
    %c42 = arith.constant 42 : index
    %197 = vector.load %arg1[%c0_107, %c0_108, %c42] : memref<1x32x460xbf16, #tpu.memory_space<vmem>>, vector<1x32x256xbf16>
    %198 = vector.shape_cast %197 : vector<1x32x256xbf16> to vector<32x256xbf16>
    %c11 = arith.constant 11 : index
    %c0_109 = arith.constant 0 : index
    %c0_110 = arith.constant 0 : index
    %199 = vector.load %arg4[%c11, %c0_109, %c0_110] : memref<27x32x32xbf16, #tpu.memory_space<vmem>>, vector<1x32x32xbf16>
    %200 = vector.shape_cast %199 : vector<1x32x32xbf16> to vector<32x32xbf16>
    %cst_111 = arith.constant dense<0.000000e+00> : vector<32x256xf32>
    %201 = tpu.matmul %200, %198, %cst_111 {dimension_numbers = #tpu.dot_dimension_numbers<[1], [0], [0], [1], [0, 0, 1, 1], [], []>} : vector<32x32xbf16>, vector<32x256xbf16>, vector<32x256xf32> -> vector<32x256xf32>
    %c4_i32 = arith.constant 4 : i32
    %202 = vector.broadcast %c4_i32 : i32 to vector<1x256xi32>
    %203 = arith.addi %16, %202 : vector<1x256xi32>
    %c0_i32_112 = arith.constant 0 : i32
    %204 = vector.broadcast %c0_i32_112 : i32 to vector<1x256xi32>
    %205 = arith.cmpi sge, %203, %204 : vector<1x256xi32>
    %c4_i32_113 = arith.constant 4 : i32
    %206 = vector.broadcast %c4_i32_113 : i32 to vector<1x256xi32>
    %207 = arith.addi %16, %206 : vector<1x256xi32>
    %c16_i32_114 = arith.constant 16 : i32
    %208 = vector.broadcast %c16_i32_114 : i32 to vector<1x256xi32>
    %209 = arith.cmpi slt, %207, %208 : vector<1x256xi32>
    %210 = arith.andi %205, %209 : vector<1x256xi1>
    %cst_115 = arith.constant 0.000000e+00 : f32
    %211 = vector.shape_cast %210 : vector<1x256xi1> to vector<1x256xi1>
    %212 = vector.broadcast %211 : vector<1x256xi1> to vector<32x256xi1>
    %213 = vector.broadcast %cst_115 : f32 to vector<32x256xf32>
    %214 = arith.select %212, %201, %213 : vector<32x256xi1>, vector<32x256xf32>
    %215 = arith.addf %196, %214 : vector<32x256xf32>
    %c0_116 = arith.constant 0 : index
    %c0_117 = arith.constant 0 : index
    %c98 = arith.constant 98 : index
    %216 = vector.load %arg1[%c0_116, %c0_117, %c98] : memref<1x32x460xbf16, #tpu.memory_space<vmem>>, vector<1x32x256xbf16>
    %217 = vector.shape_cast %216 : vector<1x32x256xbf16> to vector<32x256xbf16>
    %c12 = arith.constant 12 : index
    %c0_118 = arith.constant 0 : index
    %c0_119 = arith.constant 0 : index
    %218 = vector.load %arg4[%c12, %c0_118, %c0_119] : memref<27x32x32xbf16, #tpu.memory_space<vmem>>, vector<1x32x32xbf16>
    %219 = vector.shape_cast %218 : vector<1x32x32xbf16> to vector<32x32xbf16>
    %cst_120 = arith.constant dense<0.000000e+00> : vector<32x256xf32>
    %220 = tpu.matmul %219, %217, %cst_120 {dimension_numbers = #tpu.dot_dimension_numbers<[1], [0], [0], [1], [0, 0, 1, 1], [], []>} : vector<32x32xbf16>, vector<32x256xbf16>, vector<32x256xf32> -> vector<32x256xf32>
    %c-4_i32_121 = arith.constant -4 : i32
    %221 = vector.broadcast %c-4_i32_121 : i32 to vector<1x256xi32>
    %222 = arith.addi %16, %221 : vector<1x256xi32>
    %c0_i32_122 = arith.constant 0 : i32
    %223 = vector.broadcast %c0_i32_122 : i32 to vector<1x256xi32>
    %224 = arith.cmpi sge, %222, %223 : vector<1x256xi32>
    %c-4_i32_123 = arith.constant -4 : i32
    %225 = vector.broadcast %c-4_i32_123 : i32 to vector<1x256xi32>
    %226 = arith.addi %16, %225 : vector<1x256xi32>
    %c16_i32_124 = arith.constant 16 : i32
    %227 = vector.broadcast %c16_i32_124 : i32 to vector<1x256xi32>
    %228 = arith.cmpi slt, %226, %227 : vector<1x256xi32>
    %229 = arith.andi %224, %228 : vector<1x256xi1>
    %cst_125 = arith.constant 0.000000e+00 : f32
    %230 = vector.shape_cast %229 : vector<1x256xi1> to vector<1x256xi1>
    %231 = vector.broadcast %230 : vector<1x256xi1> to vector<32x256xi1>
    %232 = vector.broadcast %cst_125 : f32 to vector<32x256xf32>
    %233 = arith.select %231, %220, %232 : vector<32x256xi1>, vector<32x256xf32>
    %234 = arith.addf %215, %233 : vector<32x256xf32>
    %c0_126 = arith.constant 0 : index
    %c0_127 = arith.constant 0 : index
    %c102_128 = arith.constant 102 : index
    %235 = vector.load %arg1[%c0_126, %c0_127, %c102_128] : memref<1x32x460xbf16, #tpu.memory_space<vmem>>, vector<1x32x256xbf16>
    %236 = vector.shape_cast %235 : vector<1x32x256xbf16> to vector<32x256xbf16>
    %c13 = arith.constant 13 : index
    %c0_129 = arith.constant 0 : index
    %c0_130 = arith.constant 0 : index
    %237 = vector.load %arg4[%c13, %c0_129, %c0_130] : memref<27x32x32xbf16, #tpu.memory_space<vmem>>, vector<1x32x32xbf16>
    %238 = vector.shape_cast %237 : vector<1x32x32xbf16> to vector<32x32xbf16>
    %cst_131 = arith.constant dense<0.000000e+00> : vector<32x256xf32>
    %239 = tpu.matmul %238, %236, %cst_131 {dimension_numbers = #tpu.dot_dimension_numbers<[1], [0], [0], [1], [0, 0, 1, 1], [], []>} : vector<32x32xbf16>, vector<32x256xbf16>, vector<32x256xf32> -> vector<32x256xf32>
    %240 = arith.addf %234, %239 : vector<32x256xf32>
    %c0_132 = arith.constant 0 : index
    %c0_133 = arith.constant 0 : index
    %c106 = arith.constant 106 : index
    %241 = vector.load %arg1[%c0_132, %c0_133, %c106] : memref<1x32x460xbf16, #tpu.memory_space<vmem>>, vector<1x32x256xbf16>
    %242 = vector.shape_cast %241 : vector<1x32x256xbf16> to vector<32x256xbf16>
    %c14 = arith.constant 14 : index
    %c0_134 = arith.constant 0 : index
    %c0_135 = arith.constant 0 : index
    %243 = vector.load %arg4[%c14, %c0_134, %c0_135] : memref<27x32x32xbf16, #tpu.memory_space<vmem>>, vector<1x32x32xbf16>
    %244 = vector.shape_cast %243 : vector<1x32x32xbf16> to vector<32x32xbf16>
    %cst_136 = arith.constant dense<0.000000e+00> : vector<32x256xf32>
    %245 = tpu.matmul %244, %242, %cst_136 {dimension_numbers = #tpu.dot_dimension_numbers<[1], [0], [0], [1], [0, 0, 1, 1], [], []>} : vector<32x32xbf16>, vector<32x256xbf16>, vector<32x256xf32> -> vector<32x256xf32>
    %c4_i32_137 = arith.constant 4 : i32
    %246 = vector.broadcast %c4_i32_137 : i32 to vector<1x256xi32>
    %247 = arith.addi %16, %246 : vector<1x256xi32>
    %c0_i32_138 = arith.constant 0 : i32
    %248 = vector.broadcast %c0_i32_138 : i32 to vector<1x256xi32>
    %249 = arith.cmpi sge, %247, %248 : vector<1x256xi32>
    %c4_i32_139 = arith.constant 4 : i32
    %250 = vector.broadcast %c4_i32_139 : i32 to vector<1x256xi32>
    %251 = arith.addi %16, %250 : vector<1x256xi32>
    %c16_i32_140 = arith.constant 16 : i32
    %252 = vector.broadcast %c16_i32_140 : i32 to vector<1x256xi32>
    %253 = arith.cmpi slt, %251, %252 : vector<1x256xi32>
    %254 = arith.andi %249, %253 : vector<1x256xi1>
    %cst_141 = arith.constant 0.000000e+00 : f32
    %255 = vector.shape_cast %254 : vector<1x256xi1> to vector<1x256xi1>
    %256 = vector.broadcast %255 : vector<1x256xi1> to vector<32x256xi1>
    %257 = vector.broadcast %cst_141 : f32 to vector<32x256xf32>
    %258 = arith.select %256, %245, %257 : vector<32x256xi1>, vector<32x256xf32>
    %259 = arith.addf %240, %258 : vector<32x256xf32>
    %c0_142 = arith.constant 0 : index
    %c0_143 = arith.constant 0 : index
    %c162 = arith.constant 162 : index
    %260 = vector.load %arg1[%c0_142, %c0_143, %c162] : memref<1x32x460xbf16, #tpu.memory_space<vmem>>, vector<1x32x256xbf16>
    %261 = vector.shape_cast %260 : vector<1x32x256xbf16> to vector<32x256xbf16>
    %c15 = arith.constant 15 : index
    %c0_144 = arith.constant 0 : index
    %c0_145 = arith.constant 0 : index
    %262 = vector.load %arg4[%c15, %c0_144, %c0_145] : memref<27x32x32xbf16, #tpu.memory_space<vmem>>, vector<1x32x32xbf16>
    %263 = vector.shape_cast %262 : vector<1x32x32xbf16> to vector<32x32xbf16>
    %cst_146 = arith.constant dense<0.000000e+00> : vector<32x256xf32>
    %264 = tpu.matmul %263, %261, %cst_146 {dimension_numbers = #tpu.dot_dimension_numbers<[1], [0], [0], [1], [0, 0, 1, 1], [], []>} : vector<32x32xbf16>, vector<32x256xbf16>, vector<32x256xf32> -> vector<32x256xf32>
    %c-4_i32_147 = arith.constant -4 : i32
    %265 = vector.broadcast %c-4_i32_147 : i32 to vector<1x256xi32>
    %266 = arith.addi %16, %265 : vector<1x256xi32>
    %c0_i32_148 = arith.constant 0 : i32
    %267 = vector.broadcast %c0_i32_148 : i32 to vector<1x256xi32>
    %268 = arith.cmpi sge, %266, %267 : vector<1x256xi32>
    %c-4_i32_149 = arith.constant -4 : i32
    %269 = vector.broadcast %c-4_i32_149 : i32 to vector<1x256xi32>
    %270 = arith.addi %16, %269 : vector<1x256xi32>
    %c16_i32_150 = arith.constant 16 : i32
    %271 = vector.broadcast %c16_i32_150 : i32 to vector<1x256xi32>
    %272 = arith.cmpi slt, %270, %271 : vector<1x256xi32>
    %273 = arith.andi %268, %272 : vector<1x256xi1>
    %cst_151 = arith.constant 0.000000e+00 : f32
    %274 = vector.shape_cast %273 : vector<1x256xi1> to vector<1x256xi1>
    %275 = vector.broadcast %274 : vector<1x256xi1> to vector<32x256xi1>
    %276 = vector.broadcast %cst_151 : f32 to vector<32x256xf32>
    %277 = arith.select %275, %264, %276 : vector<32x256xi1>, vector<32x256xf32>
    %278 = arith.addf %259, %277 : vector<32x256xf32>
    %c0_152 = arith.constant 0 : index
    %c0_153 = arith.constant 0 : index
    %c166 = arith.constant 166 : index
    %279 = vector.load %arg1[%c0_152, %c0_153, %c166] : memref<1x32x460xbf16, #tpu.memory_space<vmem>>, vector<1x32x256xbf16>
    %280 = vector.shape_cast %279 : vector<1x32x256xbf16> to vector<32x256xbf16>
    %c16 = arith.constant 16 : index
    %c0_154 = arith.constant 0 : index
    %c0_155 = arith.constant 0 : index
    %281 = vector.load %arg4[%c16, %c0_154, %c0_155] : memref<27x32x32xbf16, #tpu.memory_space<vmem>>, vector<1x32x32xbf16>
    %282 = vector.shape_cast %281 : vector<1x32x32xbf16> to vector<32x32xbf16>
    %cst_156 = arith.constant dense<0.000000e+00> : vector<32x256xf32>
    %283 = tpu.matmul %282, %280, %cst_156 {dimension_numbers = #tpu.dot_dimension_numbers<[1], [0], [0], [1], [0, 0, 1, 1], [], []>} : vector<32x32xbf16>, vector<32x256xbf16>, vector<32x256xf32> -> vector<32x256xf32>
    %284 = arith.addf %278, %283 : vector<32x256xf32>
    %c0_157 = arith.constant 0 : index
    %c0_158 = arith.constant 0 : index
    %c170 = arith.constant 170 : index
    %285 = vector.load %arg1[%c0_157, %c0_158, %c170] : memref<1x32x460xbf16, #tpu.memory_space<vmem>>, vector<1x32x256xbf16>
    %286 = vector.shape_cast %285 : vector<1x32x256xbf16> to vector<32x256xbf16>
    %c17 = arith.constant 17 : index
    %c0_159 = arith.constant 0 : index
    %c0_160 = arith.constant 0 : index
    %287 = vector.load %arg4[%c17, %c0_159, %c0_160] : memref<27x32x32xbf16, #tpu.memory_space<vmem>>, vector<1x32x32xbf16>
    %288 = vector.shape_cast %287 : vector<1x32x32xbf16> to vector<32x32xbf16>
    %cst_161 = arith.constant dense<0.000000e+00> : vector<32x256xf32>
    %289 = tpu.matmul %288, %286, %cst_161 {dimension_numbers = #tpu.dot_dimension_numbers<[1], [0], [0], [1], [0, 0, 1, 1], [], []>} : vector<32x32xbf16>, vector<32x256xbf16>, vector<32x256xf32> -> vector<32x256xf32>
    %c4_i32_162 = arith.constant 4 : i32
    %290 = vector.broadcast %c4_i32_162 : i32 to vector<1x256xi32>
    %291 = arith.addi %16, %290 : vector<1x256xi32>
    %c0_i32_163 = arith.constant 0 : i32
    %292 = vector.broadcast %c0_i32_163 : i32 to vector<1x256xi32>
    %293 = arith.cmpi sge, %291, %292 : vector<1x256xi32>
    %c4_i32_164 = arith.constant 4 : i32
    %294 = vector.broadcast %c4_i32_164 : i32 to vector<1x256xi32>
    %295 = arith.addi %16, %294 : vector<1x256xi32>
    %c16_i32_165 = arith.constant 16 : i32
    %296 = vector.broadcast %c16_i32_165 : i32 to vector<1x256xi32>
    %297 = arith.cmpi slt, %295, %296 : vector<1x256xi32>
    %298 = arith.andi %293, %297 : vector<1x256xi1>
    %cst_166 = arith.constant 0.000000e+00 : f32
    %299 = vector.shape_cast %298 : vector<1x256xi1> to vector<1x256xi1>
    %300 = vector.broadcast %299 : vector<1x256xi1> to vector<32x256xi1>
    %301 = vector.broadcast %cst_166 : f32 to vector<32x256xf32>
    %302 = arith.select %300, %289, %301 : vector<32x256xi1>, vector<32x256xf32>
    %303 = arith.addf %284, %302 : vector<32x256xf32>
    %c1_167 = arith.constant 1 : index
    %c0_168 = arith.constant 0 : index
    %c0_169 = arith.constant 0 : index
    %304 = vector.load %arg5[%c1_167, %c0_168, %c0_169] : memref<3x32x1xf32, #tpu.memory_space<vmem>>, vector<1x32x1xf32>
    %305 = vector.shape_cast %304 : vector<1x32x1xf32> to vector<32x1xf32>
    %306 = vector.broadcast %305 : vector<32x1xf32> to vector<32x256xf32>
    %307 = arith.addf %303, %306 : vector<32x256xf32>
    %cst_170 = arith.constant 0.000000e+00 : f32
    %308 = vector.broadcast %cst_170 : f32 to vector<32x256xf32>
    %309 = arith.maximumf %307, %308 : vector<32x256xf32>
    %310 = vector.extract_strided_slice %17 {offsets = [2, 0, 0], sizes = [1, 32, 32], strides = [1, 1, 1]} : vector<5x32x32xbf16> to vector<1x32x32xbf16>
    %311 = vector.shape_cast %310 : vector<1x32x32xbf16> to vector<32x32xbf16>
    %312 = arith.truncf %309 : vector<32x256xf32> to vector<32x256xbf16>
    %cst_171 = arith.constant dense<0.000000e+00> : vector<32x256xf32>
    %313 = tpu.matmul %311, %312, %cst_171 {dimension_numbers = #tpu.dot_dimension_numbers<[1], [0], [0], [1], [0, 0, 1, 1], [], []>} : vector<32x32xbf16>, vector<32x256xbf16>, vector<32x256xf32> -> vector<32x256xf32>
    %314 = arith.addf %172, %313 : vector<32x256xf32>
    %c0_172 = arith.constant 0 : index
    %c0_173 = arith.constant 0 : index
    %c0_174 = arith.constant 0 : index
    %315 = vector.load %arg1[%c0_172, %c0_173, %c0_174] : memref<1x32x460xbf16, #tpu.memory_space<vmem>>, vector<1x32x256xbf16>
    %316 = vector.shape_cast %315 : vector<1x32x256xbf16> to vector<32x256xbf16>
    %c18 = arith.constant 18 : index
    %c0_175 = arith.constant 0 : index
    %c0_176 = arith.constant 0 : index
    %317 = vector.load %arg4[%c18, %c0_175, %c0_176] : memref<27x32x32xbf16, #tpu.memory_space<vmem>>, vector<1x32x32xbf16>
    %318 = vector.shape_cast %317 : vector<1x32x32xbf16> to vector<32x32xbf16>
    %cst_177 = arith.constant dense<0.000000e+00> : vector<32x256xf32>
    %319 = tpu.matmul %318, %316, %cst_177 {dimension_numbers = #tpu.dot_dimension_numbers<[1], [0], [0], [1], [0, 0, 1, 1], [], []>} : vector<32x32xbf16>, vector<32x256xbf16>, vector<32x256xf32> -> vector<32x256xf32>
    %c-6_i32 = arith.constant -6 : i32
    %320 = vector.broadcast %c-6_i32 : i32 to vector<1x256xi32>
    %321 = arith.addi %16, %320 : vector<1x256xi32>
    %c0_i32_178 = arith.constant 0 : i32
    %322 = vector.broadcast %c0_i32_178 : i32 to vector<1x256xi32>
    %323 = arith.cmpi sge, %321, %322 : vector<1x256xi32>
    %c-6_i32_179 = arith.constant -6 : i32
    %324 = vector.broadcast %c-6_i32_179 : i32 to vector<1x256xi32>
    %325 = arith.addi %16, %324 : vector<1x256xi32>
    %c16_i32_180 = arith.constant 16 : i32
    %326 = vector.broadcast %c16_i32_180 : i32 to vector<1x256xi32>
    %327 = arith.cmpi slt, %325, %326 : vector<1x256xi32>
    %328 = arith.andi %323, %327 : vector<1x256xi1>
    %cst_181 = arith.constant 0.000000e+00 : f32
    %329 = vector.shape_cast %328 : vector<1x256xi1> to vector<1x256xi1>
    %330 = vector.broadcast %329 : vector<1x256xi1> to vector<32x256xi1>
    %331 = vector.broadcast %cst_181 : f32 to vector<32x256xf32>
    %332 = arith.select %330, %319, %331 : vector<32x256xi1>, vector<32x256xf32>
    %c0_182 = arith.constant 0 : index
    %c0_183 = arith.constant 0 : index
    %c6_184 = arith.constant 6 : index
    %333 = vector.load %arg1[%c0_182, %c0_183, %c6_184] : memref<1x32x460xbf16, #tpu.memory_space<vmem>>, vector<1x32x256xbf16>
    %334 = vector.shape_cast %333 : vector<1x32x256xbf16> to vector<32x256xbf16>
    %c19 = arith.constant 19 : index
    %c0_185 = arith.constant 0 : index
    %c0_186 = arith.constant 0 : index
    %335 = vector.load %arg4[%c19, %c0_185, %c0_186] : memref<27x32x32xbf16, #tpu.memory_space<vmem>>, vector<1x32x32xbf16>
    %336 = vector.shape_cast %335 : vector<1x32x32xbf16> to vector<32x32xbf16>
    %cst_187 = arith.constant dense<0.000000e+00> : vector<32x256xf32>
    %337 = tpu.matmul %336, %334, %cst_187 {dimension_numbers = #tpu.dot_dimension_numbers<[1], [0], [0], [1], [0, 0, 1, 1], [], []>} : vector<32x32xbf16>, vector<32x256xbf16>, vector<32x256xf32> -> vector<32x256xf32>
    %338 = arith.addf %332, %337 : vector<32x256xf32>
    %c0_188 = arith.constant 0 : index
    %c0_189 = arith.constant 0 : index
    %c12_190 = arith.constant 12 : index
    %339 = vector.load %arg1[%c0_188, %c0_189, %c12_190] : memref<1x32x460xbf16, #tpu.memory_space<vmem>>, vector<1x32x256xbf16>
    %340 = vector.shape_cast %339 : vector<1x32x256xbf16> to vector<32x256xbf16>
    %c20 = arith.constant 20 : index
    %c0_191 = arith.constant 0 : index
    %c0_192 = arith.constant 0 : index
    %341 = vector.load %arg4[%c20, %c0_191, %c0_192] : memref<27x32x32xbf16, #tpu.memory_space<vmem>>, vector<1x32x32xbf16>
    %342 = vector.shape_cast %341 : vector<1x32x32xbf16> to vector<32x32xbf16>
    %cst_193 = arith.constant dense<0.000000e+00> : vector<32x256xf32>
    %343 = tpu.matmul %342, %340, %cst_193 {dimension_numbers = #tpu.dot_dimension_numbers<[1], [0], [0], [1], [0, 0, 1, 1], [], []>} : vector<32x32xbf16>, vector<32x256xbf16>, vector<32x256xf32> -> vector<32x256xf32>
    %c6_i32 = arith.constant 6 : i32
    %344 = vector.broadcast %c6_i32 : i32 to vector<1x256xi32>
    %345 = arith.addi %16, %344 : vector<1x256xi32>
    %c0_i32_194 = arith.constant 0 : i32
    %346 = vector.broadcast %c0_i32_194 : i32 to vector<1x256xi32>
    %347 = arith.cmpi sge, %345, %346 : vector<1x256xi32>
    %c6_i32_195 = arith.constant 6 : i32
    %348 = vector.broadcast %c6_i32_195 : i32 to vector<1x256xi32>
    %349 = arith.addi %16, %348 : vector<1x256xi32>
    %c16_i32_196 = arith.constant 16 : i32
    %350 = vector.broadcast %c16_i32_196 : i32 to vector<1x256xi32>
    %351 = arith.cmpi slt, %349, %350 : vector<1x256xi32>
    %352 = arith.andi %347, %351 : vector<1x256xi1>
    %cst_197 = arith.constant 0.000000e+00 : f32
    %353 = vector.shape_cast %352 : vector<1x256xi1> to vector<1x256xi1>
    %354 = vector.broadcast %353 : vector<1x256xi1> to vector<32x256xi1>
    %355 = vector.broadcast %cst_197 : f32 to vector<32x256xf32>
    %356 = arith.select %354, %343, %355 : vector<32x256xi1>, vector<32x256xf32>
    %357 = arith.addf %338, %356 : vector<32x256xf32>
    %c0_198 = arith.constant 0 : index
    %c0_199 = arith.constant 0 : index
    %c96 = arith.constant 96 : index
    %358 = vector.load %arg1[%c0_198, %c0_199, %c96] : memref<1x32x460xbf16, #tpu.memory_space<vmem>>, vector<1x32x256xbf16>
    %359 = vector.shape_cast %358 : vector<1x32x256xbf16> to vector<32x256xbf16>
    %c21 = arith.constant 21 : index
    %c0_200 = arith.constant 0 : index
    %c0_201 = arith.constant 0 : index
    %360 = vector.load %arg4[%c21, %c0_200, %c0_201] : memref<27x32x32xbf16, #tpu.memory_space<vmem>>, vector<1x32x32xbf16>
    %361 = vector.shape_cast %360 : vector<1x32x32xbf16> to vector<32x32xbf16>
    %cst_202 = arith.constant dense<0.000000e+00> : vector<32x256xf32>
    %362 = tpu.matmul %361, %359, %cst_202 {dimension_numbers = #tpu.dot_dimension_numbers<[1], [0], [0], [1], [0, 0, 1, 1], [], []>} : vector<32x32xbf16>, vector<32x256xbf16>, vector<32x256xf32> -> vector<32x256xf32>
    %c-6_i32_203 = arith.constant -6 : i32
    %363 = vector.broadcast %c-6_i32_203 : i32 to vector<1x256xi32>
    %364 = arith.addi %16, %363 : vector<1x256xi32>
    %c0_i32_204 = arith.constant 0 : i32
    %365 = vector.broadcast %c0_i32_204 : i32 to vector<1x256xi32>
    %366 = arith.cmpi sge, %364, %365 : vector<1x256xi32>
    %c-6_i32_205 = arith.constant -6 : i32
    %367 = vector.broadcast %c-6_i32_205 : i32 to vector<1x256xi32>
    %368 = arith.addi %16, %367 : vector<1x256xi32>
    %c16_i32_206 = arith.constant 16 : i32
    %369 = vector.broadcast %c16_i32_206 : i32 to vector<1x256xi32>
    %370 = arith.cmpi slt, %368, %369 : vector<1x256xi32>
    %371 = arith.andi %366, %370 : vector<1x256xi1>
    %cst_207 = arith.constant 0.000000e+00 : f32
    %372 = vector.shape_cast %371 : vector<1x256xi1> to vector<1x256xi1>
    %373 = vector.broadcast %372 : vector<1x256xi1> to vector<32x256xi1>
    %374 = vector.broadcast %cst_207 : f32 to vector<32x256xf32>
    %375 = arith.select %373, %362, %374 : vector<32x256xi1>, vector<32x256xf32>
    %376 = arith.addf %357, %375 : vector<32x256xf32>
    %c0_208 = arith.constant 0 : index
    %c0_209 = arith.constant 0 : index
    %c102_210 = arith.constant 102 : index
    %377 = vector.load %arg1[%c0_208, %c0_209, %c102_210] : memref<1x32x460xbf16, #tpu.memory_space<vmem>>, vector<1x32x256xbf16>
    %378 = vector.shape_cast %377 : vector<1x32x256xbf16> to vector<32x256xbf16>
    %c22 = arith.constant 22 : index
    %c0_211 = arith.constant 0 : index
    %c0_212 = arith.constant 0 : index
    %379 = vector.load %arg4[%c22, %c0_211, %c0_212] : memref<27x32x32xbf16, #tpu.memory_space<vmem>>, vector<1x32x32xbf16>
    %380 = vector.shape_cast %379 : vector<1x32x32xbf16> to vector<32x32xbf16>
    %cst_213 = arith.constant dense<0.000000e+00> : vector<32x256xf32>
    %381 = tpu.matmul %380, %378, %cst_213 {dimension_numbers = #tpu.dot_dimension_numbers<[1], [0], [0], [1], [0, 0, 1, 1], [], []>} : vector<32x32xbf16>, vector<32x256xbf16>, vector<32x256xf32> -> vector<32x256xf32>
    %382 = arith.addf %376, %381 : vector<32x256xf32>
    %c0_214 = arith.constant 0 : index
    %c0_215 = arith.constant 0 : index
    %c108 = arith.constant 108 : index
    %383 = vector.load %arg1[%c0_214, %c0_215, %c108] : memref<1x32x460xbf16, #tpu.memory_space<vmem>>, vector<1x32x256xbf16>
    %384 = vector.shape_cast %383 : vector<1x32x256xbf16> to vector<32x256xbf16>
    %c23 = arith.constant 23 : index
    %c0_216 = arith.constant 0 : index
    %c0_217 = arith.constant 0 : index
    %385 = vector.load %arg4[%c23, %c0_216, %c0_217] : memref<27x32x32xbf16, #tpu.memory_space<vmem>>, vector<1x32x32xbf16>
    %386 = vector.shape_cast %385 : vector<1x32x32xbf16> to vector<32x32xbf16>
    %cst_218 = arith.constant dense<0.000000e+00> : vector<32x256xf32>
    %387 = tpu.matmul %386, %384, %cst_218 {dimension_numbers = #tpu.dot_dimension_numbers<[1], [0], [0], [1], [0, 0, 1, 1], [], []>} : vector<32x32xbf16>, vector<32x256xbf16>, vector<32x256xf32> -> vector<32x256xf32>
    %c6_i32_219 = arith.constant 6 : i32
    %388 = vector.broadcast %c6_i32_219 : i32 to vector<1x256xi32>
    %389 = arith.addi %16, %388 : vector<1x256xi32>
    %c0_i32_220 = arith.constant 0 : i32
    %390 = vector.broadcast %c0_i32_220 : i32 to vector<1x256xi32>
    %391 = arith.cmpi sge, %389, %390 : vector<1x256xi32>
    %c6_i32_221 = arith.constant 6 : i32
    %392 = vector.broadcast %c6_i32_221 : i32 to vector<1x256xi32>
    %393 = arith.addi %16, %392 : vector<1x256xi32>
    %c16_i32_222 = arith.constant 16 : i32
    %394 = vector.broadcast %c16_i32_222 : i32 to vector<1x256xi32>
    %395 = arith.cmpi slt, %393, %394 : vector<1x256xi32>
    %396 = arith.andi %391, %395 : vector<1x256xi1>
    %cst_223 = arith.constant 0.000000e+00 : f32
    %397 = vector.shape_cast %396 : vector<1x256xi1> to vector<1x256xi1>
    %398 = vector.broadcast %397 : vector<1x256xi1> to vector<32x256xi1>
    %399 = vector.broadcast %cst_223 : f32 to vector<32x256xf32>
    %400 = arith.select %398, %387, %399 : vector<32x256xi1>, vector<32x256xf32>
    %401 = arith.addf %382, %400 : vector<32x256xf32>
    %c0_224 = arith.constant 0 : index
    %c0_225 = arith.constant 0 : index
    %c192 = arith.constant 192 : index
    %402 = vector.load %arg1[%c0_224, %c0_225, %c192] : memref<1x32x460xbf16, #tpu.memory_space<vmem>>, vector<1x32x256xbf16>
    %403 = vector.shape_cast %402 : vector<1x32x256xbf16> to vector<32x256xbf16>
    %c24 = arith.constant 24 : index
    %c0_226 = arith.constant 0 : index
    %c0_227 = arith.constant 0 : index
    %404 = vector.load %arg4[%c24, %c0_226, %c0_227] : memref<27x32x32xbf16, #tpu.memory_space<vmem>>, vector<1x32x32xbf16>
    %405 = vector.shape_cast %404 : vector<1x32x32xbf16> to vector<32x32xbf16>
    %cst_228 = arith.constant dense<0.000000e+00> : vector<32x256xf32>
    %406 = tpu.matmul %405, %403, %cst_228 {dimension_numbers = #tpu.dot_dimension_numbers<[1], [0], [0], [1], [0, 0, 1, 1], [], []>} : vector<32x32xbf16>, vector<32x256xbf16>, vector<32x256xf32> -> vector<32x256xf32>
    %c-6_i32_229 = arith.constant -6 : i32
    %407 = vector.broadcast %c-6_i32_229 : i32 to vector<1x256xi32>
    %408 = arith.addi %16, %407 : vector<1x256xi32>
    %c0_i32_230 = arith.constant 0 : i32
    %409 = vector.broadcast %c0_i32_230 : i32 to vector<1x256xi32>
    %410 = arith.cmpi sge, %408, %409 : vector<1x256xi32>
    %c-6_i32_231 = arith.constant -6 : i32
    %411 = vector.broadcast %c-6_i32_231 : i32 to vector<1x256xi32>
    %412 = arith.addi %16, %411 : vector<1x256xi32>
    %c16_i32_232 = arith.constant 16 : i32
    %413 = vector.broadcast %c16_i32_232 : i32 to vector<1x256xi32>
    %414 = arith.cmpi slt, %412, %413 : vector<1x256xi32>
    %415 = arith.andi %410, %414 : vector<1x256xi1>
    %cst_233 = arith.constant 0.000000e+00 : f32
    %416 = vector.shape_cast %415 : vector<1x256xi1> to vector<1x256xi1>
    %417 = vector.broadcast %416 : vector<1x256xi1> to vector<32x256xi1>
    %418 = vector.broadcast %cst_233 : f32 to vector<32x256xf32>
    %419 = arith.select %417, %406, %418 : vector<32x256xi1>, vector<32x256xf32>
    %420 = arith.addf %401, %419 : vector<32x256xf32>
    %c0_234 = arith.constant 0 : index
    %c0_235 = arith.constant 0 : index
    %c198 = arith.constant 198 : index
    %421 = vector.load %arg1[%c0_234, %c0_235, %c198] : memref<1x32x460xbf16, #tpu.memory_space<vmem>>, vector<1x32x256xbf16>
    %422 = vector.shape_cast %421 : vector<1x32x256xbf16> to vector<32x256xbf16>
    %c25 = arith.constant 25 : index
    %c0_236 = arith.constant 0 : index
    %c0_237 = arith.constant 0 : index
    %423 = vector.load %arg4[%c25, %c0_236, %c0_237] : memref<27x32x32xbf16, #tpu.memory_space<vmem>>, vector<1x32x32xbf16>
    %424 = vector.shape_cast %423 : vector<1x32x32xbf16> to vector<32x32xbf16>
    %cst_238 = arith.constant dense<0.000000e+00> : vector<32x256xf32>
    %425 = tpu.matmul %424, %422, %cst_238 {dimension_numbers = #tpu.dot_dimension_numbers<[1], [0], [0], [1], [0, 0, 1, 1], [], []>} : vector<32x32xbf16>, vector<32x256xbf16>, vector<32x256xf32> -> vector<32x256xf32>
    %426 = arith.addf %420, %425 : vector<32x256xf32>
    %c0_239 = arith.constant 0 : index
    %c0_240 = arith.constant 0 : index
    %c204 = arith.constant 204 : index
    %427 = vector.load %arg1[%c0_239, %c0_240, %c204] : memref<1x32x460xbf16, #tpu.memory_space<vmem>>, vector<1x32x256xbf16>
    %428 = vector.shape_cast %427 : vector<1x32x256xbf16> to vector<32x256xbf16>
    %c26 = arith.constant 26 : index
    %c0_241 = arith.constant 0 : index
    %c0_242 = arith.constant 0 : index
    %429 = vector.load %arg4[%c26, %c0_241, %c0_242] : memref<27x32x32xbf16, #tpu.memory_space<vmem>>, vector<1x32x32xbf16>
    %430 = vector.shape_cast %429 : vector<1x32x32xbf16> to vector<32x32xbf16>
    %cst_243 = arith.constant dense<0.000000e+00> : vector<32x256xf32>
    %431 = tpu.matmul %430, %428, %cst_243 {dimension_numbers = #tpu.dot_dimension_numbers<[1], [0], [0], [1], [0, 0, 1, 1], [], []>} : vector<32x32xbf16>, vector<32x256xbf16>, vector<32x256xf32> -> vector<32x256xf32>
    %c6_i32_244 = arith.constant 6 : i32
    %432 = vector.broadcast %c6_i32_244 : i32 to vector<1x256xi32>
    %433 = arith.addi %16, %432 : vector<1x256xi32>
    %c0_i32_245 = arith.constant 0 : i32
    %434 = vector.broadcast %c0_i32_245 : i32 to vector<1x256xi32>
    %435 = arith.cmpi sge, %433, %434 : vector<1x256xi32>
    %c6_i32_246 = arith.constant 6 : i32
    %436 = vector.broadcast %c6_i32_246 : i32 to vector<1x256xi32>
    %437 = arith.addi %16, %436 : vector<1x256xi32>
    %c16_i32_247 = arith.constant 16 : i32
    %438 = vector.broadcast %c16_i32_247 : i32 to vector<1x256xi32>
    %439 = arith.cmpi slt, %437, %438 : vector<1x256xi32>
    %440 = arith.andi %435, %439 : vector<1x256xi1>
    %cst_248 = arith.constant 0.000000e+00 : f32
    %441 = vector.shape_cast %440 : vector<1x256xi1> to vector<1x256xi1>
    %442 = vector.broadcast %441 : vector<1x256xi1> to vector<32x256xi1>
    %443 = vector.broadcast %cst_248 : f32 to vector<32x256xf32>
    %444 = arith.select %442, %431, %443 : vector<32x256xi1>, vector<32x256xf32>
    %445 = arith.addf %426, %444 : vector<32x256xf32>
    %c2_249 = arith.constant 2 : index
    %c0_250 = arith.constant 0 : index
    %c0_251 = arith.constant 0 : index
    %446 = vector.load %arg5[%c2_249, %c0_250, %c0_251] : memref<3x32x1xf32, #tpu.memory_space<vmem>>, vector<1x32x1xf32>
    %447 = vector.shape_cast %446 : vector<1x32x1xf32> to vector<32x1xf32>
    %448 = vector.broadcast %447 : vector<32x1xf32> to vector<32x256xf32>
    %449 = arith.addf %445, %448 : vector<32x256xf32>
    %cst_252 = arith.constant 0.000000e+00 : f32
    %450 = vector.broadcast %cst_252 : f32 to vector<32x256xf32>
    %451 = arith.maximumf %449, %450 : vector<32x256xf32>
    %452 = vector.extract_strided_slice %17 {offsets = [3, 0, 0], sizes = [1, 32, 32], strides = [1, 1, 1]} : vector<5x32x32xbf16> to vector<1x32x32xbf16>
    %453 = vector.shape_cast %452 : vector<1x32x32xbf16> to vector<32x32xbf16>
    %454 = arith.truncf %451 : vector<32x256xf32> to vector<32x256xbf16>
    %cst_253 = arith.constant dense<0.000000e+00> : vector<32x256xf32>
    %455 = tpu.matmul %453, %454, %cst_253 {dimension_numbers = #tpu.dot_dimension_numbers<[1], [0], [0], [1], [0, 0, 1, 1], [], []>} : vector<32x32xbf16>, vector<32x256xbf16>, vector<32x256xf32> -> vector<32x256xf32>
    %456 = arith.addf %314, %455 : vector<32x256xf32>
    %c0_254 = arith.constant 0 : index
    %c0_255 = arith.constant 0 : index
    %c0_256 = arith.constant 0 : index
    %457 = vector.load %arg8[%c0_254, %c0_255, %c0_256] : memref<1x32x1xf32, #tpu.memory_space<vmem>>, vector<1x32x1xf32>
    %458 = vector.shape_cast %457 : vector<1x32x1xf32> to vector<32x1xf32>
    %459 = vector.broadcast %458 : vector<32x1xf32> to vector<32x256xf32>
    %460 = arith.addf %456, %459 : vector<32x256xf32>
    %c0_257 = arith.constant 0 : index
    %c0_258 = arith.constant 0 : index
    %461 = vector.load %arg7[%c0_257, %c0_258] : memref<32x1xf32, #tpu.memory_space<vmem>>, vector<32x1xf32>
    %462 = vector.broadcast %461 : vector<32x1xf32> to vector<32x256xf32>
    %463 = arith.addf %460, %462 : vector<32x256xf32>
    %cst_259 = arith.constant 0.000000e+00 : f32
    %464 = vector.broadcast %cst_259 : f32 to vector<32x256xf32>
    %465 = arith.maximumf %463, %464 : vector<32x256xf32>
    %466 = arith.truncf %465 : vector<32x256xf32> to vector<32x256xbf16>
    %c0_260 = arith.constant 0 : index
    %c0_261 = arith.constant 0 : index
    %c0_262 = arith.constant 0 : index
    %467 = vector.load %arg9[%c0_260, %c0_261, %c0_262] : memref<1x32x256xbf16, #tpu.memory_space<vmem>>, vector<1x32x256xbf16>
    %468 = vector.shape_cast %467 : vector<1x32x256xbf16> to vector<32x256xbf16>
    %469 = vector.shape_cast %466 : vector<32x256xbf16> to vector<1x32x256xbf16>
    tpu.vector_store %arg9[%c0_260, %c0_261, %c0_262], %469 {strides = array<i32>} : memref<1x32x256xbf16, #tpu.memory_space<vmem>>, vector<1x32x256xbf16>,
    return
  }
  func.func @transform_0(%arg0: i32) -> (i32, i32, i32) {
    %c0_i32 = arith.constant 0 : i32
    %c0_i32_0 = arith.constant 0 : i32
    %c0_i32_1 = arith.constant 0 : i32
    return %arg0, %c0_i32, %c0_i32_0 : i32, i32, i32
  }
  func.func @transform_1(%arg0: i32) -> (i32, i32) {
    %c0_i32 = arith.constant 0 : i32
    %c0_i32_0 = arith.constant 0 : i32
    %c0_i32_1 = arith.constant 0 : i32
    return %c0_i32, %c0_i32_0 : i32, i32
  }
  func.func @transform_2(%arg0: i32) -> (i32, i32) {
    %c0_i32 = arith.constant 0 : i32
    %c0_i32_0 = arith.constant 0 : i32
    %c0_i32_1 = arith.constant 0 : i32
    return %c0_i32, %c0_i32_0 : i32, i32
  }
  func.func @transform_3(%arg0: i32) -> (i32, i32, i32) {
    %c0_i32 = arith.constant 0 : i32
    %c0_i32_0 = arith.constant 0 : i32
    %c0_i32_1 = arith.constant 0 : i32
    %c0_i32_2 = arith.constant 0 : i32
    return %c0_i32, %c0_i32_0, %c0_i32_1 : i32, i32, i32
  }
  func.func @transform_4(%arg0: i32) -> (i32, i32, i32) {
    %c0_i32 = arith.constant 0 : i32
    %c0_i32_0 = arith.constant 0 : i32
    %c0_i32_1 = arith.constant 0 : i32
    %c0_i32_2 = arith.constant 0 : i32
    return %c0_i32, %c0_i32_0, %c0_i32_1 : i32, i32, i32
  }
  func.func @transform_5(%arg0: i32) -> (i32, i32, i32) {
    %c0_i32 = arith.constant 0 : i32
    %c0_i32_0 = arith.constant 0 : i32
    %c0_i32_1 = arith.constant 0 : i32
    %c0_i32_2 = arith.constant 0 : i32
    return %c0_i32, %c0_i32_0, %c0_i32_1 : i32, i32, i32
  }
  func.func @transform_6(%arg0: i32) -> (i32, i32) {
    %c0_i32 = arith.constant 0 : i32
    %c0_i32_0 = arith.constant 0 : i32
    %c0_i32_1 = arith.constant 0 : i32
    return %c0_i32, %c0_i32_0 : i32, i32
  }
  func.func @transform_7(%arg0: i32) -> (i32, i32, i32) {
    %c0_i32 = arith.constant 0 : i32
    %c0_i32_0 = arith.constant 0 : i32
    %c0_i32_1 = arith.constant 0 : i32
    return %arg0, %c0_i32, %c0_i32_0 : i32, i32, i32
  }
  func.func @transform_8(%arg0: i32) -> (i32, i32, i32) {
    %c0_i32 = arith.constant 0 : i32
    %c0_i32_0 = arith.constant 0 : i32
    %c0_i32_1 = arith.constant 0 : i32
    return %arg0, %c0_i32, %c0_i32_0 : i32, i32, i32
  }
}

module attributes {stable_mosaic.version = 11 : i64} {
  func.func @_final_conv_kernel(%arg0: i32, %arg1: i32, %arg2: memref<1x32x1024xbf16, #tpu.memory_space<vmem>>, %arg3: memref<1x16x1024xbf16, #tpu.memory_space<vmem>>, %arg4: memref<1x16x1024xbf16, #tpu.memory_space<vmem>>, %arg5: memref<16x32xbf16, #tpu.memory_space<vmem>>, %arg6: memref<16x16xbf16, #tpu.memory_space<vmem>>, %arg7: memref<16x16xbf16, #tpu.memory_space<vmem>>, %arg8: memref<16x1xf32, #tpu.memory_space<vmem>>, %arg9: memref<1x16x1024xf32, #tpu.memory_space<vmem>>) attributes {dimension_semantics = [#tpu.dimension_semantics<parallel>, #tpu.dimension_semantics<parallel>], iteration_bounds = array<i64: 2, 4>, scalar_prefetch = 0 : i64, scratch_operands = 0 : i64, tpu.core_type = #tpu.core_type<tc>, window_params = [{transform_indices = @transform_0, window_bounds = array<i64: 1, 32, 1024>}, {transform_indices = @transform_1, window_bounds = array<i64: 1, 16, 1024>}, {transform_indices = @transform_2, window_bounds = array<i64: 1, 16, 1024>}, {pipeline_mode = #tpu.pipeline_mode<synchronous>, transform_indices = @transform_3, window_bounds = array<i64: 16, 32>}, {pipeline_mode = #tpu.pipeline_mode<synchronous>, transform_indices = @transform_4, window_bounds = array<i64: 16, 16>}, {pipeline_mode = #tpu.pipeline_mode<synchronous>, transform_indices = @transform_5, window_bounds = array<i64: 16, 16>}, {pipeline_mode = #tpu.pipeline_mode<synchronous>, transform_indices = @transform_6, window_bounds = array<i64: 16, 1>}, {transform_indices = @transform_7, window_bounds = array<i64: 1, 16, 1024>}]} {
    %c0 = arith.constant 0 : index
    %c0_0 = arith.constant 0 : index
    %0 = vector.load %arg5[%c0, %c0_0] : memref<16x32xbf16, #tpu.memory_space<vmem>>, vector<16x32xbf16>
    %c0_1 = arith.constant 0 : index
    %c0_2 = arith.constant 0 : index
    %c0_3 = arith.constant 0 : index
    %1 = vector.load %arg2[%c0_1, %c0_2, %c0_3] : memref<1x32x1024xbf16, #tpu.memory_space<vmem>>, vector<1x32x1024xbf16>
    %2 = vector.shape_cast %1 : vector<1x32x1024xbf16> to vector<32x1024xbf16>
    %cst = arith.constant dense<0.000000e+00> : vector<16x1024xf32>
    %3 = tpu.matmul %0, %2, %cst {dimension_numbers = #tpu.dot_dimension_numbers<[1], [0], [0], [1], [0, 0, 1, 1], [], []>} : vector<16x32xbf16>, vector<32x1024xbf16>, vector<16x1024xf32> -> vector<16x1024xf32>
    %c0_4 = arith.constant 0 : index
    %c0_5 = arith.constant 0 : index
    %4 = vector.load %arg6[%c0_4, %c0_5] : memref<16x16xbf16, #tpu.memory_space<vmem>>, vector<16x16xbf16>
    %c0_6 = arith.constant 0 : index
    %c0_7 = arith.constant 0 : index
    %c0_8 = arith.constant 0 : index
    %5 = vector.load %arg3[%c0_6, %c0_7, %c0_8] : memref<1x16x1024xbf16, #tpu.memory_space<vmem>>, vector<1x16x1024xbf16>
    %6 = vector.shape_cast %5 : vector<1x16x1024xbf16> to vector<16x1024xbf16>
    %cst_9 = arith.constant dense<0.000000e+00> : vector<16x1024xf32>
    %7 = tpu.matmul %4, %6, %cst_9 {dimension_numbers = #tpu.dot_dimension_numbers<[1], [0], [0], [1], [0, 0, 1, 1], [], []>} : vector<16x16xbf16>, vector<16x1024xbf16>, vector<16x1024xf32> -> vector<16x1024xf32>
    %8 = arith.addf %3, %7 : vector<16x1024xf32>
    %c0_10 = arith.constant 0 : index
    %c0_11 = arith.constant 0 : index
    %9 = vector.load %arg7[%c0_10, %c0_11] : memref<16x16xbf16, #tpu.memory_space<vmem>>, vector<16x16xbf16>
    %c0_12 = arith.constant 0 : index
    %c0_13 = arith.constant 0 : index
    %c0_14 = arith.constant 0 : index
    %10 = vector.load %arg4[%c0_12, %c0_13, %c0_14] : memref<1x16x1024xbf16, #tpu.memory_space<vmem>>, vector<1x16x1024xbf16>
    %11 = vector.shape_cast %10 : vector<1x16x1024xbf16> to vector<16x1024xbf16>
    %cst_15 = arith.constant dense<0.000000e+00> : vector<16x1024xf32>
    %12 = tpu.matmul %9, %11, %cst_15 {dimension_numbers = #tpu.dot_dimension_numbers<[1], [0], [0], [1], [0, 0, 1, 1], [], []>} : vector<16x16xbf16>, vector<16x1024xbf16>, vector<16x1024xf32> -> vector<16x1024xf32>
    %13 = arith.addf %8, %12 : vector<16x1024xf32>
    %c0_16 = arith.constant 0 : index
    %c0_17 = arith.constant 0 : index
    %14 = vector.load %arg8[%c0_16, %c0_17] : memref<16x1xf32, #tpu.memory_space<vmem>>, vector<16x1xf32>
    %15 = vector.broadcast %14 : vector<16x1xf32> to vector<16x1024xf32>
    %16 = arith.addf %13, %15 : vector<16x1024xf32>
    %c0_18 = arith.constant 0 : index
    %c0_19 = arith.constant 0 : index
    %c0_20 = arith.constant 0 : index
    %17 = vector.load %arg9[%c0_18, %c0_19, %c0_20] : memref<1x16x1024xf32, #tpu.memory_space<vmem>>, vector<1x16x1024xf32>
    %18 = vector.shape_cast %17 : vector<1x16x1024xf32> to vector<16x1024xf32>
    %19 = vector.shape_cast %16 : vector<16x1024xf32> to vector<1x16x1024xf32>
    tpu.vector_store %arg9[%c0_18, %c0_19, %c0_20], %19 {strides = array<i32>} : memref<1x16x1024xf32, #tpu.memory_space<vmem>>, vector<1x16x1024xf32>,
    return
  }
  func.func @transform_0(%arg0: i32, %arg1: i32) -> (i32, i32, i32) {
    %c0_i32 = arith.constant 0 : i32
    %c0_i32_0 = arith.constant 0 : i32
    return %arg0, %c0_i32, %arg1 : i32, i32, i32
  }
  func.func @transform_1(%arg0: i32, %arg1: i32) -> (i32, i32, i32) {
    %c0_i32 = arith.constant 0 : i32
    %c0_i32_0 = arith.constant 0 : i32
    return %arg0, %c0_i32, %arg1 : i32, i32, i32
  }
  func.func @transform_2(%arg0: i32, %arg1: i32) -> (i32, i32, i32) {
    %c0_i32 = arith.constant 0 : i32
    %c0_i32_0 = arith.constant 0 : i32
    return %arg0, %c0_i32, %arg1 : i32, i32, i32
  }
  func.func @transform_3(%arg0: i32, %arg1: i32) -> (i32, i32) {
    %c0_i32 = arith.constant 0 : i32
    %c0_i32_0 = arith.constant 0 : i32
    %c0_i32_1 = arith.constant 0 : i32
    return %c0_i32, %c0_i32_0 : i32, i32
  }
  func.func @transform_4(%arg0: i32, %arg1: i32) -> (i32, i32) {
    %c0_i32 = arith.constant 0 : i32
    %c0_i32_0 = arith.constant 0 : i32
    %c0_i32_1 = arith.constant 0 : i32
    return %c0_i32, %c0_i32_0 : i32, i32
  }
  func.func @transform_5(%arg0: i32, %arg1: i32) -> (i32, i32) {
    %c0_i32 = arith.constant 0 : i32
    %c0_i32_0 = arith.constant 0 : i32
    %c0_i32_1 = arith.constant 0 : i32
    return %c0_i32, %c0_i32_0 : i32, i32
  }
  func.func @transform_6(%arg0: i32, %arg1: i32) -> (i32, i32) {
    %c0_i32 = arith.constant 0 : i32
    %c0_i32_0 = arith.constant 0 : i32
    %c0_i32_1 = arith.constant 0 : i32
    return %c0_i32, %c0_i32_0 : i32, i32
  }
  func.func @transform_7(%arg0: i32, %arg1: i32) -> (i32, i32, i32) {
    %c0_i32 = arith.constant 0 : i32
    %c0_i32_0 = arith.constant 0 : i32
    return %arg0, %c0_i32, %arg1 : i32, i32, i32
  }
}

</mosaic_0001>

<bundles_post_ra>
// kernel: a_call__.2
= control target key start
LH: loop header
LB: loop body
LE: loop exit
PB: predicated region body
PF: predicated region fallthrough
CT: control target
= control target key end

     0   :  { %s4329_s27 = smov 0   ;;  %s6106_s0 = inlined_call_operand.vmem [shape: bf16[2,32,460], index: 0, kind: input, shape index: {}]   ;;  %s6107_s1 = inlined_call_operand.vmem [shape: bf16[32,32], index: 1, kind: input, shape index: {}]   ;;  %s6108_s2 = inlined_call_operand.vmem [shape: f32[32,1], index: 2, kind: input, shape index: {}]   ;;  %s6109_s3 = inlined_call_operand.vmem [shape: bf16[27,32,32], index: 3, kind: input, shape index: {}]   ;;  %s6110_s4 = inlined_call_operand.vmem [shape: f32[3,32,1], index: 4, kind: input, shape index: {}]   ;;  %s6111_s5 = inlined_call_operand.vmem [shape: bf16[5,32,32], index: 5, kind: input, shape index: {}]   ;;  %s6112_s6 = inlined_call_operand.vmem [shape: f32[32,1], index: 6, kind: input, shape index: {}]   ;;  %s6113_s7 = inlined_call_operand.vmem [shape: f32[2,32,1], index: 7, kind: input, shape index: {}]   ;;  %s6114_s8 = inlined_call_operand.vmem [shape: bf16[2,32,256], index: 8, kind: output, shape index: {}]  }
   0x1 LB: > { %s3569_s28 = sadd.s32 4294967295, %s4262_s27   ;;  %p3573_p0 = scmp.ge.s32.totalorder %s4262_s27, 1  ;;  %s4262_s27 = sphi %s4329_s27, %s18_s27  }
   0x2   : > { %p272_p1 = scmp.lt.s32.totalorder %s4262_s27, 3 }
   0x4   : > { %p273_p2 = pnand %p3573_p0, %p272_p1 }
   0x6   : > { %276 = sbr.rel (%p273_p2) target bundleno = 1252 (0x4e4), region = 52 }
   0xb   : > { %p311_p3 = scmp.lt.s32.totalorder %s3569_s28, 1  ;;  %s4264_s11 = smov 60   ;;  %v4271_v39 = vmov 0   ;;  %vm546_vm0 = vcmask 490496   ;;  %vm454_vm1 = vcmask 211968   ;;  %v4161_v50 = vld [vmem:[%s6109_s3] sm:$0xff] }
   0xc   : > { %s4265_s12 = smov 26   ;;  %s4266_s13 = smov 56   ;;  %4255 = vset.pattern.permute.xlu2 %v4271_v39  ;;  %4254 = vset.pattern.permute.xlu1 %v4271_v39  ;;  %vm463_vm2 = vcmask 261120   ;;  %v4159_v60 = vld [vmem:[%s6107_s1] sm:$0xff]  ;;  %v1391_v62 = vld [vmem:[%s6110_s4 + $0x18] sm:$0xff]  ;;  %v1390_v63 = vld [vmem:[%s6110_s4 + $0x10] sm:$0xff] }
   0xd   : > { %s6297_s28 = smov (!%p311_p3, %s3569_s28), 1  ;;  %s4267_s14 = smov 58   ;;  %4253 = vset.pattern.permute.xlu0 %v4271_v39  ;;  %vm734_vm3 = vcmask 457728   ;;  %vm646_vm4 = vcmask 474112   ;;  %vm842_vm5 = vcmask 228352   ;;  %vm1135_vm6 = vcmask 1014784  }
   0xe   : > { %s4142_s29 = sshll.u32 %s6297_s28, 6  ;;  %s4268_s15 = smov 28   ;;  %vm1005_vm7 = vcmask 195584   ;;  %vm1319_vm8 = vcmask 982016   ;;  %vm1231_vm9 = vcmask 998400   ;;  %vm1567_vm10 = vcmask 769024  }
   0xf   : > { %s4343_s10 = scalar_lea.vmem %s6106_s0, %s4142_s29  ;;  %s4269_s16 = smov 124   ;;  %vm1667_vm15 = vcmask 736256  }
  0x10   : > { %v3610_v0 = vld [vmem:[%s4343_s10 + $0x28] sm:$0xf]  ;;  %v4158_v1 = vld [vmem:[%s4343_s10 + $0x34] sm:$0xf0]  ;;  %v3602_v2 = vld [vmem:[%s4343_s10 + $0x20] sm:$0xf] }
  0x11   : > { %v4348_v3 = vor.u32 %v4158_v1, %v3610_v0  ;;  %v4157_v4 = vld [vmem:[%s4343_s10 + $0x2c] sm:$0xf0]  ;;  %v4153_v5 = vld [vmem:[%s4343_s10 + $0x4] sm:$0xf]  ;;  %v3592_v6 = vld [vmem:[%s4343_s10 + $0x10] sm:$0xf0] }
  0x12   : > { %v4353_v7 = vor.u32 %v4157_v4, %v3602_v2  ;;  %v4355_v8 = vor.u32 %v4153_v5, %v3592_v6  ;;  %v4156_v9 = vld [vmem:[%s4343_s10 + $0x24] sm:$0xf]  ;;  %v3590_v10 = vld [vmem:[%s4343_s10] sm:$0xf]  ;;  %v4154_v11 = vld [vmem:[%s4343_s10 + $0xc] sm:$0xf0] }
  0x13   : > { %544 = vrot.lane.b32.xlu1 %v4348_v3, %s4264_s11  ;;  %v3604_v12 = vld [vmem:[%s4343_s10 + $0x30] sm:$0xf0]  ;;  %v3598_v13 = vld [vmem:[%s4343_s10 + $0x8] sm:$0xf]  ;;  %v4155_v14 = vld [vmem:[%s4343_s10 + $0x14] sm:$0xf0]  ;;  %v4366_v15 = vor.u32 %v4154_v11, %v3590_v10 }
  0x14   : > { %540 = vrot.lane.b32.xlu0 %v4353_v7, %s4264_s11  ;;  %536 = vrot.lane.b32.xlu2 %v4355_v8, %s4264_s11  ;;  %v4368_v16 = vor.u32 %v4156_v9, %v3604_v12  ;;  %v4370_v17 = vor.u32 %v4155_v14, %v3598_v13  ;;  %v3734_v18 = vld [vmem:[%s4343_s10 + $0x24] sm:$0xf]  ;;  %v4176_v19 = vld [vmem:[%s4343_s10 + $0x28] sm:$0xf]  ;;  %s4270_s17 = smov 24   ;;  %s4272_s18 = smov 120  }
  0x15   : > { %v3736_v20 = vld [vmem:[%s4343_s10 + $0x34] sm:$0xf0]  ;;  %v4177_v21 = vld [vmem:[%s4343_s10 + $0x30] sm:$0xf0]  ;;  %v3742_v22 = vld [vmem:[%s4343_s10 + $0x2c] sm:$0xf] }
  0x16   : > { %v4178_v23 = vld [vmem:[%s4343_s10 + $0x38] sm:$0xf0]  ;;  %v4411_v24 = vor.u32 %v4176_v19, %v3736_v20  ;;  %v4413_v25 = vor.u32 %v4177_v21, %v3734_v18  ;;  %v3722_v27 = vld [vmem:[%s4343_s10 + $0x4] sm:$0xf]  ;;  %v4173_v28 = vld [vmem:[%s4343_s10 + $0x8] sm:$0xf] }
  0x17   : > { %v4415_v26 = vor.u32 %v4178_v23, %v3742_v22  ;;  %v3724_v29 = vld [vmem:[%s4343_s10 + $0x14] sm:$0xf0]  ;;  %v4174_v30 = vld [vmem:[%s4343_s10 + $0x10] sm:$0xf0]  ;;  %v3730_v31 = vld [vmem:[%s4343_s10 + $0xc] sm:$0xf] }
  0x18   : > { %v4175_v32 = vld [vmem:[%s4343_s10 + $0x18] sm:$0xf0]  ;;  %v4426_v33 = vor.u32 %v4173_v28, %v3724_v29  ;;  %v4428_v34 = vor.u32 %v4174_v30, %v3722_v27  ;;  %s4273_s19 = smov 122   ;;  %v1388_v0 = vld [vmem:[%s6110_s4] sm:$0xff]  ;;  %v4162_v1 = vld [vmem:[%s6109_s3 + $0x8] sm:$0xff]  ;;  %s4274_s29 = smov 94  }
  0x19   : > { %v4430_v35 = vor.u32 %v4175_v32, %v3730_v31  ;;  %v1389_v10 = vld [vmem:[%s6110_s4 + $0x8] sm:$0xff]  ;;  %v385_v11 = vld [vmem:[%s6108_s2 + $0x18] sm:$0xff]  ;;  %v384_v12 = vld [vmem:[%s6108_s2 + $0x10] sm:$0xff]  ;;  %s4276_s20 = smov 86   ;;  %s4277_s25 = smov 30  }
  0x1a   : > { %v4160_v20 = vld [vmem:[%s6107_s1 + $0x8] sm:$0xff]  ;;  %v382_v22 = vld [vmem:[%s6108_s2] sm:$0xff]  ;;  %s4280_s24 = smov 32   ;;  %s4282_s26 = smov 64  }
  0x1b   : > { %534 = vrot.lane.b32.xlu1 %v4366_v15, %s4264_s11  ;;  %v383_v23 = vld [vmem:[%s6108_s2 + $0x8] sm:$0xff]  ;;  %v4165_v27 = vld [vmem:[%s6109_s3 + $0x20] sm:$0xff] }
  0x1c   : > { %542 = vrot.lane.b32.xlu0 %v4368_v16, %s4264_s11  ;;  %538 = vrot.lane.b32.xlu2 %v4370_v17, %s4264_s11 }
  0x23   : > { %450 = vrot.lane.b32.xlu1 %v4368_v16, %s4265_s12 }
  0x24   : > { %448 = vrot.lane.b32.xlu0 %v4353_v7, %s4265_s12  ;;  %452 = vrot.lane.b32.xlu2 %v4348_v3, %s4265_s12 }
  0x2b   : > { %444 = vrot.lane.b32.xlu1 %v4355_v8, %s4265_s12 }
  0x2c   : > { %442 = vrot.lane.b32.xlu0 %v4366_v15, %s4265_s12  ;;  %446 = vrot.lane.b32.xlu2 %v4370_v17, %s4265_s12  ;;  %s4278_s12 = smov 22  }
  0x33   : > { %730 = vrot.lane.b32.xlu1 %v4368_v16, %s4266_s13 }
  0x34   : > { %728 = vrot.lane.b32.xlu0 %v4353_v7, %s4266_s13  ;;  %732 = vrot.lane.b32.xlu2 %v4348_v3, %s4266_s13 }
  0x3b   : > { %724 = vrot.lane.b32.xlu1 %v4355_v8, %s4266_s13 }
  0x3c   : > { %722 = vrot.lane.b32.xlu0 %v4366_v15, %s4266_s13  ;;  %726 = vrot.lane.b32.xlu2 %v4370_v17, %s4266_s13  ;;  %s4275_s13 = smov 90  }
  0x43   : > { %642 = vrot.lane.b32.xlu1 %v4368_v16, %s4267_s14 }
  0x44   : > { %640 = vrot.lane.b32.xlu0 %v4353_v7, %s4267_s14  ;;  %644 = vrot.lane.b32.xlu2 %v4348_v3, %s4267_s14 }
  0x4b   : > { %636 = vrot.lane.b32.xlu1 %v4355_v8, %s4267_s14 }
  0x4c   : > { %634 = vrot.lane.b32.xlu0 %v4366_v15, %s4267_s14  ;;  %638 = vrot.lane.b32.xlu2 %v4370_v17, %s4267_s14 }
  0x53   : > { %838 = vrot.lane.b32.xlu1 %v4368_v16, %s4268_s15 }
  0x54   : > { %836 = vrot.lane.b32.xlu0 %v4353_v7, %s4268_s15  ;;  %840 = vrot.lane.b32.xlu2 %v4348_v3, %s4268_s15 }
  0x5b   : > { %832 = vrot.lane.b32.xlu1 %v4355_v8, %s4268_s15 }
  0x5c   : > { %830 = vrot.lane.b32.xlu0 %v4366_v15, %s4268_s15  ;;  %834 = vrot.lane.b32.xlu2 %v4370_v17, %s4268_s15 }
  0x63   : > { %1131 = vrot.lane.b32.xlu1 %v4411_v24, %s4269_s16 }
  0x64   : > { %1129 = vrot.lane.b32.xlu0 %v4413_v25, %s4269_s16  ;;  %1133 = vrot.lane.b32.xlu2 %v4415_v26, %s4269_s16 }
  0x6b   : > { %1125 = vrot.lane.b32.xlu1 %v4426_v33, %s4269_s16 }
  0x6c   : > { %1123 = vrot.lane.b32.xlu0 %v4428_v34, %s4269_s16  ;;  %1127 = vrot.lane.b32.xlu2 %v4430_v35, %s4269_s16 }
  0x6e   : > { %v537_v36 = vpop.permute.xlu2 %536 }
  0x73   : > { %1001 = vrot.lane.b32.xlu1 %v4368_v16, %s4270_s17 }
  0x74   : > { %999 = vrot.lane.b32.xlu0 %v4353_v7, %s4270_s17  ;;  %1003 = vrot.lane.b32.xlu2 %v4348_v3, %s4270_s17 }
  0x76   : > { %v539_v37 = vpop.permute.xlu2 %538 }
  0x77   : > { %v548_v49 = vsel %vm546_vm0, %v537_v36, %v539_v37 }
  0x7b   : > { %995 = vrot.lane.b32.xlu1 %v4355_v8, %s4270_s17 }
  0x7c   : > { %993 = vrot.lane.b32.xlu0 %v4366_v15, %s4270_s17  ;;  %997 = vrot.lane.b32.xlu2 %v4370_v17, %s4270_s17 }
  0x7e   : > { %v453_v38 = vpop.permute.xlu2 %452 }
  0x83   : > { %1315 = vrot.lane.b32.xlu1 %v4411_v24, %s4272_s18 }
  0x84   : > { %1313 = vrot.lane.b32.xlu0 %v4413_v25, %s4272_s18  ;;  %1317 = vrot.lane.b32.xlu2 %v4415_v26, %s4272_s18 }
  0x85   : > { %v545_v40 = vpop.permute.xlu1 %544 }
  0x86   : > { %v541_v41 = vpop.permute.xlu0 %540  ;;  %v447_v42 = vpop.permute.xlu2 %446 }
  0x8b   : > { %1309 = vrot.lane.b32.xlu1 %v4426_v33, %s4272_s18 }
  0x8c   : > { %1307 = vrot.lane.b32.xlu0 %v4428_v34, %s4272_s18  ;;  %1311 = vrot.lane.b32.xlu2 %v4430_v35, %s4272_s18  ;;  %s4143_s18 = sshll.u32 %s6297_s28, 5 }
  0x8d   : > { %v535_v43 = vpop.permute.xlu1 %534  ;;  %s5195_s23 = scalar_lea.vmem %s6113_s7, %s4143_s18 }
  0x8e   : > { %v543_v44 = vpop.permute.xlu0 %542  ;;  %v733_v45 = vpop.permute.xlu2 %732  ;;  %v547_v48 = vsel %vm546_vm0, %v535_v43, %v537_v36 }
  0x8f   : > { %v549_v46 = vsel %vm546_vm0, %v541_v41, %v543_v44  ;;  %v550_v47 = vsel %vm546_vm0, %v543_v44, %v545_v40  ;;  %v4163_v40 = vld [vmem:[%s6109_s3 + $0x10] sm:$0xff]  ;;  %vm1863_vm0 = vcmask 244736  }
  0x90   : > { %567 = vmatpush.bf16.msra.mxu2 %v549_v46  ;;  %586 = vmatpush.bf16.msra.mxu3 %v550_v47 }
  0x93   : > { %1227 = vrot.lane.b32.xlu1 %v4411_v24, %s4273_s19 }
  0x94   : > { %1225 = vrot.lane.b32.xlu0 %v4413_v25, %s4273_s19  ;;  %1229 = vrot.lane.b32.xlu2 %v4415_v26, %s4273_s19 }
  0x95   : > { %568 = vmatpush.bf16.msra.mxu2 %v547_v48  ;;  %587 = vmatpush.bf16.msra.mxu3 %v548_v49  ;;  %v451_v51 = vpop.permute.xlu1 %450 }
  0x96   : > { %v449_v52 = vpop.permute.xlu0 %448  ;;  %v727_v53 = vpop.permute.xlu2 %726  ;;  %v4457_v54 = vsel %vm454_vm1, %v451_v51, %v453_v38 }
  0x97   : > { %6148 = vst [vmem:[#allocation2_spill] sm:$0xff] %v4457_v54  ;;  %v4460_v55 = vsel %vm454_vm1, %v449_v52, %v451_v51  ;;  %495 = vmatpush.bf16.msra.mxu1 %v4457_v54  ;;  %v4164_v51 = vld [vmem:[%s6109_s3 + $0x18] sm:$0xff] }
  0x98   : > { %6149 = vst [vmem:[#allocation3_spill] sm:$0xff] %v4460_v55  ;;  %3624 = vmatmul.msk.bf16.vlgmr.msra.gmra.mxu2 %vm463_vm2, %v4161_v50  ;;  %3626 = vmatmul.msk.bf16.vlgmr.msra.gmra.mxu3 %vm463_vm2, %v4161_v50 }
  0x99   : > { %476 = vmatpush.bf16.msra.mxu0 %v4460_v55 }
  0x9b   : > { %1221 = vrot.lane.b32.xlu1 %v4426_v33, %s4273_s19 }
  0x9c   : > { %1219 = vrot.lane.b32.xlu0 %v4428_v34, %s4273_s19  ;;  %1223 = vrot.lane.b32.xlu2 %v4430_v35, %s4273_s19 }
  0x9d   : > { %v445_v56 = vpop.permute.xlu1 %444 }
  0x9e   : > { %v443_v57 = vpop.permute.xlu0 %442  ;;  %v645_v58 = vpop.permute.xlu2 %644  ;;  %v4473_v59 = vsel %vm454_vm1, %v445_v56, %v447_v42  ;;  %v4166_v42 = vld [vmem:[%s6109_s3 + $0x28] sm:$0xff] }
  0x9f   : > { %6150 = vst [vmem:[#allocation4_spill] sm:$0xff] %v4473_v59  ;;  %v4479_v61 = vsel %vm454_vm1, %v443_v57, %v445_v56  ;;  %496 = vmatpush.bf16.msra.mxu1 %v4473_v59  ;;  %v4169_v56 = vld [vmem:[%s6109_s3 + $0x40] sm:$0xff]  ;;  %vm1755_vm1 = vcmask 703488  }
  0xa0   : > { %6151 = vst [vmem:[#allocation5_spill] sm:$0xff] %v4479_v61  ;;  %477 = vmatpush.bf16.msra.mxu0 %v4479_v61 }
  0xa2   : > { %3614 = vmatmul.msk.bf16.vlgmr.msra.gmra.mxu1 %vm463_vm2, %v4159_v60 }
  0xa3   : > { %3612 = vmatmul.msk.bf16.vlgmr.msra.gmra.mxu0 %vm463_vm2, %v4159_v60  ;;  %1409 = vperm.xlu1 %4254, %v1391_v62  }
  0xa4   : > { %1404 = vperm.xlu0 %4253, %v1390_v63   ;;  %1394 = vperm.xlu2 %4255, %v1388_v0  }
  0xa5   : > { %v731_v2 = vpop.permute.xlu1 %730 }
  0xa6   : > { %v729_v4 = vpop.permute.xlu0 %728  ;;  %v639_v5 = vpop.permute.xlu2 %638  ;;  %v738_v6 = vsel %vm734_vm3, %v731_v2, %v733_v45 }
  0xa7   : > { %v737_v9 = vsel %vm734_vm3, %v729_v4, %v731_v2  ;;  %774 = vmatpush.bf16.msrb.mxu3 %v738_v6  ;;  %v4167_v4 = vld [vmem:[%s6109_s3 + $0x30] sm:$0xff] }
  0xa8   : > { %3625 = vmatmul.msk.bf16.gmra.mxu2 %vm463_vm2, %v4162_v1  ;;  %3627 = vmatmul.msk.bf16.gmra.mxu3 %vm463_vm2, %v4162_v1 }
  0xa9   : > { %755 = vmatpush.bf16.msrb.mxu2 %v737_v9  ;;  %v4170_v9 = vld [vmem:[%s6109_s3 + $0x48] sm:$0xff] }
  0xab   : > { %1399 = vperm.xlu1 %4254, %v1389_v10  }
  0xac   : > { %403 = vperm.xlu0 %4253, %v385_v11   ;;  %398 = vperm.xlu2 %4255, %v384_v12  }
  0xad   : > { %v725_v13 = vpop.permute.xlu1 %724 }
  0xae   : > { %v723_v14 = vpop.permute.xlu0 %722  ;;  %v841_v18 = vpop.permute.xlu2 %840  ;;  %v736_v19 = vsel %vm734_vm3, %v725_v13, %v727_v53 }
  0xaf   : > { %v735_v21 = vsel %vm734_vm3, %v723_v14, %v725_v13  ;;  %775 = vmatpush.bf16.msrb.mxu3 %v736_v19  ;;  %vm2026_vm3 = vcmask 179200  }
  0xb0   : > { %756 = vmatpush.bf16.msrb.mxu2 %v735_v21  ;;  %v4168_v21 = vld [vmem:[%s6109_s3 + $0x38] sm:$0xff] }
  0xb2   : > { %3615 = vmatmul.msk.bf16.gmra.mxu1 %vm463_vm2, %v4160_v20 }
  0xb3   : > { %957 = vmatpush.bf16.msra.mxu3 %v4457_v54  ;;  %3613 = vmatmul.msk.bf16.gmra.mxu0 %vm463_vm2, %v4160_v20 }
  0xb4   : > { %938 = vmatpush.bf16.msra.mxu2 %v4460_v55  ;;  %388 = vperm.xlu1 %4254, %v382_v22  }
  0xb5   : > { %1561 = vrot.lane.b32.xlu0 %v4353_v7, %s4274_s29  ;;  %393 = vperm.xlu2 %4255, %v383_v23   ;;  %v643_v28 = vpop.permute.xlu1 %642 }
  0xb6   : > { %v641_v29 = vpop.permute.xlu0 %640  ;;  %v835_v30 = vpop.permute.xlu2 %834  ;;  %v650_v31 = vsel %vm646_vm4, %v643_v28, %v645_v58 }
  0xb7   : > { %958 = vmatpush.bf16.msra.mxu3 %v4473_v59  ;;  %v649_v32 = vsel %vm646_vm4, %v641_v29, %v643_v28  ;;  %686 = vmatpush.bf16.msrb.mxu1 %v650_v31 }
  0xb8   : > { %939 = vmatpush.bf16.msra.mxu2 %v4479_v61  ;;  %3658 = vmatmul.msk.bf16.vlgmr.msrb.gmra.mxu3 %vm463_vm2, %v4165_v27 }
  0xb9   : > { %3656 = vmatmul.msk.bf16.vlgmr.msrb.gmra.mxu2 %vm463_vm2, %v4165_v27  ;;  %667 = vmatpush.bf16.msrb.mxu0 %v649_v32  ;;  %v4179_v27 = vld [vmem:[%s6109_s3 + $0x60] sm:$0xff] }
  0xbc   : > { %1563 = vrot.lane.b32.xlu1 %v4368_v16, %s4274_s29 }
  0xbd   : > { %1555 = vrot.lane.b32.xlu0 %v4366_v15, %s4274_s29  ;;  %1565 = vrot.lane.b32.xlu2 %v4348_v3, %s4274_s29  ;;  %v637_v36 = vpop.permute.xlu1 %636 }
  0xbe   : > { %v635_v37 = vpop.permute.xlu0 %634  ;;  %v1134_v38 = vpop.permute.xlu2 %1133  ;;  %v648_v39 = vsel %vm646_vm4, %v637_v36, %v639_v5 }
  0xbf   : > { %v647_v41 = vsel %vm646_vm4, %v635_v37, %v637_v36  ;;  %687 = vmatpush.bf16.msrb.mxu1 %v648_v39  ;;  %v4171_v39 = vld [vmem:[%s6109_s3 + $0x50] sm:$0xff] }
  0xc0   : > { %668 = vmatpush.bf16.msrb.mxu0 %v647_v41 }
  0xc2   : > { %3642 = vmatmul.msk.bf16.vlgmr.msrb.gmra.mxu1 %vm463_vm2, %v4163_v40 }
  0xc3   : > { %3640 = vmatmul.msk.bf16.vlgmr.msrb.gmra.mxu0 %vm463_vm2, %v4163_v40 }
  0xc4   : > { %1557 = vrot.lane.b32.xlu1 %v4355_v8, %s4274_s29 }
  0xc5   : > { %1661 = vrot.lane.b32.xlu0 %v4353_v7, %s4275_s13  ;;  %1559 = vrot.lane.b32.xlu2 %v4370_v17, %s4274_s29  ;;  %v839_v43 = vpop.permute.xlu1 %838 }
  0xc6   : > { %v837_v44 = vpop.permute.xlu0 %836  ;;  %v846_v45 = vsel %vm842_vm5, %v839_v43, %v841_v18  ;;  %v1128_v46 = vpop.permute.xlu2 %1127 }
  0xc7   : > { %v845_v47 = vsel %vm842_vm5, %v837_v44, %v839_v43  ;;  %882 = vmatpush.bf16.msra.mxu1 %v846_v45 }
  0xc8   : > { %3659 = vmatmul.msk.bf16.gmra.mxu3 %vm463_vm2, %v4166_v42  ;;  %863 = vmatpush.bf16.msra.mxu0 %v845_v47 }
  0xc9   : > { %3657 = vmatmul.msk.bf16.gmra.mxu2 %vm463_vm2, %v4166_v42  ;;  %v4180_v42 = vld [vmem:[%s6109_s3 + $0x68] sm:$0xff] }
  0xcc   : > { %1663 = vrot.lane.b32.xlu1 %v4368_v16, %s4275_s13 }
  0xcd   : > { %1655 = vrot.lane.b32.xlu0 %v4366_v15, %s4275_s13  ;;  %1665 = vrot.lane.b32.xlu2 %v4348_v3, %s4275_s13  ;;  %v833_v48 = vpop.permute.xlu1 %832 }
  0xce   : > { %v831_v49 = vpop.permute.xlu0 %830  ;;  %v1004_v50 = vpop.permute.xlu2 %1003  ;;  %v844_v52 = vsel %vm842_vm5, %v833_v48, %v835_v30 }
  0xcf   : > { %v843_v53 = vsel %vm842_vm5, %v831_v49, %v833_v48  ;;  %883 = vmatpush.bf16.msra.mxu1 %v844_v52  ;;  %vm2696_vm5 = vcmask 949248  }
  0xd0   : > { %864 = vmatpush.bf16.msra.mxu0 %v843_v53 }
  0xd2   : > { %3643 = vmatmul.msk.bf16.gmra.mxu1 %vm463_vm2, %v4164_v51 }
  0xd3   : > { %3641 = vmatmul.msk.bf16.gmra.mxu0 %vm463_vm2, %v4164_v51  ;;  %v4172_v51 = vld [vmem:[%s6109_s3 + $0x58] sm:$0xff] }
  0xd4   : > { %1657 = vrot.lane.b32.xlu1 %v4355_v8, %s4275_s13 }
  0xd5   : > { %1749 = vrot.lane.b32.xlu0 %v4353_v7, %s4276_s20  ;;  %1659 = vrot.lane.b32.xlu2 %v4370_v17, %s4275_s13  ;;  %v1132_v57 = vpop.permute.xlu1 %1131 }
  0xd6   : > { %v1130_v58 = vpop.permute.xlu0 %1129  ;;  %v1139_v60 = vsel %vm1135_vm6, %v1132_v57, %v1134_v38  ;;  %v998_v62 = vpop.permute.xlu2 %997 }
  0xd7   : > { %v1138_v63 = vsel %vm1135_vm6, %v1130_v58, %v1132_v57  ;;  %1175 = vmatpush.bf16.msrb.mxu3 %v1139_v60 }
  0xd8   : > { %3690 = vmatmul.msk.bf16.vlgmr.msra.gmra.mxu3 %vm463_vm2, %v4169_v56  ;;  %1156 = vmatpush.bf16.msrb.mxu2 %v1138_v63 }
  0xd9   : > { %3688 = vmatmul.msk.bf16.vlgmr.msra.gmra.mxu2 %vm463_vm2, %v4169_v56  ;;  %v4183_v56 = vld [vmem:[%s6109_s3 + $0x80] sm:$0xff] }
  0xdc   : > { %1751 = vrot.lane.b32.xlu1 %v4368_v16, %s4276_s20 }
  0xdd   : > { %1743 = vrot.lane.b32.xlu0 %v4366_v15, %s4276_s20  ;;  %1753 = vrot.lane.b32.xlu2 %v4348_v3, %s4276_s20  ;;  %v1126_v0 = vpop.permute.xlu1 %1125 }
  0xde   : > { %v1124_v1 = vpop.permute.xlu0 %1123  ;;  %v1318_v2 = vpop.permute.xlu2 %1317  ;;  %v1137_v5 = vsel %vm1135_vm6, %v1126_v0, %v1128_v46 }
  0xdf   : > { %v1136_v6 = vsel %vm1135_vm6, %v1124_v1, %v1126_v0  ;;  %1176 = vmatpush.bf16.msrb.mxu3 %v1137_v5 }
  0xe0   : > { %1157 = vmatpush.bf16.msrb.mxu2 %v1136_v6 }
  0xe2   : > { %3674 = vmatmul.msk.bf16.vlgmr.msra.gmra.mxu1 %vm463_vm2, %v4167_v4 }
  0xe3   : > { %3672 = vmatmul.msk.bf16.vlgmr.msra.gmra.mxu0 %vm463_vm2, %v4167_v4  ;;  %v4181_v4 = vld [vmem:[%s6109_s3 + $0x70] sm:$0xff] }
  0xe4   : > { %1745 = vrot.lane.b32.xlu1 %v4355_v8, %s4276_s20 }
  0xe5   : > { %1857 = vrot.lane.b32.xlu0 %v4353_v7, %s4277_s25  ;;  %1747 = vrot.lane.b32.xlu2 %v4370_v17, %s4276_s20  ;;  %v1002_v10 = vpop.permute.xlu1 %1001 }
  0xe6   : > { %v1000_v11 = vpop.permute.xlu0 %999  ;;  %v1009_v12 = vsel %vm1005_vm7, %v1002_v10, %v1004_v50  ;;  %v1312_v13 = vpop.permute.xlu2 %1311 }
  0xe7   : > { %v1008_v14 = vsel %vm1005_vm7, %v1000_v11, %v1002_v10  ;;  %1045 = vmatpush.bf16.msrb.mxu1 %v1009_v12  ;;  %v4184_v11 = vld [vmem:[%s6109_s3 + $0x88] sm:$0xff] }
  0xe8   : > { %3691 = vmatmul.msk.bf16.gmra.mxu3 %vm463_vm2, %v4170_v9  ;;  %1026 = vmatpush.bf16.msrb.mxu0 %v1008_v14 }
  0xe9   : > { %3689 = vmatmul.msk.bf16.gmra.mxu2 %vm463_vm2, %v4170_v9 }
  0xec   : > { %1859 = vrot.lane.b32.xlu1 %v4368_v16, %s4277_s25 }
  0xed   : > { %1851 = vrot.lane.b32.xlu0 %v4366_v15, %s4277_s25  ;;  %1861 = vrot.lane.b32.xlu2 %v4348_v3, %s4277_s25  ;;  %v996_v18 = vpop.permute.xlu1 %995 }
  0xee   : > { %v994_v19 = vpop.permute.xlu0 %993  ;;  %v1230_v20 = vpop.permute.xlu2 %1229  ;;  %v1007_v22 = vsel %vm1005_vm7, %v996_v18, %v998_v62 }
  0xef   : > { %v1006_v23 = vsel %vm1005_vm7, %v994_v19, %v996_v18  ;;  %1046 = vmatpush.bf16.msrb.mxu1 %v1007_v22  ;;  %v327_v19 = vlaneseq }
  0xf0   : > { %1027 = vmatpush.bf16.msrb.mxu0 %v1006_v23 }
  0xf1   : > { %v328_v23 = vand.u32 127, %v327_v19 }
  0xf2   : > { %3675 = vmatmul.msk.bf16.gmra.mxu1 %vm463_vm2, %v4168_v21 }
  0xf3   : > { %3673 = vmatmul.msk.bf16.gmra.mxu0 %vm463_vm2, %v4168_v21 }
  0xf4   : > { %1853 = vrot.lane.b32.xlu1 %v4355_v8, %s4277_s25 }
  0xf5   : > { %2020 = vrot.lane.b32.xlu0 %v4353_v7, %s4278_s12  ;;  %1855 = vrot.lane.b32.xlu2 %v4370_v17, %s4277_s25  ;;  %v1316_v28 = vpop.permute.xlu1 %1315  ;;  %s4281_s25 = smov 20  }
  0xf6   : > { %v1314_v29 = vpop.permute.xlu0 %1313  ;;  %v1323_v30 = vsel %vm1319_vm8, %v1316_v28, %v1318_v2  ;;  %v1224_v31 = vpop.permute.xlu2 %1223 }
  0xf7   : > { %v1322_v32 = vsel %vm1319_vm8, %v1314_v29, %v1316_v28  ;;  %1359 = vmatpush.bf16.msra.mxu3 %v1323_v30 }
  0xf8   : > { %3746 = vmatmul.msk.bf16.vlgmr.msrb.gmra.mxu3 %vm463_vm2, %v4179_v27  ;;  %1340 = vmatpush.bf16.msra.mxu2 %v1322_v32  ;;  %v4182_v32 = vld [vmem:[%s6109_s3 + $0x78] sm:$0xff] }
  0xf9   : > { %3744 = vmatmul.msk.bf16.vlgmr.msrb.gmra.mxu2 %vm463_vm2, %v4179_v27 }
  0xfc   : > { %2022 = vrot.lane.b32.xlu1 %v4368_v16, %s4278_s12 }
  0xfd   : > { %2014 = vrot.lane.b32.xlu0 %v4366_v15, %s4278_s12  ;;  %2024 = vrot.lane.b32.xlu2 %v4348_v3, %s4278_s12  ;;  %v1310_v36 = vpop.permute.xlu1 %1309 }
  0xfe   : > { %v1308_v37 = vpop.permute.xlu0 %1307  ;;  %v4642_v38 = vpop.permute.xlu2 %1394  ;;  %v1321_v40 = vsel %vm1319_vm8, %v1310_v36, %v1312_v13 }
  0xff   : > { %6152 = vst [vmem:[#allocation6_spill] sm:$0xff] %v4642_v38  ;;  %v1320_v41 = vsel %vm1319_vm8, %v1308_v37, %v1310_v36  ;;  %1360 = vmatpush.bf16.msra.mxu3 %v1321_v40  ;;  %v329_v37 = vadd.s32 128, %v328_v23  ;;  %v3950_v40 = vld [vmem:[%s6110_s4 + $0x30] sm:$0xff] }
 0x100   : > { %1341 = vmatpush.bf16.msra.mxu2 %v1320_v41 }
 0x102   : > { %3706 = vmatmul.msk.bf16.vlgmr.msrb.gmra.mxu1 %vm463_vm2, %v4171_v39 }
 0x103   : > { %3704 = vmatmul.msk.bf16.vlgmr.msrb.gmra.mxu0 %vm463_vm2, %v4171_v39 }
 0x104   : > { %2016 = vrot.lane.b32.xlu1 %v4355_v8, %s4278_s12 }
 0x105   : > { %2116 = vrot.lane.b32.xlu0 %v4413_v25, %s4274_s29  ;;  %2018 = vrot.lane.b32.xlu2 %v4370_v17, %s4278_s12  ;;  %v1228_v43 = vpop.permute.xlu1 %1227 }
 0x106   : > { %v1226_v44 = vpop.permute.xlu0 %1225  ;;  %v1235_v45 = vsel %vm1231_vm9, %v1228_v43, %v1230_v20  ;;  %v4659_v46 = vpop.permute.xlu2 %398 }
 0x107   : > { %v1234_v47 = vsel %vm1231_vm9, %v1226_v44, %v1228_v43  ;;  %1271 = vmatpush.bf16.msra.mxu1 %v1235_v45  ;;  %v4766_v43 = vand.u32 15, %v329_v37  ;;  %v4770_v44 = vand.u32 15, %v328_v23 }
 0x108   : > { %3747 = vmatmul.msk.bf16.gmra.mxu3 %vm463_vm2, %v4180_v42  ;;  %1252 = vmatpush.bf16.msra.mxu0 %v1234_v47 }
 0x109   : > { %3745 = vmatmul.msk.bf16.gmra.mxu2 %vm463_vm2, %v4180_v42  ;;  %6160 = vst [vmem:[#allocation14_spill] sm:$0xff] %v4766_v43  ;;  %v4789_v19 = vadd.s32 4294967294, %v4770_v44 }
 0x10a   : > { %6161 = vst [vmem:[#allocation15_spill] sm:$0xff] %v4770_v44 }
 0x10b   : > { %vm601_vm13 = vcmp.ge.s32.totalorder %v4789_v19, 0 }
 0x10c   : > { %2118 = vrot.lane.b32.xlu1 %v4411_v24, %s4274_s29 }
 0x10d   : > { %2110 = vrot.lane.b32.xlu0 %v4428_v34, %s4274_s29  ;;  %2120 = vrot.lane.b32.xlu2 %v4415_v26, %s4274_s29  ;;  %v1222_v48 = vpop.permute.xlu1 %1221 }
 0x10e   : > { %v1220_v49 = vpop.permute.xlu0 %1219  ;;  %v1233_v52 = vsel %vm1231_vm9, %v1222_v48, %v1224_v31 }
 0x10f   : > { %v4670_v50 = vpop.permute.xlu2 %393  ;;  %v1232_v53 = vsel %vm1231_vm9, %v1220_v49, %v1222_v48  ;;  %1272 = vmatpush.bf16.msra.mxu1 %v1233_v52 }
 0x110   : > { %1253 = vmatpush.bf16.msra.mxu0 %v1232_v53  ;;  %v4779_v53 = vadd.s32 4294967294, %v4766_v43 }
 0x112   : > { %3707 = vmatmul.msk.bf16.gmra.mxu1 %vm463_vm2, %v4172_v51  ;;  %vm602_vm11 = vcmp.ge.s32.totalorder %v4779_v53, 0 }
 0x113   : > { %3705 = vmatmul.msk.bf16.gmra.mxu0 %vm463_vm2, %v4172_v51 }
 0x114   : > { %2112 = vrot.lane.b32.xlu1 %v4426_v33, %s4274_s29 }
 0x115   : > { %2211 = vrot.lane.b32.xlu0 %v4413_v25, %s4275_s13  ;;  %2114 = vrot.lane.b32.xlu2 %v4430_v35, %s4274_s29  ;;  %v4688_v57 = vpop.permute.xlu1 %1409 }
 0x116   : > { %6153 = vst [vmem:[#allocation7_spill] sm:$0xff] %v4688_v57  ;;  %v4690_v58 = vpop.permute.xlu0 %1404 }
 0x117   : > { %v1566_v60 = vpop.permute.xlu2 %1565 }
 0x118   : > { %3778 = vmatmul.msk.bf16.vlgmr.msra.gmra.mxu3 %vm463_vm2, %v4183_v56 }
 0x119   : > { %3776 = vmatmul.msk.bf16.vlgmr.msra.gmra.mxu2 %vm463_vm2, %v4183_v56 }
 0x11b   : > { %v4694_v62 = vpop.f32.mrf.mxu2  ;;  %v4696_v63 = vpop.f32.mrf.mxu3 }
 0x11c   : > { %2213 = vrot.lane.b32.xlu1 %v4411_v24, %s4275_s13 }
 0x11d   : > { %2205 = vrot.lane.b32.xlu0 %v4428_v34, %s4275_s13  ;;  %2215 = vrot.lane.b32.xlu2 %v4415_v26, %s4275_s13  ;;  %v4704_v0 = vpop.permute.xlu1 %1399 }
 0x11e   : > { %6154 = vst [vmem:[#allocation8_spill] sm:$0xff] %v4704_v0  ;;  %v404_v1 = vpop.permute.xlu0 %403 }
 0x11f   : > { %v4706_v2 = vpop.permute.xlu2 %1559  ;;  %v498_v5 = vpop.f32.mrf.mxu1 }
 0x120   : > { %6155 = vst [vmem:[#allocation9_spill] sm:$0xff] %v4706_v2  ;;  %v4711_v6 = vpop.f32.mrf.mxu0 }
 0x122   : > { %3762 = vmatmul.msk.bf16.vlgmr.msra.gmra.mxu1 %vm463_vm2, %v4181_v4 }
 0x123   : > { %v4714_v9 = vpop.f32.mrf.mxu2  ;;  %v4716_v10 = vpop.f32.mrf.mxu3  ;;  %3760 = vmatmul.msk.bf16.vlgmr.msra.gmra.mxu0 %vm463_vm2, %v4181_v4 }
 0x124   : > { %2207 = vrot.lane.b32.xlu1 %v4426_v33, %s4275_s13  ;;  %v613_v57 = vsel %vm601_vm13, %v4714_v9, 0.0 }
 0x125   : > { %2298 = vrot.lane.b32.xlu0 %v4413_v25, %s4276_s20  ;;  %2209 = vrot.lane.b32.xlu2 %v4430_v35, %s4275_s13 }
 0x126   : > { %v389_v12 = vpop.permute.xlu1 %388 }
 0x127   : > { %v1562_v13 = vpop.permute.xlu0 %1561  ;;  %v4728_v14 = vpop.permute.xlu2 %1665 }
 0x128   : > { %v500_v18 = vpop.f32.mrf.mxu1  ;;  %3779 = vmatmul.msk.bf16.gmra.mxu3 %vm463_vm2, %v4184_v11  ;;  %v481_v20 = vpop.f32.mrf.mxu0 }
 0x129   : > { %3777 = vmatmul.msk.bf16.gmra.mxu2 %vm463_vm2, %v4184_v11  ;;  %v501_v56 = vadd.f32 %v500_v18, %v4670_v50  ;;  %v4783_v11 = vadd.s32 2, %v4766_v43  ;;  %v3949_v18 = vld [vmem:[%s6110_s4 + $0x28] sm:$0xff] }
 0x12b   : > { %v4732_v21 = vpop.f32.mrf.mxu2  ;;  %v4734_v22 = vpop.f32.mrf.mxu3  ;;  %vm792_vm12 = vcmp.lt.s32.totalorder %v4783_v11, 16  ;;  %v6197_v11 = vld [vmem:[#allocation8_spill] sm:$0xff] }
 0x12c   : > { %2300 = vrot.lane.b32.xlu1 %v4411_v24, %s4276_s20 }
 0x12d   : > { %2292 = vrot.lane.b32.xlu0 %v4428_v34, %s4276_s20  ;;  %2302 = vrot.lane.b32.xlu2 %v4415_v26, %s4276_s20 }
 0x12e   : > { %v1564_v27 = vpop.permute.xlu1 %1563 }
 0x12f   : > { %v4742_v28 = vpop.permute.xlu0 %1555  ;;  %v4745_v29 = vsel %vm1567_vm10, %v1562_v13, %v1564_v27  ;;  %v4748_v30 = vsel %vm1567_vm10, %v1564_v27, %v1566_v60  ;;  %v4750_v31 = vpop.permute.xlu2 %1659  ;;  %v3951_v13 = vld [vmem:[%s6110_s4 + $0x38] sm:$0xff]  ;;  %v4793_v27 = vadd.s32 2, %v4770_v44 }
 0x130   : > { %6156 = vst [vmem:[#allocation10_spill] sm:$0xff] %v4742_v28  ;;  %v503_v36 = vpop.f32.mrf.mxu1  ;;  %v484_v39 = vpop.f32.mrf.mxu0 }
 0x131   : > { %6157 = vst [vmem:[#allocation11_spill] sm:$0xff] %v4745_v29  ;;  %v504_v47 = vadd.f32 %v503_v36, %v4659_v46  ;;  %v485_v51 = vadd.f32 %v484_v39, %v4659_v46  ;;  %v482_v46 = vadd.f32 %v481_v20, %v4670_v50  ;;  %v499_v36 = vadd.f32 %v498_v5, %v389_v12 }
 0x132   : > { %6158 = vst [vmem:[#allocation12_spill] sm:$0xff] %v4748_v30  ;;  %3763 = vmatmul.msk.bf16.gmra.mxu1 %vm463_vm2, %v4182_v32  ;;  %v511_v20 = vmax.f32 %v501_v56, 0.0  ;;  %vm791_vm14 = vcmp.lt.s32.totalorder %v4793_v27, 16  ;;  %v612_v56 = vsel %vm602_vm11, %v4696_v63, 0.0 }
 0x133   : > { %6159 = vst [vmem:[#allocation13_spill] sm:$0xff] %v4750_v31  ;;  %v4759_v41 = vpop.f32.mrf.mxu2  ;;  %v4761_v42 = vpop.f32.mrf.mxu3  ;;  %3761 = vmatmul.msk.bf16.gmra.mxu0 %vm463_vm2, %v4182_v32  ;;  %v3948_v32 = vld [vmem:[%s6110_s4 + $0x20] sm:$0xff]  ;;  %v513_v37 = vmax.f32 %v504_v47, 0.0  ;;  %v510_v5 = vmax.f32 %v482_v46, 0.0  ;;  %v611_v46 = vsel %vm601_vm13, %v4694_v62, 0.0 }
 0x134   : > { %2294 = vrot.lane.b32.xlu1 %v4426_v33, %s4276_s20 }
 0x135   : > { %2389 = vperm.xlu0 %4253, %v3950_v40   ;;  %2296 = vrot.lane.b32.xlu2 %v4430_v35, %s4276_s20  ;;  %v480_v40 = vadd.f32 %v4711_v6, %v389_v12  ;;  %v509_v12 = vmax.f32 %v499_v36, 0.0 }
 0x136   : > { %v4772_v45 = vpop.permute.xlu1 %1557 }
 0x137   : > { %6162 = vst [vmem:[#allocation16_spill] sm:$0xff] %v4772_v45  ;;  %v1662_v48 = vpop.permute.xlu0 %1661  ;;  %v4775_v49 = vpop.permute.xlu2 %1753 }
 0x138   : > { %6163 = vst [vmem:[#allocation17_spill] sm:$0xff] %v4775_v49  ;;  %v505_v52 = vpop.f32.mrf.mxu1  ;;  %v486_v60 = vpop.f32.mrf.mxu0 }
 0x139   : > { %v506_v4 = vadd.f32 %v505_v52, %v404_v1  ;;  %v487_v23 = vadd.f32 %v486_v60, %v404_v1  ;;  %v512_v52 = vmax.f32 %v485_v51, 0.0 }
 0x13b   : > { %v515_v39 = vmax.f32 %v506_v4, 0.0  ;;  %v514_v43 = vmax.f32 %v487_v23, 0.0  ;;  %v777_v1 = vpop.f32.mrf.mxu3 }
 0x13c   : > { %v758_v50 = vpop.f32.mrf.mxu2  ;;  %2394 = vperm.xlu1 %4254, %v3951_v13   ;;  %v508_v13 = vmax.f32 %v480_v40, 0.0  ;;  %v800_v23 = vsel %vm792_vm12, %v777_v1, 0.0 }
 0x13d   : > { %v519_v60 = vpack.c.bf16 %v515_v39, %v513_v37  ;;  %2384 = vperm.xlu0 %4253, %v3949_v18   ;;  %2379 = vperm.xlu2 %4255, %v3948_v32   ;;  %v518_v47 = vpack.c.bf16 %v514_v43, %v512_v52  ;;  %v799_v18 = vsel %vm791_vm14, %v758_v50, 0.0  ;;  %v517_v37 = vpack.c.bf16 %v511_v20, %v509_v12 }
 0x13e   : > { %v1664_v6 = vpop.permute.xlu1 %1663  ;;  %v516_v52 = vpack.c.bf16 %v510_v5, %v508_v13  ;;  %v616_v13 = vsel %vm602_vm11, %v4734_v22, 0.0 }
 0x13f   : > { %v4806_v51 = vpop.permute.xlu0 %1655  ;;  %v4808_v4 = vpop.permute.xlu2 %1747  ;;  %1527 = vmatpush.bf16.msrb.mxu3 %v519_v60  ;;  %1508 = vmatpush.bf16.msrb.mxu2 %v518_v47  ;;  %v1670_v63 = vsel %vm1667_vm15, %v1662_v48, %v1664_v6  ;;  %v1671_v40 = vsel %vm1667_vm15, %v1664_v6, %v4728_v14 }
 0x140   : > { %6164 = vst [vmem:[#allocation18_spill] sm:$0xff] %v4806_v51  ;;  %v689_v43 = vpop.f32.mrf.mxu1  ;;  %v670_v32 = vpop.f32.mrf.mxu0  ;;  %v614_v51 = vsel %vm602_vm11, %v4716_v10, 0.0  ;;  %v4145_v10 = vld [vmem:[%s6111_s5] sm:$0xff] }
 0x141   : > { %6165 = vst [vmem:[#allocation19_spill] sm:$0xff] %v4808_v4  ;;  %v700_v36 = vadd.f32 %v689_v43, %v612_v56  ;;  %v699_v39 = vadd.f32 %v670_v32, %v611_v46  ;;  %v615_v46 = vsel %vm601_vm13, %v4732_v21, 0.0 }
 0x143   : > { %v808_v1 = vadd.f32 %v800_v23, %v700_v36  ;;  %1528 = vmatpush.bf16.msrb.mxu3 %v517_v37  ;;  %v807_v60 = vadd.f32 %v799_v18, %v699_v39  ;;  %v4825_v44 = vpop.f32.mrf.mxu3  ;;  %1509 = vmatpush.bf16.msrb.mxu2 %v516_v52 }
 0x144   : > { %v4823_v47 = vpop.f32.mrf.mxu2  ;;  %2603 = vrot.lane.b32.xlu1 %v4353_v7, %s4273_s19 }
 0x145   : > { %2607 = vrot.lane.b32.xlu0 %v4348_v3, %s4273_s19  ;;  %2605 = vrot.lane.b32.xlu2 %v4368_v16, %s4273_s19 }
 0x146   : > { %v4833_v62 = vpop.permute.xlu1 %1657  ;;  %3800 = vmatmul.msk.bf16.vlgmr.msrb.gmra.mxu2 %vm463_vm2, %v4145_v10  ;;  %3802 = vmatmul.msk.bf16.vlgmr.msrb.gmra.mxu3 %vm463_vm2, %v4145_v10 }
 0x147   : > { %6166 = vst [vmem:[#allocation20_spill] sm:$0xff] %v4833_v62  ;;  %1688 = vmatpush.bf16.msra.mxu2 %v1670_v63  ;;  %1707 = vmatpush.bf16.msra.mxu3 %v1671_v40  ;;  %v4835_v14 = vpop.permute.xlu0 %1749  ;;  %v4837_v48 = vpop.permute.xlu2 %1861 }
 0x148   : > { %6167 = vst [vmem:[#allocation21_spill] sm:$0xff] %v4835_v14  ;;  %v4839_v50 = vpop.f32.mrf.mxu1  ;;  %v4841_v20 = vpop.f32.mrf.mxu0 }
 0x149   : > { %6168 = vst [vmem:[#allocation22_spill] sm:$0xff] %v4837_v48  ;;  %v702_v38 = vadd.f32 %v4839_v50, %v614_v51  ;;  %v618_v51 = vsel %vm602_vm11, %v4761_v42, 0.0 }
 0x14b   : > { %v782_v6 = vpop.f32.mrf.mxu3 }
 0x14c   : > { %v763_v5 = vpop.f32.mrf.mxu2  ;;  %2597 = vrot.lane.b32.xlu1 %v4366_v15, %s4273_s19  ;;  %v804_v23 = vsel %vm792_vm12, %v782_v6, 0.0 }
 0x14d   : > { %2601 = vrot.lane.b32.xlu0 %v4370_v17, %s4273_s19  ;;  %2599 = vrot.lane.b32.xlu2 %v4355_v8, %s4273_s19  ;;  %v803_v18 = vsel %vm791_vm14, %v763_v5, 0.0  ;;  %s4279_s19 = smov 116  }
 0x14e   : > { %v4849_v12 = vpop.permute.xlu1 %1751 }
 0x14f   : > { %6169 = vst [vmem:[#allocation23_spill] sm:$0xff] %v4849_v12  ;;  %v4851_v56 = vpop.permute.xlu0 %1743  ;;  %v4863_v32 = vpop.permute.xlu2 %1855 }
 0x150   : > { %6170 = vst [vmem:[#allocation24_spill] sm:$0xff] %v4851_v56  ;;  %v694_v43 = vpop.f32.mrf.mxu1  ;;  %v675_v36 = vpop.f32.mrf.mxu0 }
 0x151   : > { %6171 = vst [vmem:[#allocation25_spill] sm:$0xff] %v4863_v32  ;;  %v704_v37 = vadd.f32 %v694_v43, %v616_v13  ;;  %v703_v39 = vadd.f32 %v675_v36, %v615_v46 }
 0x153   : > { %v812_v52 = vadd.f32 %v804_v23, %v704_v37  ;;  %v811_v63 = vadd.f32 %v803_v18, %v703_v39  ;;  %v4867_v22 = vpop.f32.mrf.mxu3 }
 0x154   : > { %v4865_v40 = vpop.f32.mrf.mxu2  ;;  %2690 = vrot.lane.b32.xlu1 %v4353_v7, %s4279_s19 }
 0x155   : > { %2694 = vrot.lane.b32.xlu0 %v4348_v3, %s4279_s19  ;;  %2692 = vrot.lane.b32.xlu2 %v4368_v16, %s4279_s19  ;;  %v805_v10 = vsel %vm791_vm14, %v4865_v40, 0.0 }
 0x156   : > { %v4872_v21 = vpop.permute.xlu1 %1745 }
 0x157   : > { %6172 = vst [vmem:[#allocation26_spill] sm:$0xff] %v4872_v21  ;;  %v4874_v5 = vpop.permute.xlu0 %1857  ;;  %v4880_v23 = vpop.permute.xlu2 %2024 }
 0x158   : > { %v4876_v6 = vpop.f32.mrf.mxu1  ;;  %v4878_v13 = vpop.f32.mrf.mxu0  ;;  %6173 = vst [vmem:[#allocation27_spill] sm:$0xff] %v4880_v23 }
 0x159   : > { %v706_v42 = vadd.f32 %v4876_v6, %v618_v51 }
 0x15b   : > { %v960_v46 = vpop.f32.mrf.mxu3 }
 0x15c   : > { %v941_v43 = vpop.f32.mrf.mxu2  ;;  %2684 = vrot.lane.b32.xlu1 %v4366_v15, %s4279_s19 }
 0x15d   : > { %2688 = vrot.lane.b32.xlu0 %v4370_v17, %s4279_s19  ;;  %2686 = vrot.lane.b32.xlu2 %v4355_v8, %s4279_s19 }
 0x15e   : > { %v4885_v18 = vpop.permute.xlu1 %1859 }
 0x15f   : > { %v4887_v36 = vpop.permute.xlu0 %1851 }
 0x160   : > { %6174 = vst [vmem:[#allocation28_spill] sm:$0xff] %v4887_v36  ;;  %v885_v37 = vpop.f32.mrf.mxu1  ;;  %v866_v39 = vpop.f32.mrf.mxu0 }
 0x161   : > { %v896_v61 = vsel %vm602_vm11, %v885_v37, 0.0  ;;  %v895_v59 = vsel %vm601_vm13, %v866_v39, 0.0  ;;  %v4900_v36 = vpop.permute.xlu2 %2018 }
 0x162   : > { %v904_v55 = vadd.f32 %v896_v61, %v808_v1  ;;  %v903_v54 = vadd.f32 %v895_v59, %v807_v60  ;;  %6175 = vst [vmem:[#allocation29_spill] sm:$0xff] %v4900_v36 }
 0x163   : > { %v4895_v23 = vpop.f32.mrf.mxu3 }
 0x164   : > { %v4893_v32 = vpop.f32.mrf.mxu2  ;;  %2798 = vrot.lane.b32.xlu1 %v4353_v7, %s4280_s24  ;;  %v4898_v56 = vadd.f32 %v960_v46, %v904_v55  ;;  %v4904_v37 = vadd.f32 %v941_v43, %v903_v54 }
 0x165   : > { %2802 = vrot.lane.b32.xlu0 %v4348_v3, %s4280_s24  ;;  %2800 = vrot.lane.b32.xlu2 %v4368_v16, %s4280_s24 }
 0x166   : > { %v4906_v39 = vpop.permute.xlu1 %1853 }
 0x167   : > { %6176 = vst [vmem:[#allocation30_spill] sm:$0xff] %v4906_v39  ;;  %v4908_v59 = vpop.permute.xlu0 %2020 }
 0x168   : > { %6177 = vst [vmem:[#allocation31_spill] sm:$0xff] %v4908_v59  ;;  %v4910_v61 = vpop.f32.mrf.mxu1  ;;  %v4912_v1 = vpop.f32.mrf.mxu0 }
 0x169   : > { %v4919_v54 = vpop.permute.xlu2 %2120  ;;  %v898_v9 = vsel %vm602_vm11, %v4910_v61, 0.0 }
 0x16a   : > { %6179 = vst [vmem:[#allocation33_spill] sm:$0xff] %v4919_v54 }
 0x16b   : > { %v965_v21 = vpop.f32.mrf.mxu3 }
 0x16c   : > { %v946_v60 = vpop.f32.mrf.mxu2  ;;  %2792 = vrot.lane.b32.xlu1 %v4366_v15, %s4280_s24 }
 0x16d   : > { %2796 = vrot.lane.b32.xlu0 %v4370_v17, %s4280_s24  ;;  %2794 = vrot.lane.b32.xlu2 %v4355_v8, %s4280_s24 }
 0x16e   : > { %v4917_v55 = vpop.permute.xlu1 %2022 }
 0x16f   : > { %6178 = vst [vmem:[#allocation32_spill] sm:$0xff] %v4917_v55  ;;  %v4921_v43 = vpop.permute.xlu0 %2014 }
 0x170   : > { %6180 = vst [vmem:[#allocation34_spill] sm:$0xff] %v4921_v43  ;;  %v890_v46 = vpop.f32.mrf.mxu1  ;;  %v871_v36 = vpop.f32.mrf.mxu0 }
 0x171   : > { %v900_v39 = vsel %vm602_vm11, %v890_v46, 0.0  ;;  %v899_v59 = vsel %vm601_vm13, %v871_v36, 0.0 }
 0x172   : > { %v908_v4 = vadd.f32 %v900_v39, %v812_v52  ;;  %v907_v14 = vadd.f32 %v899_v59, %v811_v63  ;;  %v4944_v63 = vpop.permute.xlu2 %2114 }
 0x173   : > { %v4929_v12 = vpop.f32.mrf.mxu3  ;;  %6183 = vst [vmem:[#allocation37_spill] sm:$0xff] %v4944_v63 }
 0x174   : > { %v4927_v28 = vpop.f32.mrf.mxu2  ;;  %2961 = vrot.lane.b32.xlu1 %v4353_v7, %s4281_s25  ;;  %v4932_v54 = vadd.f32 %v965_v21, %v908_v4  ;;  %v4936_v43 = vadd.f32 %v946_v60, %v907_v14 }
 0x175   : > { %2965 = vrot.lane.b32.xlu0 %v4348_v3, %s4281_s25  ;;  %2963 = vrot.lane.b32.xlu2 %v4368_v16, %s4281_s25 }
 0x176   : > { %v4938_v46 = vpop.permute.xlu1 %2016 }
 0x177   : > { %6181 = vst [vmem:[#allocation35_spill] sm:$0xff] %v4938_v46  ;;  %v4940_v36 = vpop.permute.xlu0 %2116 }
 0x178   : > { %6182 = vst [vmem:[#allocation36_spill] sm:$0xff] %v4940_v36  ;;  %v4942_v52 = vpop.f32.mrf.mxu1  ;;  %v4946_v39 = vpop.f32.mrf.mxu0 }
 0x17a   : > { %v4963_v21 = vpop.permute.xlu2 %2215 }
 0x17b   : > { %v4950_v7 = vpop.f32.mrf.mxu3  ;;  %6186 = vst [vmem:[#allocation40_spill] sm:$0xff] %v4963_v21 }
 0x17c   : > { %v4948_v59 = vpop.f32.mrf.mxu2  ;;  %2955 = vrot.lane.b32.xlu1 %v4366_v15, %s4281_s25 }
 0x17d   : > { %2959 = vrot.lane.b32.xlu0 %v4370_v17, %s4281_s25  ;;  %2957 = vrot.lane.b32.xlu2 %v4355_v8, %s4281_s25 }
 0x17e   : > { %v4955_v3 = vpop.permute.xlu1 %2118 }
 0x17f   : > { %6184 = vst [vmem:[#allocation38_spill] sm:$0xff] %v4955_v3  ;;  %v4957_v16 = vpop.permute.xlu0 %2110 }
 0x180   : > { %6185 = vst [vmem:[#allocation39_spill] sm:$0xff] %v4957_v16  ;;  %v4959_v4 = vpop.f32.mrf.mxu1  ;;  %v4961_v14 = vpop.f32.mrf.mxu0 }
 0x182   : > { %v4987_v46 = vpop.permute.xlu2 %2209 }
 0x183   : > { %v4967_v63 = vpop.f32.mrf.mxu3  ;;  %6189 = vst [vmem:[#allocation43_spill] sm:$0xff] %v4987_v46 }
 0x184   : > { %v4965_v60 = vpop.f32.mrf.mxu2  ;;  %3057 = vrot.lane.b32.xlu1 %v4413_v25, %s4282_s26 }
 0x185   : > { %3061 = vrot.lane.b32.xlu0 %v4415_v26, %s4282_s26  ;;  %3059 = vrot.lane.b32.xlu2 %v4411_v24, %s4282_s26 }
 0x186   : > { %v4972_v8 = vpop.permute.xlu1 %2112 }
 0x187   : > { %6187 = vst [vmem:[#allocation41_spill] sm:$0xff] %v4972_v8  ;;  %v4974_v15 = vpop.permute.xlu0 %2211 }
 0x188   : > { %6188 = vst [vmem:[#allocation42_spill] sm:$0xff] %v4974_v15  ;;  %v4976_v17 = vpop.f32.mrf.mxu1  ;;  %v4978_v16 = vpop.f32.mrf.mxu0 }
 0x18b   : > { %v4982_v3 = vpop.f32.mrf.mxu3 }
 0x18c   : > { %v4980_v36 = vpop.f32.mrf.mxu2  ;;  %3051 = vrot.lane.b32.xlu1 %v4428_v34, %s4282_s26 }
 0x18d   : > { %3055 = vrot.lane.b32.xlu0 %v4430_v35, %s4282_s26  ;;  %3053 = vrot.lane.b32.xlu2 %v4426_v33, %s4282_s26  ;;  %s6087_s26 = scalar_lea.vmem %s6114_s8, %s4143_s18 }
 0x18e   : > { %v4989_v21 = vpop.permute.xlu1 %2213 }
 0x18f   : > { %6190 = vst [vmem:[#allocation44_spill] sm:$0xff] %v4989_v21  ;;  %v4991_v8 = vpop.permute.xlu0 %2205 }
 0x190   : > { %6191 = vst [vmem:[#allocation45_spill] sm:$0xff] %v4991_v8  ;;  %v1053_v15 = vpop.f32.mrf.mxu1  ;;  %v1034_v55 = vpop.f32.mrf.mxu0 }
 0x191   : > { %v5007_v8 = vpop.permute.xlu2 %2302 }
 0x192   : > { %6194 = vst [vmem:[#allocation48_spill] sm:$0xff] %v5007_v8 }
 0x193   : > { %v4995_v45 = vpop.f32.mrf.mxu3 }
 0x194   : > { %v4993_v49 = vpop.f32.mrf.mxu2  ;;  %3153 = vrot.lane.b32.xlu1 %v4413_v25, %s4267_s14 }
 0x195   : > { %3157 = vrot.lane.b32.xlu0 %v4415_v26, %s4267_s14  ;;  %3155 = vrot.lane.b32.xlu2 %v4411_v24, %s4267_s14 }
 0x196   : > { %v5003_v46 = vpop.permute.xlu1 %2207 }
 0x197   : > { %6192 = vst [vmem:[#allocation46_spill] sm:$0xff] %v5003_v46  ;;  %v5005_v21 = vpop.permute.xlu0 %2298 }
 0x198   : > { %6193 = vst [vmem:[#allocation47_spill] sm:$0xff] %v5005_v21  ;;  %v5009_v2 = vpop.f32.mrf.mxu1  ;;  %v5011_v29 = vpop.f32.mrf.mxu0 }
 0x199   : > { %v5035_v48 = vpop.permute.xlu2 %2296 }
 0x19b   : > { %v5015_v31 = vpop.f32.mrf.mxu3 }
 0x19c   : > { %v5013_v30 = vpop.f32.mrf.mxu2  ;;  %3147 = vrot.lane.b32.xlu1 %v4428_v34, %s4267_s14 }
 0x19d   : > { %3151 = vrot.lane.b32.xlu0 %v4430_v35, %s4267_s14  ;;  %3149 = vrot.lane.b32.xlu2 %v4426_v33, %s4267_s14  ;;  %s4283_s14 = smov 52  }
 0x19e   : > { %v5023_v21 = vpop.permute.xlu1 %2300 }
 0x19f   : > { %6195 = vst [vmem:[#allocation49_spill] sm:$0xff] %v5023_v21  ;;  %v5025_v8 = vpop.permute.xlu0 %2292  ;;  %v701_v21 = vadd.f32 %v4841_v20, %v613_v57  ;;  %v802_v57 = vsel %vm792_vm12, %v4825_v44, 0.0 }
 0x1a0   : > { %6196 = vst [vmem:[#allocation50_spill] sm:$0xff] %v5025_v8  ;;  %v5027_v46 = vpop.f32.mrf.mxu1  ;;  %v5032_v62 = vpop.f32.mrf.mxu0  ;;  %v810_v50 = vadd.f32 %v802_v57, %v702_v38 }
 0x1a2   : > { %v906_v6 = vadd.f32 %v898_v9, %v810_v50  ;;  %v1063_v9 = vsel %vm792_vm12, %v1053_v15, 0.0  ;;  %v1059_v15 = vsel %vm792_vm12, %v4959_v4, 0.0  ;;  %v1193_v4 = vsel %vm602_vm11, %v4982_v3, 0.0 }
 0x1a3   : > { %v5043_v8 = vpop.f32.mrf.mxu3 }
 0x1a4   : > { %v5041_v0 = vpop.f32.mrf.mxu2  ;;  %3240 = vrot.lane.b32.xlu1 %v4413_v25, %s4283_s14  ;;  %v617_v25 = vsel %vm601_vm13, %v4759_v41, 0.0  ;;  %v973_v50 = vadd.f32 %v4895_v23, %v906_v6  ;;  %v1071_v23 = vadd.f32 %v1063_v9, %v4932_v54 }
 0x1a5   : > { %3244 = vrot.lane.b32.xlu0 %v4415_v26, %s4283_s14  ;;  %3242 = vrot.lane.b32.xlu2 %v4411_v24, %s4283_s14  ;;  %v801_v26 = vsel %vm791_vm14, %v4823_v47, 0.0  ;;  %v705_v44 = vadd.f32 %v4878_v13, %v617_v25  ;;  %v897_v24 = vsel %vm601_vm13, %v4912_v1, 0.0  ;;  %v806_v47 = vsel %vm792_vm12, %v4867_v22, 0.0 }
 0x1a6   : > { %v5067_v20 = vpop.permute.xlu1 %2294  ;;  %v809_v38 = vadd.f32 %v801_v26, %v701_v21  ;;  %v902_v13 = vsel %vm602_vm11, %v4942_v52, 0.0  ;;  %v814_v1 = vadd.f32 %v806_v47, %v706_v42  ;;  %v901_v21 = vsel %vm601_vm13, %v4946_v39, 0.0  ;;  %v5104_v42 = vpop.permute.xlu2 %2379 }
 0x1a7   : > { %v5078_v41 = vpop.permute.xlu0 %2389  ;;  %v813_v40 = vadd.f32 %v805_v10, %v705_v44  ;;  %v1062_v25 = vsel %vm791_vm14, %v1034_v55, 0.0  ;;  %v1061_v52 = vsel %vm792_vm12, %v4976_v17, 0.0  ;;  %v1060_v55 = vsel %vm791_vm14, %v4978_v16, 0.0 }
 0x1a8   : > { %v5080_v61 = vpop.f32.mrf.mxu1  ;;  %v5091_v51 = vpop.f32.mrf.mxu0  ;;  %v905_v57 = vadd.f32 %v897_v24, %v809_v38  ;;  %v910_v22 = vadd.f32 %v902_v13, %v814_v1  ;;  %v1070_v16 = vadd.f32 %v1062_v25, %v4936_v43  ;;  %v1069_v24 = vadd.f32 %v1061_v52, %v973_v50  ;;  %v4127_v1 = vld [vmem:[%s6110_s4 + $0x58] sm:$0xff] }
 0x1a9   : > { %v909_v39 = vadd.f32 %v901_v21, %v813_v40  ;;  %v1064_v43 = vsel %vm791_vm14, %v5011_v29, 0.0  ;;  %v1201_v13 = vadd.f32 %v1193_v4, %v1071_v23  ;;  %v1188_v29 = vsel %vm601_vm13, %v4948_v59, 0.0 }
 0x1aa   : > { %v972_v17 = vadd.f32 %v4893_v32, %v905_v57  ;;  %v1067_v32 = vadd.f32 %v1059_v15, %v4898_v56  ;;  %v977_v3 = vadd.f32 %v4929_v12, %v910_v22  ;;  %v4126_v56 = vld [vmem:[%s6110_s4 + $0x50] sm:$0xff]  ;;  %v1191_v12 = vsel %vm602_vm11, %v4967_v63, 0.0  ;;  %v4146_v57 = vld [vmem:[%s6111_s5 + $0x8] sm:$0xff] }
 0x1ab   : > { %v1367_v26 = vpop.f32.mrf.mxu3  ;;  %v1190_v59 = vsel %vm601_vm13, %v4965_v60, 0.0  ;;  %v1199_v63 = vadd.f32 %v1191_v12, %v1069_v24  ;;  %v1195_v52 = vsel %vm602_vm11, %v4995_v45, 0.0  ;;  %3801 = vmatmul.msk.bf16.gmra.mxu2 %vm463_vm2, %v4146_v57  ;;  %3803 = vmatmul.msk.bf16.gmra.mxu3 %vm463_vm2, %v4146_v57  ;;  %v6199_v57 = vld [vmem:[#allocation22_spill] sm:$0xff] }
 0x1ac   : > { %3234 = vrot.lane.b32.xlu1 %v4428_v34, %s4283_s14  ;;  %v1058_v34 = vsel %vm791_vm14, %v4961_v14, 0.0  ;;  %v1348_v54 = vpop.f32.mrf.mxu2  ;;  %v1068_v38 = vadd.f32 %v1060_v55, %v972_v17  ;;  %v1377_v22 = vsel %vm792_vm12, %v1367_v26, 0.0  ;;  %v1194_v55 = vsel %vm601_vm13, %v4993_v49, 0.0 }
 0x1ad   : > { %3238 = vrot.lane.b32.xlu0 %v4430_v35, %s4283_s14  ;;  %3236 = vrot.lane.b32.xlu2 %v4426_v33, %s4283_s14  ;;  %v1192_v33 = vsel %vm601_vm13, %v4980_v36, 0.0  ;;  %v1065_v35 = vsel %vm792_vm12, %v5009_v2, 0.0  ;;  %v1189_v36 = vsel %vm602_vm11, %v4950_v7, 0.0  ;;  %v1066_v10 = vadd.f32 %v1058_v34, %v4904_v37 }
 0x1ae   : > { %v5127_v44 = vpop.permute.xlu1 %2394  ;;  %v976_v2 = vadd.f32 %v4927_v28, %v909_v39  ;;  %v1073_v7 = vadd.f32 %v1065_v35, %v977_v3  ;;  %v1200_v37 = vadd.f32 %v1192_v33, %v1070_v16  ;;  %v4124_v28 = vld [vmem:[%s6110_s4 + $0x40] sm:$0xff]  ;;  %v1197_v40 = vadd.f32 %v1189_v36, %v1067_v32  ;;  %v2606_v23 = vpop.permute.xlu2 %2605 }
 0x1af   : > { %v5135_v14 = vpop.permute.xlu0 %2384  ;;  %v1198_v25 = vadd.f32 %v1190_v59, %v1068_v38  ;;  %v1196_v39 = vadd.f32 %v1188_v29, %v1066_v10  ;;  %v1287_v15 = vadd.f32 %v5080_v61, %v1199_v63  ;;  %v1376_v60 = vsel %vm791_vm14, %v1348_v54, 0.0  ;;  %v6200_v59 = vld [vmem:[#allocation6_spill] sm:$0xff] }
 0x1b0   : > { %v1279_v6 = vpop.f32.mrf.mxu1  ;;  %v1260_v47 = vpop.f32.mrf.mxu0  ;;  %v1072_v21 = vadd.f32 %v1064_v43, %v976_v2  ;;  %v1285_v26 = vadd.f32 %v5027_v46, %v1197_v40  ;;  %v1203_v45 = vadd.f32 %v1195_v52, %v1073_v7  ;;  %v1373_v61 = vsel %vm792_vm12, %v5015_v31, 0.0  ;;  %v3423_v2 = vld [vmem:[%s5195_s23 + $0x8] sm:$0xff]  ;;  %v6201_v40 = vld [vmem:[#allocation20_spill] sm:$0xff] }
 0x1b1   : > { %v1289_v9 = vadd.f32 %v1279_v6, %v1201_v13  ;;  %v1288_v50 = vadd.f32 %v1260_v47, %v1200_v37  ;;  %v1286_v34 = vadd.f32 %v5091_v51, %v1198_v25  ;;  %v1284_v46 = vadd.f32 %v5032_v62, %v1196_v39  ;;  %v3422_v47 = vld [vmem:[%s5195_s23] sm:$0xff] }
 0x1b2   : > { %v1202_v19 = vadd.f32 %v1194_v55, %v1072_v21  ;;  %v1375_v31 = vsel %vm792_vm12, %v5043_v8, 0.0  ;;  %v1372_v35 = vsel %vm791_vm14, %v5013_v30, 0.0  ;;  %v1374_v62 = vsel %vm791_vm14, %v5041_v0, 0.0  ;;  %v4125_v8 = vld [vmem:[%s6110_s4 + $0x48] sm:$0xff]  ;;  %v6202_v25 = vld [vmem:[#allocation18_spill] sm:$0xff]  ;;  %v3424_v55 = vld [vmem:[%s5195_s23 + $0x10] sm:$0xff] }
 0x1b3   : > { %v1385_v17 = vadd.f32 %v1377_v22, %v1289_v9  ;;  %v1369_v4 = vpop.f32.mrf.mxu3  ;;  %v1384_v51 = vadd.f32 %v1376_v60, %v1288_v50  ;;  %v1383_v32 = vadd.f32 %v1375_v31, %v1287_v15  ;;  %v1381_v3 = vadd.f32 %v1373_v61, %v1285_v26  ;;  %v6203_v50 = vld [vmem:[#allocation13_spill] sm:$0xff]  ;;  %v4187_v61 = vld [vmem:[%s6109_s3 + $0xa0] sm:$0xff]  ;;  %v6204_v31 = vld [vmem:[#allocation12_spill] sm:$0xff] }
 0x1b4   : > { %3332 = vperm.xlu1 %4254, %v4126_v56   ;;  %v1350_v54 = vpop.f32.mrf.mxu2  ;;  %v1382_v6 = vadd.f32 %v1374_v62, %v1286_v34  ;;  %v1379_v36 = vsel %vm792_vm12, %v1369_v4, 0.0  ;;  %v1380_v56 = vadd.f32 %v1372_v35, %v1284_v46  ;;  %v1866_v7 = vsel %vm1863_vm0, %v4874_v5, %v4885_v18  ;;  %v3454_v34 = vld [vmem:[%s6112_s6] sm:$0xff]  ;;  %v4147_v46 = vld [vmem:[%s6111_s5 + $0x10] sm:$0xff] }
 0x1b5   : > { %3322 = vperm.xlu0 %4253, %v4124_v28   ;;  %3337 = vperm.xlu2 %4255, %v4127_v1   ;;  %v1417_v30 = vadd.f32 %v4690_v58, %v1385_v17  ;;  %v1378_v0 = vsel %vm791_vm14, %v1350_v54, 0.0  ;;  %v1416_v29 = vadd.f32 %v4690_v58, %v1384_v51  ;;  %v1415_v37 = vadd.f32 %v6197_v11, %v1383_v32  ;;  %v6198_v28 = vld [vmem:[#allocation7_spill] sm:$0xff]  ;;  %v6207_v35 = vld [vmem:[#allocation16_spill] sm:$0xff]  ;;  %v3457_v32 = vld [vmem:[%s6112_s6 + $0x18] sm:$0xff] }
 0x1b6   : > { %v2604_v53 = vpop.permute.xlu1 %2603  ;;  %v1867_v27 = vsel %vm1863_vm0, %v4885_v18, %v6199_v57  ;;  %v1413_v21 = vadd.f32 %v6200_v59, %v1381_v3  ;;  %v1414_v58 = vadd.f32 %v6197_v11, %v1382_v6  ;;  %v1668_v22 = vsel %vm1667_vm15, %v6202_v25, %v6201_v40  ;;  %v3455_v51 = vld [vmem:[%s6112_s6 + $0x8] sm:$0xff]  ;;  %v6210_v6 = vld [vmem:[#allocation10_spill] sm:$0xff]  ;;  %v6223_v25 = vld [vmem:[#allocation4_spill] sm:$0xff] }
 0x1b7   : > { %v2608_v16 = vpop.permute.xlu0 %2607  ;;  %v5188_v49 = vsel %vm1231_vm9, %v2604_v53, %v2606_v23  ;;  %v1425_v9 = vmax.f32 %v1417_v30, 0.0  ;;  %v1669_v52 = vsel %vm1667_vm15, %v6201_v40, %v6203_v50  ;;  %v1412_v39 = vadd.f32 %v6200_v59, %v1380_v56  ;;  %1689 = vmatpush.bf16.msra.mxu2 %v1668_v22  ;;  %v3425_v53 = vld [vmem:[%s5195_s23 + $0x18] sm:$0xff]  ;;  %v6205_v54 = vld [vmem:[#allocation11_spill] sm:$0xff]  ;;  %v6213_v30 = vld [vmem:[#allocation26_spill] sm:$0xff] }
 0x1b8   : > { %v5202_v24 = vsel %vm1231_vm9, %v2606_v23, %v2608_v16  ;;  %v1281_v33 = vpop.f32.mrf.mxu1  ;;  %v1262_v38 = vpop.f32.mrf.mxu0  ;;  %v1424_v18 = vmax.f32 %v1416_v29, 0.0  ;;  %1708 = vmatpush.bf16.msra.mxu3 %v1669_v52  ;;  %v1423_v23 = vmax.f32 %v1415_v37, 0.0  ;;  %v1421_v17 = vmax.f32 %v1413_v21, 0.0  ;;  %v4188_v29 = vld [vmem:[%s6109_s3 + $0xa8] sm:$0xff]  ;;  %v6218_v57 = vld [vmem:[#allocation30_spill] sm:$0xff]  ;;  %v6220_v21 = vld [vmem:[#allocation25_spill] sm:$0xff] }
 0x1b9   : > { %v1291_v43 = vadd.f32 %v1281_v33, %v1203_v45  ;;  %v1290_v10 = vadd.f32 %v1262_v38, %v1202_v19  ;;  %v1422_v45 = vmax.f32 %v1414_v58, 0.0  ;;  %v1420_v4 = vmax.f32 %v1412_v39, 0.0  ;;  %v6206_v33 = vld [vmem:[#allocation9_spill] sm:$0xff]  ;;  %v3456_v38 = vld [vmem:[%s6112_s6 + $0x10] sm:$0xff]  ;;  %v6216_v11 = vld [vmem:[#allocation31_spill] sm:$0xff] }
 0x1ba   : > { %v1429_v16 = vpack.c.bf16 %v1423_v23, %v1421_v17  ;;  %v1569_v62 = vsel %vm1567_vm10, %v6207_v35, %v6206_v33  ;;  %v1865_v58 = vsel %vm1863_vm0, %v6218_v57, %v6220_v21  ;;  %v6222_v40 = vld [vmem:[#allocation3_spill] sm:$0xff]  ;;  %v6224_v22 = vld [vmem:[#allocation5_spill] sm:$0xff]  ;;  %v6225_v39 = vld [vmem:[#allocation44_spill] sm:$0xff]  ;;  %vm3063_vm11 = vcmask 523264  }
 0x1bb   : > { %v1387_v13 = vadd.f32 %v1379_v36, %v1291_v43  ;;  %v1386_v12 = vadd.f32 %v1378_v0, %v1290_v10  ;;  %1884 = vmatpush.bf16.msrb.mxu2 %v1866_v7  ;;  %v1428_v19 = vpack.c.bf16 %v1422_v45, %v1420_v4  ;;  %3834 = vmatmul.msk.bf16.vlgmr.msra.gmra.mxu3 %vm463_vm2, %v4187_v61  ;;  %v6208_v43 = vld [vmem:[#allocation17_spill] sm:$0xff]  ;;  %v6215_v7 = vld [vmem:[#allocation32_spill] sm:$0xff]  ;;  %v4192_v50 = vld [vmem:[%s6109_s3 + $0xc8] sm:$0xff]  ;;  %vm3246_vm12 = vcmask 424960  }
 0x1bc   : > { %3327 = vperm.xlu1 %4254, %v4125_v8   ;;  %1903 = vmatpush.bf16.msrb.mxu3 %v1867_v27  ;;  %v6209_v8 = vld [vmem:[#allocation23_spill] sm:$0xff]  ;;  %v1568_v36 = vsel %vm1567_vm10, %v6210_v6, %v6207_v35  ;;  %v6211_v10 = vld [vmem:[#allocation21_spill] sm:$0xff]  ;;  %v2029_v37 = vsel %vm2026_vm3, %v6216_v11, %v6215_v7  ;;  %v6219_v27 = vld [vmem:[#allocation28_spill] sm:$0xff] }
 0x1bd   : > { %v1419_v1 = vadd.f32 %v6198_v28, %v1387_v13  ;;  %3433 = vperm.xlu0 %4253, %v3423_v2   ;;  %3428 = vperm.xlu2 %4255, %v3422_v47   ;;  %v1418_v63 = vadd.f32 %v6198_v28, %v1386_v12  ;;  %v1759_v3 = vsel %vm1755_vm1, %v6209_v8, %v6208_v43  ;;  %v6212_v47 = vld [vmem:[#allocation19_spill] sm:$0xff]  ;;  %v6214_v13 = vld [vmem:[#allocation24_spill] sm:$0xff]  ;;  %v4148_v12 = vld [vmem:[%s6111_s5 + $0x18] sm:$0xff] }
 0x1be   : > { %3832 = vmatmul.msk.bf16.vlgmr.msra.gmra.mxu2 %vm463_vm2, %v4187_v61  ;;  %v1758_v2 = vsel %vm1755_vm1, %v6211_v10, %v6209_v8  ;;  %v1757_v0 = vsel %vm1755_vm1, %v6213_v30, %v6212_v47  ;;  %v1756_v56 = vsel %vm1755_vm1, %v6214_v13, %v6213_v30  ;;  %v6217_v28 = vld [vmem:[#allocation27_spill] sm:$0xff]  ;;  %v1864_v59 = vsel %vm1863_vm0, %v6219_v27, %v6218_v57  ;;  %v4186_v52 = vld [vmem:[%s6109_s3 + $0x98] sm:$0xff]  ;;  %v4195_v61 = vld [vmem:[%s6109_s3 + $0xe0] sm:$0xff] }
 0x1bf   : > { %v1427_v5 = vmax.f32 %v1419_v1, 0.0  ;;  %v1426_v15 = vmax.f32 %v1418_v63, 0.0  ;;  %v2030_v1 = vsel %vm2026_vm3, %v6215_v7, %v6217_v28  ;;  %1885 = vmatpush.bf16.msrb.mxu2 %v1864_v59  ;;  %v4191_v63 = vld [vmem:[%s6109_s3 + $0xc0] sm:$0xff]  ;;  %v6228_v23 = vld [vmem:[#allocation35_spill] sm:$0xff]  ;;  %v4189_v17 = vld [vmem:[%s6109_s3 + $0xb0] sm:$0xff] }
 0x1c0   : > { %1904 = vmatpush.bf16.msrb.mxu3 %v1865_v58  ;;  %v6231_v4 = vld [vmem:[#allocation33_spill] sm:$0xff]  ;;  %v6234_v33 = vld [vmem:[#allocation46_spill] sm:$0xff]  ;;  %v4193_v43 = vld [vmem:[%s6109_s3 + $0xd0] sm:$0xff] }
 0x1c1   : > { %v1431_v60 = vpack.c.bf16 %v1427_v5, %v1425_v9  ;;  %v1430_v26 = vpack.c.bf16 %v1426_v15, %v1424_v18  ;;  %v4185_v9 = vld [vmem:[%s6109_s3 + $0x90] sm:$0xff]  ;;  %v6221_v5 = vld [vmem:[#allocation2_spill] sm:$0xff]  ;;  %v6235_v35 = vld [vmem:[#allocation45_spill] sm:$0xff] }
 0x1c2   : > { %v6226_v18 = vld [vmem:[#allocation42_spill] sm:$0xff]  ;;  %v6238_v6 = vld [vmem:[#allocation39_spill] sm:$0xff]  ;;  %v6239_v10 = vld [vmem:[#allocation37_spill] sm:$0xff] }
 0x1c3   : > { %1473 = vmatpush.bf16.msrb.mxu1 %v1431_v60  ;;  %1454 = vmatpush.bf16.msrb.mxu0 %v1430_v26  ;;  %v2219_v15 = vsel %vm1667_vm15, %v6226_v18, %v6225_v39  ;;  %v6227_v60 = vld [vmem:[#allocation40_spill] sm:$0xff]  ;;  %v6229_v26 = vld [vmem:[#allocation34_spill] sm:$0xff]  ;;  %v6240_v47 = vld [vmem:[#allocation49_spill] sm:$0xff] }
 0x1c4   : > { %3438 = vperm.xlu1 %4254, %v3424_v55   ;;  %2047 = vmatpush.bf16.msra.mxu2 %v2029_v37  ;;  %v2220_v55 = vsel %vm1667_vm15, %v6225_v39, %v6227_v60  ;;  %v4199_v8 = vld [vmem:[%s6109_s3 + $0x100] sm:$0xff]  ;;  %v6241_v30 = vld [vmem:[#allocation47_spill] sm:$0xff]  ;;  %v6242_v13 = vld [vmem:[#allocation48_spill] sm:$0xff] }
 0x1c5   : > { %3460 = vperm.xlu0 %4253, %v3454_v34   ;;  %3443 = vperm.xlu2 %4255, %v3425_v53   ;;  %v2027_v34 = vsel %vm2026_vm3, %v6229_v26, %v6228_v23  ;;  %v6230_v53 = vld [vmem:[#allocation29_spill] sm:$0xff]  ;;  %v4200_v11 = vld [vmem:[%s6109_s3 + $0x108] sm:$0xff]  ;;  %v6246_v21 = vld [vmem:[#allocation50_spill] sm:$0xff]  ;;  %v5439_v26 = vpop.permute.xlu1 %2597 }
 0x1c6   : > { %2066 = vmatpush.bf16.msra.mxu3 %v2030_v1  ;;  %v2028_v45 = vsel %vm2026_vm3, %v6228_v23, %v6230_v53  ;;  %v4197_v1 = vld [vmem:[%s6109_s3 + $0xf0] sm:$0xff]  ;;  %v2304_v58 = vsel %vm1755_vm1, %v6246_v21, %v5067_v20  ;;  %6254 = vst [vmem:[#allocation16_spill] sm:$0xff] %v5439_v26 }
 0x1c7   : > { %1474 = vmatpush.bf16.msrb.mxu1 %v1429_v16  ;;  %1455 = vmatpush.bf16.msrb.mxu0 %v1428_v19  ;;  %v6232_v16 = vld [vmem:[#allocation38_spill] sm:$0xff] }
 0x1c8   : > { %2048 = vmatpush.bf16.msra.mxu2 %v2027_v34  ;;  %v2125_v19 = vsel %vm1567_vm10, %v6232_v16, %v6231_v4 }
 0x1c9   : > { %v1511_v7 = vpop.f32.mrf.mxu2 }
 0x1ca   : > { %3790 = vmatmul.msk.bf16.vlgmr.msrb.gmra.mxu1 %vm463_vm2, %v4147_v46  ;;  %3788 = vmatmul.msk.bf16.vlgmr.msrb.gmra.mxu0 %vm463_vm2, %v4147_v46  ;;  %v6233_v46 = vld [vmem:[#allocation36_spill] sm:$0xff] }
 0x1cb   : > { %1607 = vmatpush.bf16.msra.mxu1 %v6204_v31  ;;  %1588 = vmatpush.bf16.msra.mxu0 %v6205_v54  ;;  %v2124_v31 = vsel %vm1567_vm10, %v6233_v46, %v6232_v16  ;;  %v4190_v54 = vld [vmem:[%s6109_s3 + $0xb8] sm:$0xff]  ;;  %v3986_v16 = vld [vmem:[%s4343_s10 + $0x20] sm:$0xf]  ;;  %v4205_v46 = vld [vmem:[%s4343_s10 + $0x24] sm:$0xf] }
 0x1cc   : > { %3465 = vperm.xlu1 %4254, %v3455_v51   ;;  %3835 = vmatmul.msk.bf16.gmra.mxu3 %vm463_vm2, %v4188_v29  ;;  %v4196_v51 = vld [vmem:[%s6109_s3 + $0xe8] sm:$0xff] }
 0x1cd   : > { %3475 = vperm.xlu0 %4253, %v3457_v32   ;;  %3470 = vperm.xlu2 %4255, %v3456_v38   ;;  %v6236_v32 = vld [vmem:[#allocation43_spill] sm:$0xff] }
 0x1ce   : > { %3833 = vmatmul.msk.bf16.gmra.mxu2 %vm463_vm2, %v4188_v29  ;;  %2067 = vmatpush.bf16.msra.mxu3 %v2028_v45  ;;  %v2218_v38 = vsel %vm1667_vm15, %v6234_v33, %v6236_v32  ;;  %v1530_v29 = vpop.f32.mrf.mxu3 }
 0x1cf   : > { %1608 = vmatpush.bf16.msra.mxu1 %v1569_v62  ;;  %1589 = vmatpush.bf16.msra.mxu0 %v1568_v36  ;;  %v2217_v62 = vsel %vm1667_vm15, %v6235_v35, %v6234_v33 }
 0x1d1   : > { %v5407_v28 = vpop.f32.mrf.mxu2 }
 0x1d2   : > { %6244 = vst [vmem:[#allocation7_spill] sm:$0xff] %v5407_v28 }
 0x1d3   : > { %1795 = vmatpush.bf16.msrb.mxu1 %v1759_v3  ;;  %1776 = vmatpush.bf16.msrb.mxu0 %v1758_v2  ;;  %v6237_v3 = vld [vmem:[#allocation41_spill] sm:$0xff] }
 0x1d4   : > { %v2122_v36 = vsel %vm1567_vm10, %v6238_v6, %v6237_v3  ;;  %v2123_v2 = vsel %vm1567_vm10, %v6237_v3, %v6239_v10  ;;  %v2691_v3 = vpop.permute.xlu1 %2690  ;;  %v3978_v6 = vld [vmem:[%s4343_s10] sm:$0xf]  ;;  %v4203_v10 = vld [vmem:[%s4343_s10 + $0x4] sm:$0xf] }
 0x1d6   : > { %v5405_v37 = vpop.f32.mrf.mxu3 }
 0x1d7   : > { %1796 = vmatpush.bf16.msrb.mxu1 %v1757_v0  ;;  %1777 = vmatpush.bf16.msrb.mxu0 %v1756_v56  ;;  %v2306_v0 = vsel %vm1755_vm1, %v6241_v30, %v6240_v47  ;;  %v2307_v56 = vsel %vm1755_vm1, %v6240_v47, %v6242_v13  ;;  %6243 = vst [vmem:[#allocation8_spill] sm:$0xff] %v5405_v37  ;;  %v3980_v47 = vld [vmem:[%s4343_s10 + $0x10] sm:$0xf0] }
 0x1d8   : > { %v3983_v30 = vor.u32 %v4203_v10, %v3980_v47 }
 0x1da   : > { %3791 = vmatmul.msk.bf16.gmra.mxu1 %vm463_vm2, %v4148_v12  ;;  %3789 = vmatmul.msk.bf16.gmra.mxu0 %vm463_vm2, %v4148_v12  ;;  %v4194_v12 = vld [vmem:[%s6109_s3 + $0xd8] sm:$0xff] }
 0x1dc   : > { %3866 = vmatmul.msk.bf16.vlgmr.msrb.gmra.mxu3 %vm463_vm2, %v4191_v63 }
 0x1dd   : > { %2256 = vmatpush.bf16.msrb.mxu3 %v2220_v55  ;;  %v5437_v55 = vpop.permute.xlu0 %2601 }
 0x1de   : > { %3864 = vmatmul.msk.bf16.vlgmr.msrb.gmra.mxu2 %vm463_vm2, %v4191_v63  ;;  %v2305_v63 = vsel %vm1755_vm1, %v5067_v20, %v5035_v48  ;;  %v5432_v48 = vpop.permute.xlu2 %2599  ;;  %v4198_v20 = vld [vmem:[%s6109_s3 + $0xf8] sm:$0xff]  ;;  %6253 = vst [vmem:[#allocation9_spill] sm:$0xff] %v5437_v55 }
 0x1df   : > { %2237 = vmatpush.bf16.msrb.mxu2 %v2219_v15  ;;  %6252 = vst [vmem:[#allocation11_spill] sm:$0xff] %v5432_v48 }
 0x1e1   : > { %2257 = vmatpush.bf16.msrb.mxu3 %v2218_v38  ;;  %v6260_v38 = vld [vmem:[#allocation14_spill] sm:$0xff] }
 0x1e2   : > { %v5506_v10 = vadd.s32 4, %v6260_v38 }
 0x1e3   : > { %2238 = vmatpush.bf16.msrb.mxu2 %v2217_v62  ;;  %v6259_v62 = vld [vmem:[#allocation15_spill] sm:$0xff] }
 0x1e4   : > { %v5456_v32 = vadd.s32 4294967292, %v6259_v62  ;;  %vm1813_vm8 = vcmp.lt.s32.totalorder %v5506_v10, 16 }
 0x1e5   : > { %v2695_v35 = vpop.permute.xlu0 %2694 }
 0x1e6   : > { %v2693_v33 = vpop.permute.xlu2 %2692  ;;  %vm1622_vm7 = vcmp.ge.s32.totalorder %v5456_v32, 0 }
 0x1ea   : > { %3818 = vmatmul.msk.bf16.vlgmr.msra.gmra.mxu1 %vm463_vm2, %v4185_v9  ;;  %3816 = vmatmul.msk.bf16.vlgmr.msra.gmra.mxu0 %vm463_vm2, %v4185_v9 }
 0x1eb   : > { %1978 = vmatpush.bf16.msra.mxu1 %v6221_v5  ;;  %1959 = vmatpush.bf16.msra.mxu0 %v6222_v40 }
 0x1ec   : > { %3867 = vmatmul.msk.bf16.gmra.mxu3 %vm463_vm2, %v4192_v50 }
 0x1ee   : > { %3865 = vmatmul.msk.bf16.gmra.mxu2 %vm463_vm2, %v4192_v50 }
 0x1ef   : > { %1979 = vmatpush.bf16.msra.mxu1 %v6223_v25  ;;  %1960 = vmatpush.bf16.msra.mxu0 %v6224_v22 }
 0x1fa   : > { %3819 = vmatmul.msk.bf16.gmra.mxu1 %vm463_vm2, %v4186_v52  ;;  %3817 = vmatmul.msk.bf16.gmra.mxu0 %vm463_vm2, %v4186_v52 }
 0x1fc   : > { %3898 = vmatmul.msk.bf16.vlgmr.msra.gmra.mxu3 %vm463_vm2, %v4195_v61 }
 0x1fe   : > { %3896 = vmatmul.msk.bf16.vlgmr.msra.gmra.mxu2 %vm463_vm2, %v4195_v61 }
 0x20a   : > { %3850 = vmatmul.msk.bf16.vlgmr.msrb.gmra.mxu1 %vm463_vm2, %v4189_v17  ;;  %3848 = vmatmul.msk.bf16.vlgmr.msrb.gmra.mxu0 %vm463_vm2, %v4189_v17 }
 0x20b   : > { %2161 = vmatpush.bf16.msrb.mxu1 %v2125_v19  ;;  %2142 = vmatpush.bf16.msrb.mxu0 %v2124_v31  ;;  %v4206_v19 = vld [vmem:[%s4343_s10 + $0x2c] sm:$0xf0] }
 0x20c   : > { %3899 = vmatmul.msk.bf16.gmra.mxu3 %vm463_vm2, %v4196_v51 }
 0x20e   : > { %3897 = vmatmul.msk.bf16.gmra.mxu2 %vm463_vm2, %v4196_v51  ;;  %v3987_v51 = vor.u32 %v4206_v19, %v3986_v16  ;;  %v4202_v16 = vld [vmem:[%s6109_s3 + $0x118] sm:$0xff] }
 0x20f   : > { %2143 = vmatpush.bf16.msrb.mxu0 %v2122_v36  ;;  %2162 = vmatpush.bf16.msrb.mxu1 %v2123_v2  ;;  %v4204_v36 = vld [vmem:[%s4343_s10 + $0xc] sm:$0xf0] }
 0x210   : > { %v3979_v2 = vor.u32 %v4204_v36, %v3978_v6 }
 0x21a   : > { %3851 = vmatmul.msk.bf16.gmra.mxu1 %vm463_vm2, %v4190_v54  ;;  %3849 = vmatmul.msk.bf16.gmra.mxu0 %vm463_vm2, %v4190_v54  ;;  %v3988_v54 = vld [vmem:[%s4343_s10 + $0x30] sm:$0xf0] }
 0x21c   : > { %3930 = vmatmul.msk.bf16.vlgmr.msrb.gmra.mxu3 %vm463_vm2, %v4199_v8 }
 0x21e   : > { %3928 = vmatmul.msk.bf16.vlgmr.msrb.gmra.mxu2 %vm463_vm2, %v4199_v8  ;;  %v3991_v8 = vor.u32 %v4205_v46, %v3988_v54 }
 0x22a   : > { %3882 = vmatmul.msk.bf16.vlgmr.msra.gmra.mxu1 %vm463_vm2, %v4193_v43  ;;  %3880 = vmatmul.msk.bf16.vlgmr.msra.gmra.mxu0 %vm463_vm2, %v4193_v43  ;;  %v5459_v43 = vadd.s32 4294967292, %v6260_v38 }
 0x22b   : > { %2324 = vmatpush.bf16.msra.mxu0 %v2306_v0  ;;  %2343 = vmatpush.bf16.msra.mxu1 %v2307_v56  ;;  %v4201_v0 = vld [vmem:[%s6109_s3 + $0x110] sm:$0xff] }
 0x22c   : > { %3931 = vmatmul.msk.bf16.gmra.mxu3 %vm463_vm2, %v4200_v11  ;;  %vm1623_vm6 = vcmp.ge.s32.totalorder %v5459_v43, 0 }
 0x22e   : > { %3929 = vmatmul.msk.bf16.gmra.mxu2 %vm463_vm2, %v4200_v11  ;;  %v1535_v50 = vpop.f32.mrf.mxu3  ;;  %v1516_v52 = vpop.f32.mrf.mxu2 }
 0x22f   : > { %2325 = vmatpush.bf16.msra.mxu0 %v2304_v58  ;;  %2344 = vmatpush.bf16.msra.mxu1 %v2305_v63  ;;  %v2687_v58 = vpop.permute.xlu2 %2686  ;;  %v2689_v63 = vpop.permute.xlu0 %2688 }
 0x236   : > { %v5428_v15 = vpop.f32.mrf.mxu3  ;;  %v5430_v60 = vpop.f32.mrf.mxu2 }
 0x237   : > { %6250 = vst [vmem:[#allocation13_spill] sm:$0xff] %v5428_v15 }
 0x238   : > { %6251 = vst [vmem:[#allocation12_spill] sm:$0xff] %v5430_v60 }
 0x23a   : > { %3883 = vmatmul.msk.bf16.gmra.mxu1 %vm463_vm2, %v4194_v12  ;;  %3881 = vmatmul.msk.bf16.gmra.mxu0 %vm463_vm2, %v4194_v12 }
 0x23e   : > { %v1710_v61 = vpop.f32.mrf.mxu3 }
 0x241   : > { %v1691_v17 = vpop.f32.mrf.mxu2 }
 0x246   : > { %v5470_v56 = vpop.f32.mrf.mxu3 }
 0x247   : > { %v1476_v57 = vpop.f32.mrf.mxu1  ;;  %v1457_v27 = vpop.f32.mrf.mxu0 }
 0x248   : > { %v5412_v59 = vadd.f32 %v1530_v29, %v1476_v57  ;;  %v5420_v9 = vadd.f32 %v1511_v7, %v1457_v27  ;;  %v2700_v29 = vsel %vm2696_vm5, %v2693_v33, %v2695_v35 }
 0x249   : > { %v5475_v11 = vpop.f32.mrf.mxu2 }
 0x24a   : > { %6245 = vst [vmem:[#allocation22_spill] sm:$0xff] %v5412_v59  ;;  %3914 = vmatmul.msk.bf16.vlgmr.msrb.gmra.mxu1 %vm463_vm2, %v4197_v1  ;;  %3912 = vmatmul.msk.bf16.vlgmr.msrb.gmra.mxu0 %vm463_vm2, %v4197_v1  ;;  %v2699_v1 = vsel %vm2696_vm5, %v2691_v3, %v2693_v33 }
 0x24b   : > { %6247 = vst [vmem:[#allocation6_spill] sm:$0xff] %v5420_v9  ;;  %2530 = vmatpush.bf16.msrb.mxu0 %v3987_v51  ;;  %2549 = vmatpush.bf16.msrb.mxu1 %v3991_v8 }
 0x24f   : > { %v5424_v39 = vpop.f32.mrf.mxu1  ;;  %v5426_v18 = vpop.f32.mrf.mxu0  ;;  %2531 = vmatpush.bf16.msrb.mxu0 %v3979_v2  ;;  %2550 = vmatpush.bf16.msrb.mxu1 %v3983_v30  ;;  %v5509_v2 = vadd.s32 4, %v6259_v62 }
 0x250   : > { %6248 = vst [vmem:[#allocation20_spill] sm:$0xff] %v5424_v39 }
 0x251   : > { %6249 = vst [vmem:[#allocation18_spill] sm:$0xff] %v5426_v18  ;;  %vm1812_vm10 = vcmp.lt.s32.totalorder %v5509_v2, 16 }
 0x257   : > { %v1481_v23 = vpop.f32.mrf.mxu1  ;;  %v1462_v34 = vpop.f32.mrf.mxu0 }
 0x258   : > { %v5441_v53 = vadd.f32 %v1535_v50, %v1481_v23  ;;  %v5443_v45 = vadd.f32 %v1516_v52, %v1462_v34  ;;  %v2685_v50 = vpop.permute.xlu1 %2684  ;;  %v2698_v52 = vsel %vm2696_vm5, %v2687_v58, %v2689_v63 }
 0x25a   : > { %6255 = vst [vmem:[#allocation17_spill] sm:$0xff] %v5441_v53  ;;  %3915 = vmatmul.msk.bf16.gmra.mxu1 %vm463_vm2, %v4198_v20  ;;  %3913 = vmatmul.msk.bf16.gmra.mxu0 %vm463_vm2, %v4198_v20  ;;  %v2697_v20 = vsel %vm2696_vm5, %v2685_v50, %v2687_v58 }
 0x25b   : > { %6256 = vst [vmem:[#allocation23_spill] sm:$0xff] %v5443_v45 }
 0x25f   : > { %v5447_v4 = vpop.f32.mrf.mxu1  ;;  %v5452_v31 = vpop.f32.mrf.mxu0 }
 0x260   : > { %6257 = vst [vmem:[#allocation10_spill] sm:$0xff] %v5447_v4 }
 0x261   : > { %6258 = vst [vmem:[#allocation21_spill] sm:$0xff] %v5452_v31 }
 0x267   : > { %v1610_v13 = vpop.f32.mrf.mxu1  ;;  %v1591_v12 = vpop.f32.mrf.mxu0 }
 0x268   : > { %v1633_v7 = vsel %vm1623_vm6, %v1610_v13, 0.0  ;;  %v1632_v57 = vsel %vm1622_vm7, %v1591_v12, 0.0 }
 0x269   : > { %v1721_v27 = vadd.f32 %v1710_v61, %v1633_v7  ;;  %v1720_v21 = vadd.f32 %v1691_v17, %v1632_v57  ;;  %v1715_v61 = vpop.f32.mrf.mxu3  ;;  %v1696_v17 = vpop.f32.mrf.mxu2 }
 0x26a   : > { %3946 = vmatmul.msk.bf16.vlgmr.msra.gmra.mxu1 %vm463_vm2, %v4201_v0  ;;  %3944 = vmatmul.msk.bf16.vlgmr.msra.gmra.mxu0 %vm463_vm2, %v4201_v0  ;;  %v4207_v0 = vld [vmem:[%s6109_s3 + $0x120] sm:$0xff] }
 0x26b   : > { %2736 = vmatpush.bf16.msra.mxu1 %v2700_v29  ;;  %2717 = vmatpush.bf16.msra.mxu0 %v2699_v1 }
 0x26f   : > { %v5484_v23 = vpop.f32.mrf.mxu1  ;;  %2737 = vmatpush.bf16.msra.mxu1 %v2698_v52  ;;  %v5486_v34 = vpop.f32.mrf.mxu0  ;;  %2718 = vmatpush.bf16.msra.mxu0 %v2697_v20 }
 0x271   : > { %v5497_v8 = vpop.f32.mrf.mxu3  ;;  %v5499_v3 = vpop.f32.mrf.mxu2 }
 0x277   : > { %v1615_v19 = vpop.f32.mrf.mxu1  ;;  %v1596_v46 = vpop.f32.mrf.mxu0 }
 0x278   : > { %v1637_v51 = vsel %vm1623_vm6, %v1615_v19, 0.0  ;;  %v1636_v54 = vsel %vm1622_vm7, %v1596_v46, 0.0 }
 0x279   : > { %v1725_v33 = vadd.f32 %v1715_v61, %v1637_v51  ;;  %v1724_v35 = vadd.f32 %v1696_v17, %v1636_v54  ;;  %v1906_v47 = vpop.f32.mrf.mxu3  ;;  %v1887_v30 = vpop.f32.mrf.mxu2 }
 0x27a   : > { %3947 = vmatmul.msk.bf16.gmra.mxu1 %vm463_vm2, %v4202_v16  ;;  %3945 = vmatmul.msk.bf16.gmra.mxu0 %vm463_vm2, %v4202_v16  ;;  %v1917_v7 = vsel %vm1623_vm6, %v1906_v47, 0.0  ;;  %v1916_v58 = vsel %vm1622_vm7, %v1887_v30, 0.0 }
 0x27f   : > { %v5501_v6 = vpop.f32.mrf.mxu1  ;;  %v5503_v36 = vpop.f32.mrf.mxu0 }
 0x281   : > { %v5538_v19 = vpop.f32.mrf.mxu3  ;;  %v5540_v46 = vpop.f32.mrf.mxu2 }
 0x287   : > { %v1798_v13 = vpop.f32.mrf.mxu1  ;;  %v1779_v29 = vpop.f32.mrf.mxu0 }
 0x288   : > { %v1821_v12 = vsel %vm1813_vm8, %v1798_v13, 0.0  ;;  %v1820_v1 = vsel %vm1812_vm10, %v1779_v29, 0.0 }
 0x289   : > { %v1829_v57 = vadd.f32 %v1821_v12, %v1721_v27  ;;  %v1828_v63 = vadd.f32 %v1820_v1, %v1720_v21  ;;  %v1892_v54 = vpop.f32.mrf.mxu2 }
 0x28a   : > { %3994 = vmatmul.msk.bf16.vlgmr.msrb.gmra.mxu1 %vm463_vm2, %v4207_v0  ;;  %3992 = vmatmul.msk.bf16.vlgmr.msrb.gmra.mxu0 %vm463_vm2, %v4207_v0  ;;  %v1920_v1 = vsel %vm1622_vm7, %v1892_v54, 0.0 }
 0x28b   : > { %v1925_v50 = vadd.f32 %v1917_v7, %v1829_v57  ;;  %2919 = vmatpush.bf16.msrb.mxu1 %v6221_v5  ;;  %v1924_v52 = vadd.f32 %v1916_v58, %v1828_v63  ;;  %2900 = vmatpush.bf16.msrb.mxu0 %v6222_v40 }
 0x28f   : > { %2920 = vmatpush.bf16.msrb.mxu1 %v6223_v25  ;;  %v5529_v20 = vpop.f32.mrf.mxu1  ;;  %2901 = vmatpush.bf16.msrb.mxu0 %v6224_v22  ;;  %v5532_v27 = vpop.f32.mrf.mxu0 }
 0x290   : > { %v1911_v22 = vpop.f32.mrf.mxu3 }
 0x291   : > { %v5550_v12 = vpop.f32.mrf.mxu2  ;;  %v1921_v7 = vsel %vm1623_vm6, %v1911_v22, 0.0 }
 0x297   : > { %v1803_v61 = vpop.f32.mrf.mxu1  ;;  %v1784_v21 = vpop.f32.mrf.mxu0 }
 0x298   : > { %v1825_v17 = vsel %vm1813_vm8, %v1803_v61, 0.0  ;;  %v1824_v16 = vsel %vm1812_vm10, %v1784_v21, 0.0  ;;  %v5548_v29 = vpop.f32.mrf.mxu3 }
 0x299   : > { %v1833_v5 = vadd.f32 %v1825_v17, %v1725_v33  ;;  %v1832_v40 = vadd.f32 %v1824_v16, %v1724_v35  ;;  %v2050_v21 = vpop.f32.mrf.mxu2 }
 0x29b   : > { %v1929_v57 = vadd.f32 %v1921_v7, %v1833_v5  ;;  %v1928_v58 = vadd.f32 %v1920_v1, %v1832_v40 }
 0x29f   : > { %v1805_v25 = vpop.f32.mrf.mxu1  ;;  %v5542_v51 = vpop.f32.mrf.mxu0 }
 0x2a0   : > { %v1827_v48 = vsel %vm1813_vm8, %v1805_v25, 0.0 }
 0x2a1   : > { %v5572_v22 = vpop.f32.mrf.mxu2 }
 0x2a7   : > { %v1981_v47 = vpop.f32.mrf.mxu1  ;;  %v1962_v30 = vpop.f32.mrf.mxu0 }
 0x2a8   : > { %v5544_v0 = vadd.f32 %v1981_v47, %v1925_v50  ;;  %v5546_v13 = vadd.f32 %v1962_v30, %v1924_v52  ;;  %v5560_v50 = vpop.f32.mrf.mxu3 }
 0x2a9   : > { %v2055_v7 = vpop.f32.mrf.mxu2 }
 0x2af   : > { %v5552_v33 = vpop.f32.mrf.mxu1  ;;  %v5554_v35 = vpop.f32.mrf.mxu0 }
 0x2b0   : > { %v5570_v30 = vpop.f32.mrf.mxu3 }
 0x2b1   : > { %v5590_v31 = vpop.f32.mrf.mxu2 }
 0x2b7   : > { %v1986_v63 = vpop.f32.mrf.mxu1  ;;  %v1967_v52 = vpop.f32.mrf.mxu0 }
 0x2b8   : > { %v5562_v61 = vadd.f32 %v1986_v63, %v1929_v57  ;;  %v5564_v17 = vadd.f32 %v1967_v52, %v1928_v58  ;;  %v2074_v40 = vpop.f32.mrf.mxu3  ;;  %v5582_v58 = vpop.permute.xlu2 %2800 }
 0x2b9   : > { %6261 = vst [vmem:[#allocation19_spill] sm:$0xff] %v5582_v58  ;;  %v5584_v63 = vpop.permute.xlu1 %2798  ;;  %v5586_v52 = vpop.permute.xlu0 %2802 }
 0x2ba   : > { %6262 = vst [vmem:[#allocation26_spill] sm:$0xff] %v5584_v63  ;;  %v5600_v28 = vpop.f32.mrf.mxu2  ;;  %v1634_v63 = vsel %vm1622_vm7, %v5486_v34, 0.0  ;;  %v1822_v34 = vsel %vm1812_vm10, %v5532_v27, 0.0 }
 0x2bb   : > { %6263 = vst [vmem:[#allocation24_spill] sm:$0xff] %v5586_v52  ;;  %v1722_v26 = vadd.f32 %v5475_v11, %v1634_v63  ;;  %v1918_v11 = vsel %vm1622_vm7, %v5540_v46, 0.0  ;;  %v2080_v63 = vsel %vm1813_vm8, %v5560_v50, 0.0 }
 0x2bf   : > { %v5566_v16 = vpop.f32.mrf.mxu1  ;;  %v5568_v47 = vpop.f32.mrf.mxu0 }
 0x2c0   : > { %v5588_v60 = vpop.f32.mrf.mxu3  ;;  %v5592_v62 = vpop.permute.xlu2 %2794 }
 0x2c1   : > { %6264 = vst [vmem:[#allocation32_spill] sm:$0xff] %v5592_v62  ;;  %v5594_v38 = vpop.permute.xlu1 %2792  ;;  %v5596_v45 = vpop.permute.xlu0 %2796 }
 0x2c2   : > { %6265 = vst [vmem:[#allocation31_spill] sm:$0xff] %v5594_v38  ;;  %v1635_v38 = vsel %vm1623_vm6, %v5484_v23, 0.0  ;;  %v5624_v58 = vpop.f32.mrf.mxu2  ;;  %v1823_v23 = vsel %vm1813_vm8, %v5529_v20, 0.0  ;;  %v1830_v20 = vadd.f32 %v1822_v34, %v1722_v26 }
 0x2c3   : > { %6266 = vst [vmem:[#allocation27_spill] sm:$0xff] %v5596_v45 }
 0x2c7   : > { %v5574_v54 = vpop.f32.mrf.mxu1  ;;  %v5576_v5 = vpop.f32.mrf.mxu0 }
 0x2c8   : > { %v5598_v53 = vpop.f32.mrf.mxu3  ;;  %v5606_v39 = vpop.permute.xlu2 %2963 }
 0x2c9   : > { %6267 = vst [vmem:[#allocation30_spill] sm:$0xff] %v5606_v39  ;;  %v5608_v9 = vpop.permute.xlu1 %2961  ;;  %v5619_v52 = vpop.permute.xlu0 %2965  ;;  %v1723_v39 = vadd.f32 %v5470_v56, %v1635_v38  ;;  %v1826_v38 = vsel %vm1812_vm10, %v5542_v51, 0.0  ;;  %v1926_v51 = vadd.f32 %v1918_v11, %v1830_v20 }
 0x2ca   : > { %6268 = vst [vmem:[#allocation28_spill] sm:$0xff] %v5608_v9  ;;  %v1639_v9 = vsel %vm1623_vm6, %v5501_v6, 0.0 }
 0x2cb   : > { %6269 = vst [vmem:[#allocation25_spill] sm:$0xff] %v5619_v52  ;;  %v1638_v52 = vsel %vm1622_vm7, %v5503_v36, 0.0  ;;  %v1727_v6 = vadd.f32 %v5497_v8, %v1639_v9  ;;  %v1831_v55 = vadd.f32 %v1823_v23, %v1723_v39  ;;  %v1919_v36 = vsel %vm1623_vm6, %v5538_v19, 0.0 }
 0x2cc   : > { %v1726_v56 = vadd.f32 %v5499_v3, %v1638_v52  ;;  %v1923_v39 = vsel %vm1623_vm6, %v5548_v29, 0.0  ;;  %v1922_v19 = vsel %vm1622_vm7, %v5550_v12, 0.0  ;;  %v2079_v29 = vsel %vm1812_vm10, %v2050_v21, 0.0 }
 0x2cd   : > { %v1835_v27 = vadd.f32 %v1827_v48, %v1727_v6  ;;  %v1927_v26 = vadd.f32 %v1919_v36, %v1831_v55  ;;  %v4208_v48 = vld [vmem:[%s6109_s3 + $0x128] sm:$0xff]  ;;  %v2084_v55 = vsel %vm1813_vm8, %v2074_v40, 0.0  ;;  %v2081_v6 = vsel %vm1812_vm10, %v5572_v22, 0.0 }
 0x2ce   : > { %v1834_v9 = vadd.f32 %v1826_v38, %v1726_v56  ;;  %v2083_v21 = vsel %vm1812_vm10, %v2055_v7, 0.0  ;;  %v2245_v38 = vpop.f32.mrf.mxu2  ;;  %3993 = vmatmul.msk.bf16.gmra.mxu0 %vm463_vm2, %v4208_v48  ;;  %3995 = vmatmul.msk.bf16.gmra.mxu1 %vm463_vm2, %v4208_v48  ;;  %v1993_v40 = vadd.f32 %v5554_v35, %v1926_v51  ;;  %v2082_v56 = vsel %vm1813_vm8, %v5570_v30, 0.0 }
 0x2cf   : > { %v5578_v1 = vpop.f32.mrf.mxu1  ;;  %v5580_v57 = vpop.f32.mrf.mxu0  ;;  %v1931_v23 = vadd.f32 %v1923_v39, %v1835_v27  ;;  %v1994_v34 = vadd.f32 %v5552_v33, %v1927_v26  ;;  %v2092_v22 = vadd.f32 %v2084_v55, %v5562_v61  ;;  %v2085_v7 = vsel %vm1812_vm10, %v5590_v31, 0.0 }
 0x2d0   : > { %v5615_v62 = vpop.f32.mrf.mxu3  ;;  %v5660_v3 = vpop.permute.xlu2 %2957  ;;  %v1930_v50 = vadd.f32 %v1922_v19, %v1834_v9  ;;  %v2091_v35 = vadd.f32 %v2083_v21, %v5564_v17  ;;  %v2086_v30 = vsel %vm1813_vm8, %v5588_v60, 0.0  ;;  %v2088_v61 = vadd.f32 %v2080_v63, %v5544_v0 }
 0x2d1   : > { %v5668_v46 = vpop.permute.xlu1 %2955  ;;  %v5677_v12 = vpop.permute.xlu0 %2959  ;;  %v1998_v20 = vadd.f32 %v5566_v16, %v1931_v23  ;;  %v2090_v16 = vadd.f32 %v2082_v56, %v1994_v34  ;;  %v2176_v31 = vsel %vm1622_vm7, %v5580_v57, 0.0  ;;  %v2089_v17 = vadd.f32 %v2081_v6, %v1993_v40 }
 0x2d2   : > { %v1997_v11 = vadd.f32 %v5568_v47, %v1930_v50  ;;  %v2175_v47 = vsel %vm1623_vm6, %v5574_v54, 0.0  ;;  %v2174_v0 = vsel %vm1622_vm7, %v5576_v5, 0.0  ;;  %v2087_v19 = vadd.f32 %v2079_v29, %v5546_v13 }
 0x2d3   : > { %v2094_v39 = vadd.f32 %v2086_v30, %v1998_v20  ;;  %v2184_v54 = vadd.f32 %v2176_v31, %v2089_v17 }
 0x2d4   : > { %v2093_v48 = vadd.f32 %v2085_v7, %v1997_v11  ;;  %v2182_v34 = vadd.f32 %v2174_v0, %v2087_v19 }
 0x2d6   : > { %v2247_v40 = vpop.f32.mrf.mxu2 }
 0x2d7   : > { %v2169_v15 = vpop.f32.mrf.mxu1  ;;  %v2150_v4 = vpop.f32.mrf.mxu0 }
 0x2d8   : > { %v2264_v52 = vpop.f32.mrf.mxu3  ;;  %v2179_v33 = vsel %vm1623_vm6, %v2169_v15, 0.0  ;;  %v2178_v36 = vsel %vm1622_vm7, %v2150_v4, 0.0  ;;  %v2177_v15 = vsel %vm1623_vm6, %v5578_v1, 0.0  ;;  %v3060_v43 = vpop.permute.xlu2 %3059 }
 0x2d9   : > { %v2187_v4 = vadd.f32 %v2179_v33, %v2092_v22  ;;  %v2186_v9 = vadd.f32 %v2178_v36, %v2091_v35  ;;  %v2185_v26 = vadd.f32 %v2177_v15, %v2090_v16  ;;  %v3058_v5 = vpop.permute.xlu1 %3057  ;;  %v3062_v13 = vpop.permute.xlu0 %3061 }
 0x2da   : > { %v3066_v29 = vsel %vm3063_vm11, %v3058_v5, %v3060_v43  ;;  %v3067_v33 = vsel %vm3063_vm11, %v3060_v43, %v3062_v13  ;;  %v6271_v43 = vld [vmem:[#allocation11_spill] sm:$0xff]  ;;  %v6274_v5 = vld [vmem:[#allocation26_spill] sm:$0xff] }
 0x2db   : > { %v2274_v63 = vadd.f32 %v2264_v52, %v2187_v4  ;;  %v2273_v6 = vadd.f32 %v2245_v38, %v2186_v9  ;;  %v2272_v50 = vadd.f32 %v5615_v62, %v2185_v26  ;;  %v2271_v38 = vadd.f32 %v5624_v58, %v2184_v54 }
 0x2df   : > { %v5602_v18 = vpop.f32.mrf.mxu1  ;;  %v5604_v37 = vpop.f32.mrf.mxu0 }
 0x2e0   : > { %v2181_v60 = vsel %vm1623_vm6, %v5602_v18, 0.0  ;;  %v2180_v57 = vsel %vm1622_vm7, %v5604_v37, 0.0  ;;  %v2183_v18 = vadd.f32 %v2175_v47, %v2088_v61  ;;  %v2266_v32 = vpop.f32.mrf.mxu3 }
 0x2e1   : > { %v2189_v55 = vadd.f32 %v2181_v60, %v2094_v39  ;;  %v2188_v21 = vadd.f32 %v2180_v57, %v2093_v48  ;;  %v3052_v13 = vpop.permute.xlu1 %3051 }
 0x2e2   : > { %v2270_v20 = vadd.f32 %v5598_v53, %v2183_v18 }
 0x2e3   : > { %v2276_v7 = vadd.f32 %v2266_v32, %v2189_v55  ;;  %v2275_v11 = vadd.f32 %v2247_v40, %v2188_v21  ;;  %v4150_v21 = vld [vmem:[%s6111_s5 + $0x28] sm:$0xff]  ;;  %v3054_v32 = vpop.permute.xlu2 %3053 }
 0x2e7   : > { %v5610_v59 = vpop.f32.mrf.mxu1  ;;  %v5617_v45 = vpop.f32.mrf.mxu0 }
 0x2e8   : > { %v2357_v22 = vsel %vm1813_vm8, %v5610_v59, 0.0  ;;  %v2356_v62 = vsel %vm1812_vm10, %v5617_v45, 0.0  ;;  %v4211_v45 = vld [vmem:[%s6109_s3 + $0x140] sm:$0xff] }
 0x2e9   : > { %v2365_v61 = vadd.f32 %v2357_v22, %v2270_v20  ;;  %4024 = vmatmul.msk.bf16.vlgmr.msra.gmra.mxu0 %vm463_vm2, %v4211_v45  ;;  %4026 = vmatmul.msk.bf16.vlgmr.msra.gmra.mxu1 %vm463_vm2, %v4211_v45  ;;  %v4209_v20 = vld [vmem:[%s6109_s3 + $0x130] sm:$0xff] }
 0x2ea   : > { %3084 = vmatpush.bf16.msra.mxu0 %v3066_v29  ;;  %3103 = vmatpush.bf16.msra.mxu1 %v3067_v33  ;;  %v6276_v29 = vld [vmem:[#allocation32_spill] sm:$0xff]  ;;  %v4215_v33 = vld [vmem:[%s6109_s3 + $0x160] sm:$0xff] }
 0x2eb   : > { %v2398_v47 = vadd.f32 %v5104_v42, %v2365_v61  ;;  %v4210_v61 = vld [vmem:[%s6109_s3 + $0x138] sm:$0xff] }
 0x2ed   : > { %v2406_v48 = vmax.f32 %v2398_v47, 0.0  ;;  %v4214_v47 = vld [vmem:[%s6109_s3 + $0x158] sm:$0xff] }
 0x2ef   : > { %v5653_v25 = vpop.f32.mrf.mxu1  ;;  %v5658_v8 = vpop.f32.mrf.mxu0 }
 0x2f0   : > { %v2359_v37 = vsel %vm1813_vm8, %v5653_v25, 0.0  ;;  %v2358_v52 = vsel %vm1812_vm10, %v5658_v8, 0.0  ;;  %v2269_v8 = vadd.f32 %v5600_v28, %v2182_v34 }
 0x2f1   : > { %v2367_v36 = vadd.f32 %v2359_v37, %v2272_v50  ;;  %v2366_v30 = vadd.f32 %v2358_v52, %v2271_v38  ;;  %v3056_v37 = vpop.permute.xlu0 %3055  ;;  %v6277_v50 = vld [vmem:[#allocation31_spill] sm:$0xff]  ;;  %v3156_v38 = vpop.permute.xlu2 %3155 }
 0x2f2   : > { %v2364_v31 = vadd.f32 %v2356_v62, %v2269_v8  ;;  %v2805_v40 = vsel %vm463_vm2, %v6277_v50, %v6276_v29  ;;  %v6278_v52 = vld [vmem:[#allocation27_spill] sm:$0xff]  ;;  %v6280_v62 = vld [vmem:[#allocation30_spill] sm:$0xff] }
 0x2f3   : > { %v2399_v2 = vadd.f32 %v5135_v14, %v2366_v30 }
 0x2f5   : > { %v2407_v57 = vmax.f32 %v2399_v2, 0.0  ;;  %v4219_v2 = vld [vmem:[%s6109_s3 + $0x180] sm:$0xff] }
 0x2f7   : > { %v2351_v27 = vpop.f32.mrf.mxu1  ;;  %v2332_v1 = vpop.f32.mrf.mxu0 }
 0x2f8   : > { %v2361_v51 = vsel %vm1813_vm8, %v2351_v27, 0.0  ;;  %v2360_v23 = vsel %vm1812_vm10, %v2332_v1, 0.0  ;;  %v2400_v27 = vadd.f32 %v5135_v14, %v2367_v36 }
 0x2f9   : > { %v2369_v56 = vadd.f32 %v2361_v51, %v2274_v63  ;;  %v2368_v25 = vadd.f32 %v2360_v23, %v2273_v6  ;;  %v4149_v51 = vld [vmem:[%s6111_s5 + $0x20] sm:$0xff]  ;;  %v6272_v63 = vld [vmem:[#allocation16_spill] sm:$0xff]  ;;  %v6273_v23 = vld [vmem:[#allocation19_spill] sm:$0xff]  ;;  %v3158_v22 = vpop.permute.xlu0 %3157  ;;  %v3150_v30 = vpop.permute.xlu2 %3149 }
 0x2fa   : > { %v2408_v0 = vmax.f32 %v2400_v27, 0.0  ;;  %v2609_v55 = vsel %vm1231_vm9, %v6272_v63, %v6271_v43  ;;  %v2807_v34 = vsel %vm463_vm2, %v6274_v5, %v6273_v23  ;;  %v3064_v27 = vsel %vm3063_vm11, %v3052_v13, %v3054_v32  ;;  %v6284_v13 = vld [vmem:[#allocation20_spill] sm:$0xff] }
 0x2fb   : > { %v2402_v59 = vadd.f32 %v5078_v41, %v2369_v56  ;;  %v2401_v28 = vadd.f32 %v5078_v41, %v2368_v25  ;;  %v2397_v41 = vadd.f32 %v5104_v42, %v2364_v31  ;;  %v6270_v42 = vld [vmem:[#allocation9_spill] sm:$0xff]  ;;  %v2806_v56 = vsel %vm463_vm2, %v6276_v29, %v6278_v52  ;;  %v3154_v25 = vpop.permute.xlu1 %3153  ;;  %3085 = vmatpush.bf16.msra.mxu0 %v3064_v27  ;;  %v6285_v29 = vld [vmem:[#allocation8_spill] sm:$0xff]  ;;  %v6287_v52 = vld [vmem:[#allocation7_spill] sm:$0xff] }
 0x2fc   : > { %v2414_v14 = vpack.c.bf16 %v2408_v0, %v2406_v48  ;;  %v2610_v18 = vsel %vm1231_vm9, %v6271_v43, %v6270_v42  ;;  %vm2967_vm9 = vcmask 162816   ;;  %v4224_v42 = vld [vmem:[%s6109_s3 + $0x1a8] sm:$0xff]  ;;  %v1533_v50 = vadd.f32 %v6285_v29, %v6284_v13 }
 0x2fd   : > { %v2410_v9 = vmax.f32 %v2402_v59, 0.0  ;;  %v2409_v1 = vmax.f32 %v2401_v28, 0.0  ;;  %v2405_v54 = vmax.f32 %v2397_v41, 0.0  ;;  %v2968_v28 = vsel %vm2967_vm9, %v5668_v46, %v5660_v3 }
 0x2fe   : > { %v3162_v46 = vsel %vm646_vm4, %v3156_v38, %v3158_v22 }
 0x2ff   : > { %v2353_v35 = vpop.f32.mrf.mxu1  ;;  %v2334_v15 = vpop.f32.mrf.mxu0 }
 0x300   : > { %v2363_v58 = vsel %vm1813_vm8, %v2353_v35, 0.0  ;;  %v2362_v53 = vsel %vm1812_vm10, %v2334_v15, 0.0  ;;  %v6281_v35 = vld [vmem:[#allocation28_spill] sm:$0xff] }
 0x301   : > { %v2371_v16 = vadd.f32 %v2363_v58, %v2276_v7  ;;  %v2370_v4 = vadd.f32 %v2362_v53, %v2275_v11  ;;  %v6279_v7 = vld [vmem:[#allocation25_spill] sm:$0xff]  ;;  %v2970_v8 = vsel %vm2967_vm9, %v6281_v35, %v6280_v62  ;;  %v4216_v11 = vld [vmem:[%s6109_s3 + $0x168] sm:$0xff]  ;;  %v3152_v15 = vpop.permute.xlu0 %3151  ;;  %v3243_v59 = vpop.permute.xlu2 %3242 }
 0x302   : > { %v2971_v36 = vsel %vm2967_vm9, %v6280_v62, %v6279_v7 }
 0x303   : > { %v2404_v10 = vadd.f32 %v5127_v44, %v2371_v16  ;;  %v2403_v17 = vadd.f32 %v5127_v44, %v2370_v4  ;;  %v2413_v44 = vpack.c.bf16 %v2407_v57, %v2405_v54  ;;  %v3148_v58 = vpop.permute.xlu1 %3147  ;;  %v2969_v4 = vsel %vm2967_vm9, %v5660_v3, %v5677_v12  ;;  %v4213_v3 = vld [vmem:[%s6109_s3 + $0x150] sm:$0xff]  ;;  %v4223_v57 = vld [vmem:[%s6109_s3 + $0x1a0] sm:$0xff] }
 0x304   : > { %v3161_v12 = vsel %vm646_vm4, %v3154_v25, %v3156_v38  ;;  %v4222_v25 = vld [vmem:[%s6109_s3 + $0x198] sm:$0xff] }
 0x305   : > { %v2412_v60 = vmax.f32 %v2404_v10, 0.0  ;;  %v2411_v39 = vmax.f32 %v2403_v17, 0.0  ;;  %v3065_v10 = vsel %vm3063_vm11, %v3054_v32, %v3056_v37  ;;  %v4220_v17 = vld [vmem:[%s6109_s3 + $0x188] sm:$0xff] }
 0x306   : > { %3104 = vmatpush.bf16.msra.mxu1 %v3065_v10 }
 0x307   : > { %v2416_v26 = vpack.c.bf16 %v2412_v60, %v2410_v9  ;;  %v2415_v19 = vpack.c.bf16 %v2411_v39, %v2409_v1  ;;  %v3159_v1 = vsel %vm646_vm4, %v3148_v58, %v3150_v30  ;;  %v3160_v39 = vsel %vm646_vm4, %v3150_v30, %v3152_v15  ;;  %v2552_v48 = vpop.f32.mrf.mxu1  ;;  %v2533_v54 = vpop.f32.mrf.mxu0  ;;  %v6289_v30 = vld [vmem:[#allocation23_spill] sm:$0xff] }
 0x309   : > { %2458 = vmatpush.bf16.msra.mxu3 %v2416_v26  ;;  %2439 = vmatpush.bf16.msra.mxu2 %v2415_v19  ;;  %v3245_v53 = vpop.permute.xlu0 %3244  ;;  %v3237_v9 = vpop.permute.xlu2 %3236  ;;  %v4217_v19 = vld [vmem:[%s6109_s3 + $0x170] sm:$0xff] }
 0x30a   : > { %v3250_v45 = vsel %vm3246_vm12, %v3243_v59, %v3245_v53  ;;  %v6290_v53 = vld [vmem:[#allocation14_spill] sm:$0xff] }
 0x30b   : > { %v3241_v16 = vpop.permute.xlu1 %3240 }
 0x30c   : > { %v3249_v31 = vsel %vm3246_vm12, %v3241_v16, %v3243_v59  ;;  %v5922_v16 = vadd.s32 4294967290, %v6290_v53 }
 0x30d   : > { %2459 = vmatpush.bf16.msra.mxu3 %v2414_v14  ;;  %2440 = vmatpush.bf16.msra.mxu2 %v2413_v44 }
 0x30e   : > { %vm2565_vm4 = vcmp.ge.s32.totalorder %v5922_v16, 0 }
 0x30f   : > { %v2554_v14 = vpop.f32.mrf.mxu1  ;;  %v2535_v44 = vpop.f32.mrf.mxu0 }
 0x310   : > { %3962 = vmatmul.msk.bf16.vlgmr.msra.gmra.mxu3 %vm463_vm2, %v4149_v51  ;;  %3960 = vmatmul.msk.bf16.vlgmr.msra.gmra.mxu2 %vm463_vm2, %v4149_v51  ;;  %v4218_v51 = vld [vmem:[%s6109_s3 + $0x178] sm:$0xff] }
 0x311   : > { %2648 = vmatpush.bf16.msrb.mxu3 %v5202_v24  ;;  %2629 = vmatpush.bf16.msrb.mxu2 %v5188_v49  ;;  %v4212_v49 = vld [vmem:[%s6109_s3 + $0x148] sm:$0xff]  ;;  %v6275_v24 = vld [vmem:[#allocation24_spill] sm:$0xff]  ;;  %v3239_v60 = vpop.permute.xlu0 %3238 }
 0x312   : > { %v2808_v6 = vsel %vm463_vm2, %v6273_v23, %v6275_v24  ;;  %4025 = vmatmul.msk.bf16.gmra.mxu0 %vm463_vm2, %v4212_v49  ;;  %4027 = vmatmul.msk.bf16.gmra.mxu1 %vm463_vm2, %v4212_v49  ;;  %v3248_v26 = vsel %vm3246_vm12, %v3237_v9, %v3239_v60  ;;  %v4221_v23 = vld [vmem:[%s6109_s3 + $0x190] sm:$0xff]  ;;  %v6282_v49 = vld [vmem:[#allocation22_spill] sm:$0xff] }
 0x313   : > { %v3235_v41 = vpop.permute.xlu1 %3234 }
 0x314   : > { %v3247_v0 = vsel %vm3246_vm12, %v3235_v41, %v3237_v9 }
 0x315   : > { %2649 = vmatpush.bf16.msrb.mxu3 %v2610_v18  ;;  %2630 = vmatpush.bf16.msrb.mxu2 %v2609_v55 }
 0x319   : > { %2825 = vmatpush.bf16.msra.mxu2 %v2807_v34  ;;  %2844 = vmatpush.bf16.msra.mxu3 %v2808_v6 }
 0x31d   : > { %2826 = vmatpush.bf16.msra.mxu2 %v2805_v40  ;;  %2845 = vmatpush.bf16.msra.mxu3 %v2806_v56  ;;  %v6286_v40 = vld [vmem:[#allocation18_spill] sm:$0xff] }
 0x31e   : > { %v1514_v56 = vadd.f32 %v6287_v52, %v6286_v40 }
 0x320   : > { %3963 = vmatmul.msk.bf16.gmra.mxu3 %vm463_vm2, %v4150_v21  ;;  %3961 = vmatmul.msk.bf16.gmra.mxu2 %vm463_vm2, %v4150_v21  ;;  %v6283_v21 = vld [vmem:[#allocation6_spill] sm:$0xff] }
 0x322   : > { %4056 = vmatmul.msk.bf16.vlgmr.msrb.gmra.mxu0 %vm463_vm2, %v4215_v33  ;;  %4058 = vmatmul.msk.bf16.vlgmr.msrb.gmra.mxu1 %vm463_vm2, %v4215_v33 }
 0x323   : > { %3267 = vmatpush.bf16.msrb.mxu0 %v3249_v31  ;;  %3286 = vmatpush.bf16.msrb.mxu1 %v3250_v45  ;;  %v5927_v31 = vadd.s32 6, %v6290_v53 }
 0x325   : > { %vm2754_vm13 = vcmp.lt.s32.totalorder %v5927_v31, 16 }
 0x327   : > { %3268 = vmatpush.bf16.msrb.mxu0 %v3247_v0  ;;  %3287 = vmatpush.bf16.msrb.mxu1 %v3248_v26  ;;  %v2577_v0 = vsel %vm2565_vm4, %v2554_v14, 0.0 }
 0x330   : > { %4010 = vmatmul.msk.bf16.vlgmr.msrb.gmra.mxu3 %vm463_vm2, %v4209_v20  ;;  %4008 = vmatmul.msk.bf16.vlgmr.msrb.gmra.mxu2 %vm463_vm2, %v4209_v20 }
 0x331   : > { %3007 = vmatpush.bf16.msrb.mxu3 %v2971_v36  ;;  %2988 = vmatpush.bf16.msrb.mxu2 %v2970_v8  ;;  %v6288_v8 = vld [vmem:[#allocation17_spill] sm:$0xff] }
 0x332   : > { %4057 = vmatmul.msk.bf16.gmra.mxu0 %vm463_vm2, %v4216_v11  ;;  %4059 = vmatmul.msk.bf16.gmra.mxu1 %vm463_vm2, %v4216_v11 }
 0x335   : > { %2989 = vmatpush.bf16.msrb.mxu2 %v2968_v28  ;;  %3008 = vmatpush.bf16.msrb.mxu3 %v2969_v4  ;;  %v6291_v28 = vld [vmem:[#allocation15_spill] sm:$0xff] }
 0x336   : > { %v5930_v4 = vadd.s32 4294967290, %v6291_v28  ;;  %v5933_v27 = vadd.s32 6, %v6291_v28 }
 0x338   : > { %vm2564_vm14 = vcmp.ge.s32.totalorder %v5930_v4, 0  ;;  %vm2753_vm15 = vcmp.lt.s32.totalorder %v5933_v27, 16  ;;  %v4151_v27 = vld [vmem:[%s6111_s5 + $0x30] sm:$0xff] }
 0x340   : > { %4011 = vmatmul.msk.bf16.gmra.mxu3 %vm463_vm2, %v4210_v61  ;;  %4009 = vmatmul.msk.bf16.gmra.mxu2 %vm463_vm2, %v4210_v61 }
 0x342   : > { %4088 = vmatmul.msk.bf16.vlgmr.msra.gmra.mxu0 %vm463_vm2, %v4219_v2  ;;  %4090 = vmatmul.msk.bf16.vlgmr.msra.gmra.mxu1 %vm463_vm2, %v4219_v2  ;;  %v2575_v2 = vsel %vm2565_vm4, %v2552_v48, 0.0 }
 0x34b   : > { %v5880_v43 = vpop.f32.mrf.mxu1  ;;  %v5883_v18 = vpop.f32.mrf.mxu0 }
 0x34c   : > { %v2579_v14 = vsel %vm2565_vm4, %v5880_v43, 0.0 }
 0x350   : > { %4042 = vmatmul.msk.bf16.vlgmr.msra.gmra.mxu3 %vm463_vm2, %v4213_v3  ;;  %4040 = vmatmul.msk.bf16.vlgmr.msra.gmra.mxu2 %vm463_vm2, %v4213_v3 }
 0x351   : > { %3198 = vmatpush.bf16.msra.mxu3 %v3162_v46  ;;  %3179 = vmatpush.bf16.msra.mxu2 %v3161_v12 }
 0x352   : > { %4089 = vmatmul.msk.bf16.gmra.mxu0 %vm463_vm2, %v4220_v17  ;;  %4091 = vmatmul.msk.bf16.gmra.mxu1 %vm463_vm2, %v4220_v17  ;;  %v2574_v17 = vsel %vm2564_vm14, %v2533_v54, 0.0 }
 0x353   : > { %v5885_v63 = vpop.f32.mrf.mxu1  ;;  %v5887_v55 = vpop.f32.mrf.mxu0 }
 0x354   : > { %v2581_v43 = vsel %vm2565_vm4, %v5885_v63, 0.0 }
 0x355   : > { %3180 = vmatpush.bf16.msra.mxu2 %v3159_v1  ;;  %3199 = vmatpush.bf16.msra.mxu3 %v3160_v39 }
 0x360   : > { %4043 = vmatmul.msk.bf16.gmra.mxu3 %vm463_vm2, %v4214_v47  ;;  %4041 = vmatmul.msk.bf16.gmra.mxu2 %vm463_vm2, %v4214_v47 }
 0x362   : > { %4120 = vmatmul.msk.bf16.vlgmr.msrb.gmra.mxu0 %vm463_vm2, %v4223_v57  ;;  %4122 = vmatmul.msk.bf16.vlgmr.msrb.gmra.mxu1 %vm463_vm2, %v4223_v57  ;;  %v2576_v57 = vsel %vm2564_vm14, %v2535_v44, 0.0 }
 0x366   : > { %v2739_v6 = vpop.f32.mrf.mxu1  ;;  %v2720_v37 = vpop.f32.mrf.mxu0 }
 0x367   : > { %v2762_v3 = vsel %vm2754_vm13, %v2739_v6, 0.0  ;;  %v2761_v47 = vsel %vm2753_vm15, %v2720_v37, 0.0 }
 0x36e   : > { %v2741_v7 = vpop.f32.mrf.mxu1  ;;  %v2722_v62 = vpop.f32.mrf.mxu0 }
 0x36f   : > { %v2764_v54 = vsel %vm2754_vm13, %v2741_v7, 0.0 }
 0x370   : > { %4074 = vmatmul.msk.bf16.vlgmr.msrb.gmra.mxu3 %vm463_vm2, %v4217_v19  ;;  %4072 = vmatmul.msk.bf16.vlgmr.msrb.gmra.mxu2 %vm463_vm2, %v4217_v19 }
 0x372   : > { %4121 = vmatmul.msk.bf16.gmra.mxu0 %vm463_vm2, %v4224_v42  ;;  %4123 = vmatmul.msk.bf16.gmra.mxu1 %vm463_vm2, %v4224_v42 }
 0x380   : > { %4075 = vmatmul.msk.bf16.gmra.mxu3 %vm463_vm2, %v4218_v51  ;;  %4073 = vmatmul.msk.bf16.gmra.mxu2 %vm463_vm2, %v4218_v51 }
 0x38f   : > { %v2744_v58 = vpop.f32.mrf.mxu1  ;;  %v2725_v61 = vpop.f32.mrf.mxu0 }
 0x390   : > { %4106 = vmatmul.msk.bf16.vlgmr.msra.gmra.mxu3 %vm463_vm2, %v4221_v23  ;;  %4104 = vmatmul.msk.bf16.vlgmr.msra.gmra.mxu2 %vm463_vm2, %v4221_v23  ;;  %v2766_v44 = vsel %vm2754_vm13, %v2744_v58, 0.0  ;;  %v2765_v37 = vsel %vm2753_vm15, %v2725_v61, 0.0 }
 0x393   : > { %v2461_v5 = vpop.f32.mrf.mxu3  ;;  %v2442_v34 = vpop.f32.mrf.mxu2 }
 0x394   : > { %v5895_v24 = vadd.f32 %v2461_v5, %v6282_v49  ;;  %v5898_v32 = vadd.f32 %v2442_v34, %v6283_v21  ;;  %v2763_v5 = vsel %vm2753_vm15, %v2722_v62, 0.0  ;;  %v2578_v21 = vsel %vm2564_vm14, %v5883_v18, 0.0 }
 0x397   : > { %v2746_v10 = vpop.f32.mrf.mxu1  ;;  %v2727_v12 = vpop.f32.mrf.mxu0 }
 0x398   : > { %v2768_v62 = vsel %vm2754_vm13, %v2746_v10, 0.0 }
 0x39b   : > { %v2463_v33 = vpop.f32.mrf.mxu3  ;;  %v2444_v38 = vpop.f32.mrf.mxu2 }
 0x39c   : > { %v5904_v22 = vadd.f32 %v2463_v33, %v1533_v50  ;;  %v5909_v20 = vadd.f32 %v2444_v38, %v1514_v56 }
 0x39f   : > { %v2922_v51 = vpop.f32.mrf.mxu1  ;;  %v2903_v23 = vpop.f32.mrf.mxu0 }
 0x3a0   : > { %4107 = vmatmul.msk.bf16.gmra.mxu3 %vm463_vm2, %v4222_v25  ;;  %4105 = vmatmul.msk.bf16.gmra.mxu2 %vm463_vm2, %v4222_v25  ;;  %v2580_v25 = vsel %vm2564_vm14, %v5887_v55, 0.0 }
 0x3a3   : > { %v2466_v36 = vpop.f32.mrf.mxu3  ;;  %v2447_v35 = vpop.f32.mrf.mxu2 }
 0x3a4   : > { %v5914_v11 = vadd.f32 %v2466_v36, %v6288_v8  ;;  %v5917_v15 = vadd.f32 %v2447_v35, %v6289_v30  ;;  %v2767_v35 = vsel %vm2753_vm15, %v2727_v12, 0.0 }
 0x3a7   : > { %v2924_v52 = vpop.f32.mrf.mxu1  ;;  %v2905_v33 = vpop.f32.mrf.mxu0 }
 0x3ab   : > { %v5919_v59 = vpop.f32.mrf.mxu3  ;;  %v5924_v45 = vpop.f32.mrf.mxu2 }
 0x3af   : > { %v2927_v58 = vpop.f32.mrf.mxu1  ;;  %v2908_v63 = vpop.f32.mrf.mxu0 }
 0x3b3   : > { %v2651_v46 = vpop.f32.mrf.mxu3  ;;  %v2632_v9 = vpop.f32.mrf.mxu2 }
 0x3b4   : > { %v2662_v60 = vadd.f32 %v2651_v46, %v2575_v2  ;;  %v2661_v41 = vadd.f32 %v2632_v9, %v2574_v17 }
 0x3b6   : > { %v2770_v1 = vadd.f32 %v2762_v3, %v2662_v60  ;;  %v2769_v39 = vadd.f32 %v2761_v47, %v2661_v41 }
 0x3b7   : > { %v5983_v17 = vpop.f32.mrf.mxu1  ;;  %v5985_v47 = vpop.f32.mrf.mxu0 }
 0x3bb   : > { %v2653_v26 = vpop.f32.mrf.mxu3  ;;  %v2634_v19 = vpop.f32.mrf.mxu2 }
 0x3bc   : > { %v2664_v48 = vadd.f32 %v2653_v26, %v2577_v0  ;;  %v2663_v42 = vadd.f32 %v2634_v19, %v2576_v57 }
 0x3be   : > { %v2772_v34 = vadd.f32 %v2764_v54, %v2664_v48  ;;  %v2771_v49 = vadd.f32 %v2763_v5, %v2663_v42 }
 0x3c3   : > { %v2656_v6 = vpop.f32.mrf.mxu3  ;;  %v2637_v13 = vpop.f32.mrf.mxu2 }
 0x3c4   : > { %v2666_v29 = vadd.f32 %v2656_v6, %v2579_v14  ;;  %v2665_v50 = vadd.f32 %v2637_v13, %v2578_v21 }
 0x3c6   : > { %v2774_v40 = vadd.f32 %v2766_v44, %v2666_v29  ;;  %v2773_v56 = vadd.f32 %v2765_v37, %v2665_v50 }
 0x3cb   : > { %v2658_v38 = vpop.f32.mrf.mxu3  ;;  %v2639_v18 = vpop.f32.mrf.mxu2 }
 0x3cc   : > { %v2668_v7 = vadd.f32 %v2658_v38, %v2581_v43  ;;  %v2667_v36 = vadd.f32 %v2639_v18, %v2580_v25 }
 0x3ce   : > { %v5975_v8 = vadd.f32 %v2768_v62, %v2668_v7  ;;  %v5977_v30 = vadd.f32 %v2767_v35, %v2667_v36 }
 0x3d3   : > { %v2847_v61 = vpop.f32.mrf.mxu3  ;;  %v2828_v53 = vpop.f32.mrf.mxu2 }
 0x3d4   : > { %v2858_v55 = vsel %vm2565_vm4, %v2847_v61, 0.0  ;;  %v2857_v28 = vsel %vm2564_vm14, %v2828_v53, 0.0 }
 0x3d5   : > { %v2866_v2 = vadd.f32 %v2858_v55, %v2770_v1  ;;  %v2865_v10 = vadd.f32 %v2857_v28, %v2769_v39 }
 0x3d7   : > { %v2933_v3 = vadd.f32 %v2922_v51, %v2866_v2  ;;  %v2932_v46 = vadd.f32 %v2903_v23, %v2865_v10  ;;  %v3106_v51 = vpop.f32.mrf.mxu1  ;;  %v3087_v23 = vpop.f32.mrf.mxu0 }
 0x3d8   : > { %v3116_v53 = vsel %vm2564_vm14, %v3087_v23, 0.0 }
 0x3db   : > { %v2849_v12 = vpop.f32.mrf.mxu3  ;;  %v2830_v9 = vpop.f32.mrf.mxu2 }
 0x3dc   : > { %v2860_v60 = vsel %vm2565_vm4, %v2849_v12, 0.0  ;;  %v2859_v41 = vsel %vm2564_vm14, %v2830_v9, 0.0  ;;  %v6017_v9 = vpop.permute.xlu1 %3332 }
 0x3dd   : > { %v2868_v0 = vadd.f32 %v2860_v60, %v2772_v34  ;;  %v2867_v26 = vadd.f32 %v2859_v41, %v2771_v49 }
 0x3df   : > { %v2935_v57 = vadd.f32 %v2924_v52, %v2868_v0  ;;  %v2934_v19 = vadd.f32 %v2905_v33, %v2867_v26  ;;  %v3108_v6 = vpop.f32.mrf.mxu1  ;;  %v3089_v21 = vpop.f32.mrf.mxu0 }
 0x3e3   : > { %v2852_v1 = vpop.f32.mrf.mxu3  ;;  %v2833_v39 = vpop.f32.mrf.mxu2 }
 0x3e4   : > { %v2862_v48 = vsel %vm2565_vm4, %v2852_v1, 0.0  ;;  %v2861_v54 = vsel %vm2564_vm14, %v2833_v39, 0.0 }
 0x3e5   : > { %v2870_v42 = vadd.f32 %v2862_v48, %v2774_v40  ;;  %v2869_v5 = vadd.f32 %v2861_v54, %v2773_v56  ;;  %v3118_v54 = vsel %vm2564_vm14, %v3089_v21, 0.0 }
 0x3e7   : > { %v5995_v14 = vadd.f32 %v2927_v58, %v2870_v42  ;;  %v5997_v44 = vadd.f32 %v2908_v63, %v2869_v5  ;;  %v3111_v29 = vpop.f32.mrf.mxu1  ;;  %v5999_v50 = vpop.f32.mrf.mxu0  ;;  %v3117_v63 = vsel %vm2565_vm4, %v3106_v51, 0.0  ;;  %v3119_v51 = vsel %vm2565_vm4, %v3108_v6, 0.0 }
 0x3eb   : > { %v2854_v34 = vpop.f32.mrf.mxu3  ;;  %v2835_v49 = vpop.f32.mrf.mxu2 }
 0x3ef   : > { %v6001_v43 = vpop.f32.mrf.mxu1  ;;  %v6003_v38 = vpop.f32.mrf.mxu0 }
 0x3f3   : > { %v3010_v37 = vpop.f32.mrf.mxu3  ;;  %v2991_v13 = vpop.f32.mrf.mxu2 }
 0x3f4   : > { %v3021_v62 = vsel %vm2754_vm13, %v3010_v37, 0.0  ;;  %v3020_v35 = vsel %vm2753_vm15, %v2991_v13, 0.0 }
 0x3f5   : > { %v3029_v58 = vadd.f32 %v3021_v62, %v2933_v3  ;;  %v3028_v61 = vadd.f32 %v3020_v35, %v2932_v46 }
 0x3f7   : > { %v3289_v7 = vpop.f32.mrf.mxu1  ;;  %v3270_v36 = vpop.f32.mrf.mxu0  ;;  %v3125_v12 = vadd.f32 %v3117_v63, %v3029_v58  ;;  %v3124_v60 = vadd.f32 %v3116_v53, %v3028_v61 }
 0x3f8   : > { %v3300_v46 = vsel %vm2754_vm13, %v3289_v7, 0.0  ;;  %v3299_v48 = vsel %vm2753_vm15, %v3270_v36, 0.0  ;;  %v2863_v7 = vsel %vm2564_vm14, %v2835_v49, 0.0  ;;  %v3328_v63 = vpop.permute.xlu1 %3327 }
 0x3fb   : > { %v3012_v52 = vpop.f32.mrf.mxu3  ;;  %v2993_v33 = vpop.f32.mrf.mxu2 }
 0x3fc   : > { %v3023_v55 = vsel %vm2754_vm13, %v3012_v52, 0.0  ;;  %v3022_v2 = vsel %vm2753_vm15, %v2993_v33, 0.0  ;;  %v3323_v33 = vpop.permute.xlu0 %3322 }
 0x3fd   : > { %v3031_v3 = vadd.f32 %v3023_v55, %v2935_v57  ;;  %v3030_v26 = vadd.f32 %v3022_v2, %v2934_v19  ;;  %v2864_v19 = vsel %vm2565_vm4, %v2854_v34, 0.0  ;;  %v2871_v2 = vadd.f32 %v2863_v7, %v5977_v30 }
 0x3fe   : > { %v2872_v49 = vadd.f32 %v2864_v19, %v5975_v8 }
 0x3ff   : > { %v3291_v0 = vpop.f32.mrf.mxu1  ;;  %v3272_v39 = vpop.f32.mrf.mxu0  ;;  %v3127_v23 = vadd.f32 %v3119_v51, %v3031_v3  ;;  %v3126_v5 = vadd.f32 %v3118_v54, %v3030_v26  ;;  %v3120_v3 = vsel %vm2564_vm14, %v5999_v50, 0.0 }
 0x400   : > { %v3302_v21 = vsel %vm2754_vm13, %v3291_v0, 0.0  ;;  %v3301_v34 = vsel %vm2753_vm15, %v3272_v39, 0.0 }
 0x403   : > { %v3015_v40 = vpop.f32.mrf.mxu3  ;;  %v2996_v56 = vpop.f32.mrf.mxu2 }
 0x404   : > { %v3025_v6 = vsel %vm2754_vm13, %v3015_v40, 0.0  ;;  %v3024_v36 = vsel %vm2753_vm15, %v2996_v56, 0.0 }
 0x405   : > { %v3033_v55 = vadd.f32 %v3025_v6, %v5995_v14  ;;  %v3032_v56 = vadd.f32 %v3024_v36, %v5997_v44 }
 0x407   : > { %v3128_v51 = vadd.f32 %v3120_v3, %v3032_v56 }
 0x40b   : > { %v3017_v25 = vpop.f32.mrf.mxu3  ;;  %v2998_v18 = vpop.f32.mrf.mxu2 }
 0x40c   : > { %v3027_v8 = vsel %vm2754_vm13, %v3017_v25, 0.0  ;;  %v3026_v30 = vsel %vm2753_vm15, %v2998_v18, 0.0 }
 0x413   : > { %v3201_v28 = vpop.f32.mrf.mxu3  ;;  %v3182_v10 = vpop.f32.mrf.mxu2 }
 0x414   : > { %v3212_v41 = vadd.f32 %v3201_v28, %v3125_v12  ;;  %v3211_v1 = vadd.f32 %v3182_v10, %v3124_v60  ;;  %v3294_v28 = vpop.f32.mrf.mxu1  ;;  %v3121_v10 = vsel %vm2565_vm4, %v3111_v29, 0.0  ;;  %v3275_v60 = vpop.f32.mrf.mxu0  ;;  %v2939_v29 = vadd.f32 %v5983_v17, %v2872_v49 }
 0x415   : > { %v3304_v25 = vsel %vm2754_vm13, %v3294_v28, 0.0  ;;  %v3123_v17 = vsel %vm2565_vm4, %v6001_v43, 0.0  ;;  %v3434_v28 = vpop.permute.xlu0 %3433 }
 0x416   : > { %v3308_v42 = vadd.f32 %v3300_v46, %v3212_v41  ;;  %v3307_v57 = vadd.f32 %v3299_v48, %v3211_v1  ;;  %v3129_v1 = vadd.f32 %v3121_v10, %v3033_v55  ;;  %v2938_v48 = vadd.f32 %v5985_v47, %v2871_v2 }
 0x417   : > { %v3035_v54 = vadd.f32 %v3027_v8, %v2939_v29  ;;  %v3122_v47 = vsel %vm2564_vm14, %v6003_v38, 0.0  ;;  %v3338_v38 = vpop.permute.xlu2 %3337 }
 0x418   : > { %v3341_v35 = vadd.f32 %v3323_v33, %v3308_v42  ;;  %v3340_v61 = vadd.f32 %v3323_v33, %v3307_v57 }
 0x419   : > { %v3131_v19 = vadd.f32 %v3123_v17, %v3035_v54 }
 0x41a   : > { %v3349_v41 = vmax.f32 %v3341_v35, 0.0  ;;  %v3348_v14 = vmax.f32 %v3340_v61, 0.0 }
 0x41b   : > { %v3203_v37 = vpop.f32.mrf.mxu3  ;;  %v3184_v13 = vpop.f32.mrf.mxu2 }
 0x41c   : > { %v3214_v52 = vadd.f32 %v3203_v37, %v3127_v23  ;;  %v3213_v62 = vadd.f32 %v3184_v13, %v3126_v5  ;;  %v3034_v23 = vadd.f32 %v3026_v30, %v2938_v48  ;;  %v3303_v5 = vsel %vm2753_vm15, %v3275_v60, 0.0  ;;  %v3296_v37 = vpop.f32.mrf.mxu1  ;;  %v3439_v60 = vpop.permute.xlu1 %3438 }
 0x41e   : > { %v3310_v58 = vadd.f32 %v3302_v21, %v3214_v52  ;;  %v3309_v53 = vadd.f32 %v3301_v34, %v3213_v62  ;;  %v3277_v52 = vpop.f32.mrf.mxu0  ;;  %v3130_v33 = vadd.f32 %v3122_v47, %v3034_v23  ;;  %v3306_v62 = vsel %vm2754_vm13, %v3296_v37, 0.0 }
 0x41f   : > { %v3305_v43 = vsel %vm2753_vm15, %v3277_v52, 0.0  ;;  %v3429_v2 = vpop.permute.xlu2 %3428 }
 0x420   : > { %v3343_v40 = vadd.f32 %v3328_v63, %v3310_v58  ;;  %v3342_v12 = vadd.f32 %v3328_v63, %v3309_v53 }
 0x422   : > { %v3351_v0 = vmax.f32 %v3343_v40, 0.0  ;;  %v3350_v26 = vmax.f32 %v3342_v12, 0.0 }
 0x423   : > { %v3206_v46 = vpop.f32.mrf.mxu3  ;;  %v3187_v44 = vpop.f32.mrf.mxu2 }
 0x424   : > { %v3357_v39 = vpack.c.bf16 %v3351_v0, %v3349_v41  ;;  %v3356_v50 = vpack.c.bf16 %v3350_v26, %v3348_v14  ;;  %v3216_v42 = vadd.f32 %v3206_v46, %v3129_v1  ;;  %v3215_v57 = vadd.f32 %v3187_v44, %v3128_v51  ;;  %v3461_v0 = vpop.permute.xlu0 %3460  ;;  %v3466_v51 = vpop.permute.xlu1 %3465 }
 0x426   : > { %v3312_v18 = vadd.f32 %v3304_v25, %v3216_v42  ;;  %v3311_v13 = vadd.f32 %v3303_v5, %v3215_v57 }
 0x427   : > { %v3444_v1 = vpop.permute.xlu2 %3443 }
 0x428   : > { %v3345_v16 = vadd.f32 %v6017_v9, %v3312_v18  ;;  %v3344_v35 = vadd.f32 %v6017_v9, %v3311_v13  ;;  %v4152_v9 = vld [vmem:[%s6111_s5 + $0x38] sm:$0xff] }
 0x429   : > { %v6293_v13 = vld [vmem:[#allocation13_spill] sm:$0xff] }
 0x42a   : > { %v3353_v61 = vmax.f32 %v3345_v16, 0.0  ;;  %v3352_v49 = vmax.f32 %v3344_v35, 0.0 }
 0x42b   : > { %v3208_v7 = vpop.f32.mrf.mxu3  ;;  %v3189_v6 = vpop.f32.mrf.mxu2 }
 0x42c   : > { %v3218_v21 = vadd.f32 %v3208_v7, %v3131_v19  ;;  %v3217_v36 = vadd.f32 %v3189_v6, %v3130_v33  ;;  %v6292_v19 = vld [vmem:[#allocation10_spill] sm:$0xff]  ;;  %v6294_v7 = vld [vmem:[#allocation21_spill] sm:$0xff]  ;;  %v6295_v6 = vld [vmem:[#allocation12_spill] sm:$0xff] }
 0x42d   : > { %v1538_v52 = vadd.f32 %v6293_v13, %v6292_v19 }
 0x42e   : > { %v3314_v4 = vadd.f32 %v3306_v62, %v3218_v21  ;;  %v3313_v34 = vadd.f32 %v3305_v43, %v3217_v36  ;;  %v1519_v21 = vadd.f32 %v6295_v6, %v6294_v7 }
 0x42f   : > { %v3471_v37 = vpop.permute.xlu2 %3470  ;;  %v2478_v36 = vadd.f32 %v5919_v59, %v1538_v52 }
 0x430   : > { %v3347_v58 = vadd.f32 %v3338_v38, %v3314_v4  ;;  %v3346_v63 = vadd.f32 %v3338_v38, %v3313_v34 }
 0x432   : > { %v3355_v53 = vmax.f32 %v3347_v58, 0.0  ;;  %v3354_v55 = vmax.f32 %v3346_v63, 0.0  ;;  %v3476_v63 = vpop.permute.xlu0 %3475 }
 0x434   : > { %v3359_v40 = vpack.c.bf16 %v3355_v53, %v3353_v61  ;;  %v3358_v31 = vpack.c.bf16 %v3354_v55, %v3352_v49 }
 0x436   : > { %3401 = vmatpush.bf16.msrb.mxu3 %v3359_v40  ;;  %3382 = vmatpush.bf16.msrb.mxu2 %v3358_v31 }
 0x43a   : > { %3402 = vmatpush.bf16.msrb.mxu3 %v3357_v39  ;;  %3383 = vmatpush.bf16.msrb.mxu2 %v3356_v50 }
 0x43d   : > { %4138 = vmatmul.msk.bf16.vlgmr.msrb.gmra.mxu3 %vm463_vm2, %v4151_v27  ;;  %4136 = vmatmul.msk.bf16.vlgmr.msrb.gmra.mxu2 %vm463_vm2, %v4151_v27 }
 0x44d   : > { %4139 = vmatmul.msk.bf16.gmra.mxu3 %vm463_vm2, %v4152_v9  ;;  %4137 = vmatmul.msk.bf16.gmra.mxu2 %vm463_vm2, %v4152_v9 }
 0x4c0   : > { %v3404_v10 = vpop.f32.mrf.mxu3  ;;  %v3385_v56 = vpop.f32.mrf.mxu2 }
 0x4c1   : > { %v3415_v12 = vadd.f32 %v3404_v10, %v5895_v24  ;;  %v3414_v3 = vadd.f32 %v3385_v56, %v5898_v32 }
 0x4c3   : > { %v3447_v41 = vadd.f32 %v3429_v2, %v3415_v12  ;;  %v3446_v8 = vadd.f32 %v3429_v2, %v3414_v3 }
 0x4c5   : > { %v3479_v14 = vadd.f32 %v3461_v0, %v3447_v41  ;;  %v3478_v26 = vadd.f32 %v3461_v0, %v3446_v8 }
 0x4c7   : > { %v3487_v46 = vmax.f32 %v3479_v14, 0.0  ;;  %v3486_v30 = vmax.f32 %v3478_v26, 0.0 }
 0x4c8   : > { %v3406_v29 = vpop.f32.mrf.mxu3  ;;  %v3387_v44 = vpop.f32.mrf.mxu2 }
 0x4c9   : > { %v3417_v24 = vadd.f32 %v3406_v29, %v5904_v22  ;;  %v3494_v32 = vpack.c.bf16 %v3487_v46, %v3486_v30  ;;  %v3416_v39 = vadd.f32 %v3387_v44, %v5909_v20 }
 0x4cb   : > { %v3449_v48 = vadd.f32 %v3434_v28, %v3417_v24  ;;  %3498 = vst [vmem:[%s6087_s26] sm:$0xff] %v3494_v32  ;;  %v3448_v50 = vadd.f32 %v3434_v28, %v3416_v39 }
 0x4cd   : > { %v3481_v54 = vadd.f32 %v3466_v51, %v3449_v48  ;;  %v3480_v42 = vadd.f32 %v3466_v51, %v3448_v50 }
 0x4cf   : > { %v3489_v23 = vmax.f32 %v3481_v54, 0.0  ;;  %v3488_v25 = vmax.f32 %v3480_v42, 0.0 }
 0x4d0   : > { %v3409_v57 = vpop.f32.mrf.mxu3  ;;  %v3390_v5 = vpop.f32.mrf.mxu2 }
 0x4d1   : > { %v3419_v17 = vadd.f32 %v3409_v57, %v5914_v11  ;;  %v3495_v47 = vpack.c.bf16 %v3489_v23, %v3488_v25  ;;  %v3418_v22 = vadd.f32 %v3390_v5, %v5917_v15  ;;  %v2477_v11 = vadd.f32 %v5924_v45, %v1519_v21 }
 0x4d3   : > { %v3451_v18 = vadd.f32 %v3439_v60, %v3419_v17  ;;  %3499 = vst [vmem:[%s6087_s26 + $0x8] sm:$0xff] %v3495_v47  ;;  %v3450_v20 = vadd.f32 %v3439_v60, %v3418_v22 }
 0x4d5   : > { %v3483_v33 = vadd.f32 %v3471_v37, %v3451_v18  ;;  %v3482_v62 = vadd.f32 %v3471_v37, %v3450_v20 }
 0x4d7   : > { %v3491_v16 = vmax.f32 %v3483_v33, 0.0  ;;  %v3490_v15 = vmax.f32 %v3482_v62, 0.0 }
 0x4d8   : > { %v3411_v43 = vpop.f32.mrf.mxu3  ;;  %v3392_v4 = vpop.f32.mrf.mxu2 }
 0x4d9   : > { %v3421_v38 = vadd.f32 %v3411_v43, %v2478_v36  ;;  %v3496_v35 = vpack.c.bf16 %v3491_v16, %v3490_v15  ;;  %v3420_v34 = vadd.f32 %v3392_v4, %v2477_v11 }
 0x4db   : > { %v3453_v58 = vadd.f32 %v3444_v1, %v3421_v38  ;;  %3500 = vst [vmem:[%s6087_s26 + $0x10] sm:$0xff] %v3496_v35  ;;  %v3452_v61 = vadd.f32 %v3444_v1, %v3420_v34 }
 0x4dd   : > { %v3485_v53 = vadd.f32 %v3476_v63, %v3453_v58  ;;  %v3484_v49 = vadd.f32 %v3476_v63, %v3452_v61 }
 0x4df   : > { %v3493_v55 = vmax.f32 %v3485_v53, 0.0  ;;  %v3492_v40 = vmax.f32 %v3484_v49, 0.0 }
 0x4e1   : > { %v3497_v31 = vpack.c.bf16 %v3493_v55, %v3492_v40 }
 0x4e3   : > { %3501 = vst [vmem:[%s6087_s26 + $0x18] sm:$0xff] %v3497_v31 }
 0x4e4 PF: > { %s18_s27 = sadd.s32 1, %s4262_s27  }
 0x4e5   : > { %p15_p4 = scmp.ge.s32.totalorder %s18_s27, 4  }
 0x4e7   :  { %17 = sbr.rel (!%p15_p4) target bundleno = 1 (0x1), region = 113 }

// kernel: a_call__.3
= control target key start
LH: loop header
LB: loop body
LE: loop exit
PB: predicated region body
PF: predicated region fallthrough
CT: control target
= control target key end

     0   :  { %s1638_s24 = smov 0   ;;  %s1640_s25 = smov 0   ;;  %s1961_s0 = inlined_call_operand.vmem [shape: bf16[2,32,4096], index: 0, kind: input, shape index: {}]   ;;  %s1962_s1 = inlined_call_operand.vmem [shape: bf16[2,16,4096], index: 1, kind: input, shape index: {}]   ;;  %s1963_s2 = inlined_call_operand.vmem [shape: bf16[2,16,4096], index: 2, kind: input, shape index: {}]   ;;  %s1964_s3 = inlined_call_operand.vmem [shape: bf16[16,32], index: 3, kind: input, shape index: {}]   ;;  %s1965_s4 = inlined_call_operand.vmem [shape: bf16[16,16], index: 4, kind: input, shape index: {}]   ;;  %s1966_s5 = inlined_call_operand.vmem [shape: bf16[16,16], index: 5, kind: input, shape index: {}]   ;;  %s1967_s6 = inlined_call_operand.vmem [shape: f32[16,1], index: 6, kind: input, shape index: {}]   ;;  %s1968_s7 = inlined_call_operand.vmem [shape: f32[2,16,4096], index: 7, kind: output, shape index: {}]  }
   0x1   :  { %s1642_s26 = smov 0   ;;  %s1644_s27 = smov 0  }
   0x2   :  { %s1646_s28 = smov 0   ;;  %s1648_s29 = smov 0  }
   0x3   :  { %s1650_s30 = smov 0  }
   0x4 LB: > { %s26_s8 = sadd.s32 1, %s1587_s28  ;;  %s29_s9 = sadd.s32 1, %s1591_s29  ;;  %s1595_s30 = sphi %s1650_s30, %s17_s30   ;;  %s1591_s29 = sphi %s1648_s29, %s1976_s29   ;;  %s1587_s28 = sphi %s1646_s28, %s1975_s28   ;;  %s1583_s27 = sphi %s1644_s27, %s1974_s27   ;;  %s1579_s26 = sphi %s1642_s26, %s1973_s26   ;;  %s1575_s25 = sphi %s1640_s25, %s1972_s25   ;;  %s1571_s24 = sphi %s1638_s24, %s1971_s24  }
   0x5   : > { %p27_p0 = scmp.ge.s32.totalorder %s26_s8, 4  ;;  %s1257_s10 = sadd.s32 4294967295, %s1595_s30  }
   0x6   : > { %p45_p1 = scmp.ne.s32.totalorder %s1575_s25, %s1571_s24  ;;  %p46_p2 = scmp.eq.s32.totalorder %s1595_s30, 0 }
   0x7   : > { %s1978_s8 = smov (%p27_p0, %s26_s8), 0  ;;  %s1980_s9 = smov (!%p27_p0, %s29_s9), %s1591_s29 }
   0x8   : > { %p31_p3 = scmp.ge.s32.totalorder %s1980_s9, 2  ;;  %p217_p4 = scmp.eq.s32.totalorder %s1257_s10, 7 }
   0x9   : > { %s34_s11 = ssub.s32 %s1587_s28, %s1978_s8  ;;  %p1684_p5 = por %p46_p2, %p45_p1 }
   0xa   : > { %s1982_s9 = smov (%p31_p3, %s1980_s9), 0  ;;  %p1690_p6 = por %p217_p4, %p45_p1 }
   0xb   : > { %s33_s14 = ssub.s32 %s1591_s29, %s1982_s9  ;;  %s38_s16 = sadd.s32 1, %s1575_s25 }
   0xc   : > { %s35_s15 = sor.u32 %s34_s11, %s33_s14  ;;  %p1260_p8 = scmp.ge.s32.totalorder %s1595_s30, 8 }
   0xd   : > { %p36_p7 = scmp.eq.s32.totalorder %s35_s15, 0 }
   0xe   : > { %251 = sbr.rel (%p1260_p8) target bundleno = 72 (0x48), region = 32 }
   0xf   : > { %s1698_s17 = scalar_select %p36_p7, %s1575_s25, %s38_s16  }
  0x13   : > { %254 = sbr.rel (!%p1684_p5) target bundleno = 42 (0x2a), region = 36  ;;  %s256_s18 = sand.u32 (%p1684_p5), 1, %s1575_s25  }
  0x14   : > { %s1262_s19 = sshll.u32 (%p1684_p5), %s1587_s28, 3  ;;  %s1261_s20 = sshll.u32 (%p1684_p5), %s256_s18, 7 }
  0x15   : > { %s1263_s21 = sshll.u32 (%p1684_p5), %s1591_s29, 7  ;;  %s258_s15 = scalar_lea.vmem (%p1684_p5), [#allocation2], %s1261_s20 }
  0x16   : > { %s261_s22 = sadd.s32 (%p1684_p5), %s1263_s21, %s1262_s19 }
  0x17   : > { %s1264_s23 = sshll.u32 (%p1684_p5), %s261_s22, 2 }
  0x18   : > { %s1709_s14 = scalar_lea.vmem %s1961_s0, %s1264_s23 }
  0x19   : > { %v276_v0 = vld [vmem:[%s1709_s14] sm:$0xff]  ;;  %v278_v1 = vld [vmem:[%s1709_s14 + $0x8] sm:$0xff]  ;;  %v280_v2 = vld [vmem:[%s1709_s14 + $0x10] sm:$0xff] }
  0x1a   : > { %277 = vst [vmem:[%s258_s15] sm:$0xff] %v276_v0  ;;  %v282_v3 = vld [vmem:[%s1709_s14 + $0x18] sm:$0xff]  ;;  %v284_v4 = vld [vmem:[%s1709_s14 + $0x80] sm:$0xff]  ;;  %v286_v5 = vld [vmem:[%s1709_s14 + $0x88] sm:$0xff] }
  0x1b   : > { %279 = vst [vmem:[%s258_s15 + $0x8] sm:$0xff] %v278_v1  ;;  %v288_v6 = vld [vmem:[%s1709_s14 + $0x90] sm:$0xff]  ;;  %v290_v7 = vld [vmem:[%s1709_s14 + $0x98] sm:$0xff]  ;;  %v292_v8 = vld [vmem:[%s1709_s14 + $0x100] sm:$0xff] }
  0x1c   : > { %281 = vst [vmem:[%s258_s15 + $0x10] sm:$0xff] %v280_v2  ;;  %v294_v9 = vld [vmem:[%s1709_s14 + $0x108] sm:$0xff]  ;;  %v296_v10 = vld [vmem:[%s1709_s14 + $0x110] sm:$0xff]  ;;  %v298_v11 = vld [vmem:[%s1709_s14 + $0x118] sm:$0xff] }
  0x1d   : > { %283 = vst [vmem:[%s258_s15 + $0x18] sm:$0xff] %v282_v3  ;;  %v300_v12 = vld [vmem:[%s1709_s14 + $0x180] sm:$0xff]  ;;  %v302_v13 = vld [vmem:[%s1709_s14 + $0x188] sm:$0xff]  ;;  %v304_v14 = vld [vmem:[%s1709_s14 + $0x190] sm:$0xff] }
  0x1e   : > { %285 = vst [vmem:[%s258_s15 + $0x20] sm:$0xff] %v284_v4  ;;  %v306_v15 = vld [vmem:[%s1709_s14 + $0x198] sm:$0xff] }
  0x1f   : > { %287 = vst [vmem:[%s258_s15 + $0x28] sm:$0xff] %v286_v5 }
  0x20   : > { %289 = vst [vmem:[%s258_s15 + $0x30] sm:$0xff] %v288_v6 }
  0x21   : > { %291 = vst [vmem:[%s258_s15 + $0x38] sm:$0xff] %v290_v7 }
  0x22   : > { %293 = vst [vmem:[%s258_s15 + $0x40] sm:$0xff] %v292_v8 }
  0x23   : > { %295 = vst [vmem:[%s258_s15 + $0x48] sm:$0xff] %v294_v9 }
  0x24   : > { %297 = vst [vmem:[%s258_s15 + $0x50] sm:$0xff] %v296_v10 }
  0x25   : > { %299 = vst [vmem:[%s258_s15 + $0x58] sm:$0xff] %v298_v11 }
  0x26   : > { %301 = vst [vmem:[%s258_s15 + $0x60] sm:$0xff] %v300_v12 }
  0x27   : > { %303 = vst [vmem:[%s258_s15 + $0x68] sm:$0xff] %v302_v13 }
  0x28   : > { %305 = vst [vmem:[%s258_s15 + $0x70] sm:$0xff] %v304_v14 }
  0x29   : > { %307 = vst [vmem:[%s258_s15 + $0x78] sm:$0xff] %v306_v15 }
  0x2a PF: > { %313 = sbr.rel (!%p1684_p5) target bundleno = 57 (0x39), region = 59  ;;  %s315_s16 = sand.u32 (%p1684_p5), 1, %s1575_s25  }
  0x2b   : > { %s1266_s18 = sshll.u32 (%p1684_p5), %s1587_s28, 3  ;;  %s1265_s19 = sshll.u32 (%p1684_p5), %s315_s16, 6 }
  0x2c   : > { %s1267_s20 = sshll.u32 (%p1684_p5), %s1591_s29, 6  ;;  %s317_s14 = scalar_lea.vmem (%p1684_p5), [#allocation3], %s1265_s19 }
  0x2d   : > { %s320_s21 = sadd.s32 (%p1684_p5), %s1267_s20, %s1266_s18 }
  0x2e   : > { %s1268_s22 = sshll.u32 (%p1684_p5), %s320_s21, 2 }
  0x2f   : > { %s322_s11 = scalar_lea.vmem %s1962_s1, %s1268_s22 }
  0x30   : > { %v335_v16 = vld [vmem:[%s322_s11] sm:$0xff]  ;;  %v337_v17 = vld [vmem:[%s322_s11 + $0x8] sm:$0xff]  ;;  %v339_v18 = vld [vmem:[%s322_s11 + $0x10] sm:$0xff] }
  0x31   : > { %336 = vst [vmem:[%s317_s14] sm:$0xff] %v335_v16  ;;  %v341_v19 = vld [vmem:[%s322_s11 + $0x18] sm:$0xff]  ;;  %v343_v20 = vld [vmem:[%s322_s11 + $0x80] sm:$0xff]  ;;  %v345_v21 = vld [vmem:[%s322_s11 + $0x88] sm:$0xff] }
  0x32   : > { %338 = vst [vmem:[%s317_s14 + $0x8] sm:$0xff] %v337_v17  ;;  %v347_v22 = vld [vmem:[%s322_s11 + $0x90] sm:$0xff]  ;;  %v349_v23 = vld [vmem:[%s322_s11 + $0x98] sm:$0xff] }
  0x33   : > { %340 = vst [vmem:[%s317_s14 + $0x10] sm:$0xff] %v339_v18 }
  0x34   : > { %342 = vst [vmem:[%s317_s14 + $0x18] sm:$0xff] %v341_v19 }
  0x35   : > { %344 = vst [vmem:[%s317_s14 + $0x20] sm:$0xff] %v343_v20 }
  0x36   : > { %346 = vst [vmem:[%s317_s14 + $0x28] sm:$0xff] %v345_v21 }
  0x37   : > { %348 = vst [vmem:[%s317_s14 + $0x30] sm:$0xff] %v347_v22 }
  0x38   : > { %350 = vst [vmem:[%s317_s14 + $0x38] sm:$0xff] %v349_v23 }
  0x39 PF: > { %356 = sbr.rel (!%p1684_p5) target bundleno = 72 (0x48), region = 82  ;;  %s358_s15 = sand.u32 (%p1684_p5), 1, %s1575_s25  }
  0x3a   : > { %s1270_s16 = sshll.u32 (%p1684_p5), %s1587_s28, 3  ;;  %s1269_s18 = sshll.u32 (%p1684_p5), %s358_s15, 6 }
  0x3b   : > { %s1271_s19 = sshll.u32 (%p1684_p5), %s1591_s29, 6  ;;  %s360_s11 = scalar_lea.vmem (%p1684_p5), [#allocation4], %s1269_s18 }
  0x3c   : > { %s363_s20 = sadd.s32 (%p1684_p5), %s1271_s19, %s1270_s16 }
  0x3d   : > { %s1272_s21 = sshll.u32 (%p1684_p5), %s363_s20, 2 }
  0x3e   : > { %s365_s10 = scalar_lea.vmem %s1963_s2, %s1272_s21 }
  0x3f   : > { %v378_v24 = vld [vmem:[%s365_s10] sm:$0xff]  ;;  %v380_v25 = vld [vmem:[%s365_s10 + $0x8] sm:$0xff]  ;;  %v382_v26 = vld [vmem:[%s365_s10 + $0x10] sm:$0xff] }
  0x40   : > { %379 = vst [vmem:[%s360_s11] sm:$0xff] %v378_v24  ;;  %v384_v27 = vld [vmem:[%s365_s10 + $0x18] sm:$0xff]  ;;  %v386_v28 = vld [vmem:[%s365_s10 + $0x80] sm:$0xff]  ;;  %v388_v29 = vld [vmem:[%s365_s10 + $0x88] sm:$0xff] }
  0x41   : > { %381 = vst [vmem:[%s360_s11 + $0x8] sm:$0xff] %v380_v25  ;;  %v390_v30 = vld [vmem:[%s365_s10 + $0x90] sm:$0xff]  ;;  %v392_v31 = vld [vmem:[%s365_s10 + $0x98] sm:$0xff] }
  0x42   : > { %383 = vst [vmem:[%s360_s11 + $0x10] sm:$0xff] %v382_v26 }
  0x43   : > { %385 = vst [vmem:[%s360_s11 + $0x18] sm:$0xff] %v384_v27 }
  0x44   : > { %387 = vst [vmem:[%s360_s11 + $0x20] sm:$0xff] %v386_v28 }
  0x45   : > { %389 = vst [vmem:[%s360_s11 + $0x28] sm:$0xff] %v388_v29 }
  0x46   : > { %391 = vst [vmem:[%s360_s11 + $0x30] sm:$0xff] %v390_v30 }
  0x47   : > { %393 = vst [vmem:[%s360_s11 + $0x38] sm:$0xff] %v392_v31 }
  0x48 PF: > { %p1273_p9 = scmp.ge.s32.totalorder %s1595_s30, 1  ;;  %p398_p10 = scmp.lt.s32.totalorder %s1595_s30, 9 }
  0x4a   : > { %p399_p11 = pnand %p1273_p9, %p398_p10 }
  0x4b   : > { %s405_s12 = sand.u32 (!%p399_p11), 1, %s1571_s24  }
  0x4c   : > { %402 = sbr.rel (%p399_p11) target bundleno = 323 (0x143), region = 105  ;;  %s1746_s14 = sshll.u32 (!%p399_p11), %s405_s12, 7 }
  0x4d   : > { %s1748_s15 = sshll.u32 (!%p399_p11), %s405_s12, 6  ;;  %s1757_s24 = scalar_lea.vmem (!%p399_p11), [#allocation2], %s1746_s14 }
  0x4e   : > { %s414_s16 = scalar_lea.vmem (!%p399_p11), [#allocation3], %s1748_s15  ;;  %s1808_s20 = scalar_lea.vmem (!%p399_p11), [#allocation4], %s1748_s15 }
  0x4f   : > { %s1875_s18 = scalar_lea.vmem (!%p399_p11), [#allocation5], %s1746_s14 }
  0x51   : > { %v1284_v32 = vld [vmem:[%s414_s16] sm:$0xf]  ;;  %vm535_vm0 = vcmask 130048   ;;  %v1466_v36 = vld [vmem:[%s414_s16 + $0x4] sm:$0xf]  ;;  %vm736_vm1 = vcmask 261120  }
  0x52   : > { %v1470_v33 = vld [vmem:[%s414_s16 + $0x1c] sm:$0xf0]  ;;  %v1286_v37 = vld [vmem:[%s414_s16 + $0x20] sm:$0xf0]  ;;  %v1292_v38 = vld [vmem:[%s414_s16 + $0x8] sm:$0xf] }
  0x53   : > { %v1754_v34 = vld [vmem:[%s1965_s4] sm:$0xff]  ;;  %v1285_v35 = vor.u32 %v1470_v33, %v1284_v32  ;;  %v1289_v39 = vor.u32 %v1466_v36, %v1286_v37  ;;  %v1471_v40 = vld [vmem:[%s414_s16 + $0x24] sm:$0xf0]  ;;  %v1467_v41 = vld [vmem:[%s414_s16 + $0xc] sm:$0xf]  ;;  %s1443_s14 = sshll.u32 (%p1690_p6), %s1579_s26, 3 }
  0x54   : > { %v1294_v42 = vld [vmem:[%s414_s16 + $0x28] sm:$0xf0]  ;;  %v1293_v43 = vor.u32 %v1471_v40, %v1292_v38  ;;  %v1308_v45 = vld [vmem:[%s414_s16 + $0x18] sm:$0xf]  ;;  %v1469_v47 = vld [vmem:[%s414_s16 + $0x1c] sm:$0xf] }
  0x55   : > { %546 = vmatpush.bf16.msra.mxu0 %v1285_v35  ;;  %v1297_v44 = vor.u32 %v1467_v41, %v1294_v42  ;;  %v1473_v46 = vld [vmem:[%s414_s16 + $0x34] sm:$0xf0]  ;;  %560 = vmatpush.bf16.msra.mxu1 %v1289_v39  ;;  %v1310_v49 = vld [vmem:[%s414_s16 + $0x38] sm:$0xf0]  ;;  %v1300_v50 = vld [vmem:[%s414_s16 + $0x10] sm:$0xf] }
  0x56   : > { %v1309_v48 = vor.u32 %v1473_v46, %v1308_v45  ;;  %v1472_v51 = vld [vmem:[%s414_s16 + $0x2c] sm:$0xf0]  ;;  %574 = vmatpush.bf16.msra.mxu2 %v1293_v43  ;;  %v1313_v52 = vor.u32 %v1469_v47, %v1310_v49  ;;  %v1468_v54 = vld [vmem:[%s414_s16 + $0x14] sm:$0xf]  ;;  %v1368_v56 = vld [vmem:[%s1757_s24 + $0x48] sm:$0xf] }
  0x57   : > { %588 = vmatpush.bf16.msra.mxu3 %v1297_v44  ;;  %v1301_v53 = vor.u32 %v1472_v51, %v1300_v50  ;;  %v1302_v55 = vld [vmem:[%s414_s16 + $0x30] sm:$0xf0]  ;;  %v1462_v58 = vld [vmem:[%s1757_s24 + $0x64] sm:$0xf0]  ;;  %v1458_v59 = vld [vmem:[%s1757_s24 + $0x4c] sm:$0xf] }
  0x58   : > { %1314 = vmatmul.msk.bf16.vlgmr.msra.gmra.mxu0 %vm535_vm0, %v1754_v34  ;;  %v1305_v57 = vor.u32 %v1468_v54, %v1302_v55  ;;  %v1370_v60 = vld [vmem:[%s1757_s24 + $0x68] sm:$0xf0]  ;;  %1315 = vmatmul.msk.bf16.vlgmr.msra.gmra.mxu1 %vm535_vm0, %v1754_v34  ;;  %v1369_v61 = vor.u32 %v1462_v58, %v1368_v56  ;;  %v1360_v63 = vld [vmem:[%s1757_s24 + $0x40] sm:$0xf]  ;;  %v1457_v1 = vld [vmem:[%s1757_s24 + $0x44] sm:$0xf] }
  0x59   : > { %v1373_v62 = vor.u32 %v1458_v59, %v1370_v60  ;;  %v1461_v0 = vld [vmem:[%s1757_s24 + $0x5c] sm:$0xf0]  ;;  %1316 = vmatmul.msk.bf16.vlgmr.msra.gmra.mxu2 %vm535_vm0, %v1754_v34  ;;  %v1362_v3 = vld [vmem:[%s1757_s24 + $0x60] sm:$0xf0]  ;;  %v1336_v4 = vld [vmem:[%s1757_s24 + $0x8] sm:$0xf]  ;;  %602 = vmatpush.bf16.msrb.mxu0 %v1301_v53 }
  0x5a   : > { %630 = vmatpush.bf16.msrb.mxu2 %v1309_v48  ;;  %1317 = vmatmul.msk.bf16.vlgmr.msra.gmra.mxu3 %vm535_vm0, %v1754_v34  ;;  %v1361_v2 = vor.u32 %v1461_v0, %v1360_v63  ;;  %v1454_v5 = vld [vmem:[%s1757_s24 + $0x24] sm:$0xf0]  ;;  %v1365_v6 = vor.u32 %v1457_v1, %v1362_v3  ;;  %v1450_v7 = vld [vmem:[%s1757_s24 + $0xc] sm:$0xf]  ;;  %v1328_v9 = vld [vmem:[%s1757_s24] sm:$0xf] }
  0x5b   : > { %644 = vmatpush.bf16.msrb.mxu3 %v1313_v52  ;;  %616 = vmatpush.bf16.msrb.mxu1 %v1305_v57  ;;  %v1338_v8 = vld [vmem:[%s1757_s24 + $0x28] sm:$0xf0]  ;;  %v1337_v10 = vor.u32 %v1454_v5, %v1336_v4  ;;  %v1453_v12 = vld [vmem:[%s1757_s24 + $0x1c] sm:$0xf0]  ;;  %v1449_v13 = vld [vmem:[%s1757_s24 + $0x4] sm:$0xf] }
  0x5c   : > { %v1341_v11 = vor.u32 %v1450_v7, %v1338_v8  ;;  %v1330_v14 = vld [vmem:[%s1757_s24 + $0x20] sm:$0xf0]  ;;  %v1329_v15 = vor.u32 %v1453_v12, %v1328_v9  ;;  %v1376_v17 = vld [vmem:[%s1757_s24 + $0x50] sm:$0xf]  ;;  %v1384_v19 = vld [vmem:[%s1757_s24 + $0x58] sm:$0xf] }
  0x5d   : > { %746 = vmatpush.bf16.msra.mxu0 %v1361_v2  ;;  %v1333_v16 = vor.u32 %v1449_v13, %v1330_v14  ;;  %v1463_v18 = vld [vmem:[%s1757_s24 + $0x6c] sm:$0xf0]  ;;  %v1464_v20 = vld [vmem:[%s1757_s24 + $0x74] sm:$0xf0]  ;;  %v1460_v21 = vld [vmem:[%s1757_s24 + $0x5c] sm:$0xf] }
  0x5e   : > { %774 = vmatpush.bf16.msra.mxu2 %v1369_v61  ;;  %v1386_v22 = vld [vmem:[%s1757_s24 + $0x78] sm:$0xf0]  ;;  %v1377_v23 = vor.u32 %v1463_v18, %v1376_v17  ;;  %v1459_v24 = vld [vmem:[%s1757_s24 + $0x54] sm:$0xf]  ;;  %v1344_v26 = vld [vmem:[%s1757_s24 + $0x10] sm:$0xf]  ;;  %v1385_v28 = vor.u32 %v1464_v20, %v1384_v19 }
  0x5f   : > { %788 = vmatpush.bf16.msra.mxu3 %v1373_v62  ;;  %760 = vmatpush.bf16.msra.mxu1 %v1365_v6  ;;  %v1378_v25 = vld [vmem:[%s1757_s24 + $0x70] sm:$0xf0]  ;;  %v1455_v27 = vld [vmem:[%s1757_s24 + $0x2c] sm:$0xf0]  ;;  %v1389_v29 = vor.u32 %v1460_v21, %v1386_v22  ;;  %v1352_v30 = vld [vmem:[%s1757_s24 + $0x18] sm:$0xf] }
  0x60   : > { %v1381_v31 = vor.u32 %v1459_v24, %v1378_v25  ;;  %v1456_v32 = vld [vmem:[%s1757_s24 + $0x34] sm:$0xf0]  ;;  %v1452_v33 = vld [vmem:[%s1757_s24 + $0x1c] sm:$0xf]  ;;  %v1345_v36 = vor.u32 %v1455_v27, %v1344_v26  ;;  %v1451_v37 = vld [vmem:[%s1757_s24 + $0x14] sm:$0xf] }
  0x61   : > { %747 = vmatpush.bf16.msra.mxu0 %v1329_v15  ;;  %v1354_v35 = vld [vmem:[%s1757_s24 + $0x38] sm:$0xf0]  ;;  %v1346_v38 = vld [vmem:[%s1757_s24 + $0x30] sm:$0xf0]  ;;  %v1353_v39 = vor.u32 %v1456_v32, %v1352_v30  ;;  %v1479_v42 = vld [vmem:[%s1808_s20 + $0x1c] sm:$0xf0] }
  0x62   : > { %775 = vmatpush.bf16.msra.mxu2 %v1337_v10  ;;  %v1357_v40 = vor.u32 %v1452_v33, %v1354_v35  ;;  %v1349_v41 = vor.u32 %v1451_v37, %v1346_v38  ;;  %v1448_v43 = vld [vmem:[%s1964_s3] sm:$0xff]  ;;  %v1412_v44 = vld [vmem:[%s1808_s20 + $0x8] sm:$0xf]  ;;  %v1476_v46 = vld [vmem:[%s1808_s20 + $0xc] sm:$0xf]  ;;  %v1597_v55 = vmov 0  }
  0x63   : > { %789 = vmatpush.bf16.msra.mxu3 %v1341_v11  ;;  %761 = vmatpush.bf16.msra.mxu1 %v1333_v16  ;;  %v1480_v45 = vld [vmem:[%s1808_s20 + $0x24] sm:$0xf0]  ;;  %v1414_v47 = vld [vmem:[%s1808_s20 + $0x28] sm:$0xf0]  ;;  %v1475_v49 = vld [vmem:[%s1808_s20 + $0x4] sm:$0xf] }
  0x64   : > { %v1406_v50 = vld [vmem:[%s1808_s20 + $0x20] sm:$0xf0]  ;;  %v1413_v51 = vor.u32 %v1480_v45, %v1412_v44  ;;  %v1417_v52 = vor.u32 %v1476_v46, %v1414_v47  ;;  %1540 = vset.pattern.permute.xlu0 %v1597_v55  ;;  %v1420_v56 = vld [vmem:[%s1808_s20 + $0x10] sm:$0xf]  ;;  %v1428_v58 = vld [vmem:[%s1808_s20 + $0x18] sm:$0xf] }
  0x65   : > { %v1409_v53 = vor.u32 %v1475_v49, %v1406_v50  ;;  %v1038_v54 = vld [vmem:[%s1967_s6] sm:$0xff]  ;;  %v1481_v57 = vld [vmem:[%s1808_s20 + $0x2c] sm:$0xf0]  ;;  %v1482_v59 = vld [vmem:[%s1808_s20 + $0x34] sm:$0xf0]  ;;  %s1444_s19 = sshll.u32 (%p1690_p6), %s1583_s27, 6 }
  0x66   : > { %1042 = vperm.xlu0 %1540, %v1038_v54   ;;  %v1478_v60 = vld [vmem:[%s1808_s20 + $0x1c] sm:$0xf]  ;;  %v1421_v62 = vor.u32 %v1481_v57, %v1420_v56  ;;  %v1477_v63 = vld [vmem:[%s1808_s20 + $0x14] sm:$0xf]  ;;  %v1429_v1 = vor.u32 %v1482_v59, %v1428_v58  ;;  %v1039_v4 = vld [vmem:[%s1967_s6 + $0x8] sm:$0xff]  ;;  %s1091_s24 = sadd.s32 (%p1690_p6), %s1444_s19, %s1443_s14 }
  0x67   : > { %v1430_v61 = vld [vmem:[%s1808_s20 + $0x38] sm:$0xf0]  ;;  %v1422_v0 = vld [vmem:[%s1808_s20 + $0x30] sm:$0xf0]  ;;  %v1474_v5 = vld [vmem:[%s1966_s5] sm:$0xff] }
  0x68   : > { %1318 = vmatmul.msk.bf16.vlgmr.msrb.gmra.mxu0 %vm535_vm0, %v1754_v34  ;;  %1319 = vmatmul.msk.bf16.vlgmr.msrb.gmra.mxu1 %vm535_vm0, %v1754_v34  ;;  %v1433_v2 = vor.u32 %v1478_v60, %v1430_v61  ;;  %v1425_v3 = vor.u32 %v1477_v63, %v1422_v0 }
  0x69   : > { %802 = vmatpush.bf16.msrb.mxu0 %v1377_v23  ;;  %1320 = vmatmul.msk.bf16.vlgmr.msrb.gmra.mxu2 %vm535_vm0, %v1754_v34 }
  0x6a   : > { %1321 = vmatmul.msk.bf16.vlgmr.msrb.gmra.mxu3 %vm535_vm0, %v1754_v34  ;;  %830 = vmatpush.bf16.msrb.mxu2 %v1385_v28  ;;  %v1404_v34 = vld [vmem:[%s1808_s20] sm:$0xf]  ;;  %s1445_s20 = sshll.u32 (%p1690_p6), %s1091_s24, 3 }
  0x6b   : > { %844 = vmatpush.bf16.msrb.mxu3 %v1389_v29  ;;  %816 = vmatpush.bf16.msrb.mxu1 %v1381_v31  ;;  %v1405_v48 = vor.u32 %v1479_v42, %v1404_v34  ;;  %s1093_s22 = scalar_lea.vmem (%p1690_p6), %s1968_s7, %s1445_s20 }
  0x6d   : > { %803 = vmatpush.bf16.msrb.mxu0 %v1345_v36 }
  0x6e   : > { %831 = vmatpush.bf16.msrb.mxu2 %v1353_v39  ;;  %1047 = vperm.xlu0 %1540, %v1039_v4  }
  0x6f   : > { %845 = vmatpush.bf16.msrb.mxu3 %v1357_v40  ;;  %817 = vmatpush.bf16.msrb.mxu1 %v1349_v41 }
  0x78   : > { %1390 = vmatmul.msk.bf16.vlgmr.msra.gmra.mxu0 %vm736_vm1, %v1448_v43  ;;  %1391 = vmatmul.msk.bf16.vlgmr.msra.gmra.mxu1 %vm736_vm1, %v1448_v43 }
  0x79   : > { %917 = vmatpush.bf16.msra.mxu0 %v1405_v48  ;;  %1392 = vmatmul.msk.bf16.vlgmr.msra.gmra.mxu2 %vm736_vm1, %v1448_v43 }
  0x7a   : > { %1393 = vmatmul.msk.bf16.vlgmr.msra.gmra.mxu3 %vm736_vm1, %v1448_v43  ;;  %945 = vmatpush.bf16.msra.mxu2 %v1413_v51 }
  0x7b   : > { %959 = vmatpush.bf16.msra.mxu3 %v1417_v52  ;;  %931 = vmatpush.bf16.msra.mxu1 %v1409_v53 }
  0x88   : > { %1394 = vmatmul.msk.bf16.vlgmr.msrb.gmra.mxu0 %vm736_vm1, %v1448_v43  ;;  %1395 = vmatmul.msk.bf16.vlgmr.msrb.gmra.mxu1 %vm736_vm1, %v1448_v43 }
  0x89   : > { %973 = vmatpush.bf16.msrb.mxu0 %v1421_v62  ;;  %1396 = vmatmul.msk.bf16.vlgmr.msrb.gmra.mxu2 %vm736_vm1, %v1448_v43 }
  0x8a   : > { %1397 = vmatmul.msk.bf16.vlgmr.msrb.gmra.mxu3 %vm736_vm1, %v1448_v43  ;;  %1001 = vmatpush.bf16.msrb.mxu2 %v1429_v1 }
  0x8b   : > { %1015 = vmatpush.bf16.msrb.mxu3 %v1433_v2  ;;  %987 = vmatpush.bf16.msrb.mxu1 %v1425_v3 }
  0x98   : > { %1434 = vmatmul.msk.bf16.vlgmr.msra.gmra.mxu0 %vm535_vm0, %v1474_v5  ;;  %1435 = vmatmul.msk.bf16.vlgmr.msra.gmra.mxu1 %vm535_vm0, %v1474_v5 }
  0x99   : > { %1436 = vmatmul.msk.bf16.vlgmr.msra.gmra.mxu2 %vm535_vm0, %v1474_v5 }
  0x9a   : > { %1437 = vmatmul.msk.bf16.vlgmr.msra.gmra.mxu3 %vm535_vm0, %v1474_v5 }
  0xa8   : > { %1438 = vmatmul.msk.bf16.vlgmr.msrb.gmra.mxu0 %vm535_vm0, %v1474_v5  ;;  %1439 = vmatmul.msk.bf16.vlgmr.msrb.gmra.mxu1 %vm535_vm0, %v1474_v5 }
  0xa9   : > { %1440 = vmatmul.msk.bf16.vlgmr.msrb.gmra.mxu2 %vm535_vm0, %v1474_v5 }
  0xaa   : > { %1441 = vmatmul.msk.bf16.vlgmr.msrb.gmra.mxu3 %vm535_vm0, %v1474_v5 }
  0xd5   : > { %v548_v6 = vpop.f32.mrf.mxu0  ;;  %v562_v7 = vpop.f32.mrf.mxu1 }
  0xd8   : > { %v1866_v37 = vpop.permute.xlu0 %1042 }
  0xdc   : > { %v576_v8 = vpop.f32.mrf.mxu2 }
  0xdd   : > { %v590_v9 = vpop.f32.mrf.mxu3  ;;  %v550_v10 = vpop.f32.mrf.mxu0 }
  0xde   : > { %v564_v11 = vpop.f32.mrf.mxu1 }
  0xe0   : > { %v1879_v49 = vpop.permute.xlu0 %1047 }
  0xe4   : > { %v578_v12 = vpop.f32.mrf.mxu2 }
  0xe5   : > { %v592_v13 = vpop.f32.mrf.mxu3  ;;  %v604_v14 = vpop.f32.mrf.mxu0 }
  0xe6   : > { %v618_v15 = vpop.f32.mrf.mxu1 }
  0xec   : > { %v1854_v16 = vpop.f32.mrf.mxu2 }
  0xed   : > { %v1856_v17 = vpop.f32.mrf.mxu3  ;;  %v1858_v18 = vpop.f32.mrf.mxu0 }
  0xee   : > { %v1860_v19 = vpop.f32.mrf.mxu1 }
  0xf4   : > { %v1862_v20 = vpop.f32.mrf.mxu2 }
  0xf5   : > { %v1864_v21 = vpop.f32.mrf.mxu3  ;;  %v749_v22 = vpop.f32.mrf.mxu0 }
  0xf6   : > { %v763_v23 = vpop.f32.mrf.mxu1  ;;  %v750_v38 = vadd.f32 %v749_v22, %v548_v6 }
  0xf7   : > { %v764_v39 = vadd.f32 %v763_v23, %v562_v7 }
  0xfc   : > { %v777_v24 = vpop.f32.mrf.mxu2 }
  0xfd   : > { %v791_v25 = vpop.f32.mrf.mxu3  ;;  %v751_v26 = vpop.f32.mrf.mxu0  ;;  %v778_v47 = vadd.f32 %v777_v24, %v576_v8 }
  0xfe   : > { %v765_v27 = vpop.f32.mrf.mxu1  ;;  %v792_v48 = vadd.f32 %v791_v25, %v590_v9  ;;  %v752_v50 = vadd.f32 %v751_v26, %v550_v10 }
  0xff   : > { %v766_v51 = vadd.f32 %v765_v27, %v564_v11 }
 0x104   : > { %v779_v28 = vpop.f32.mrf.mxu2 }
 0x105   : > { %v793_v29 = vpop.f32.mrf.mxu3  ;;  %v805_v30 = vpop.f32.mrf.mxu0  ;;  %v780_v0 = vadd.f32 %v779_v28, %v578_v12 }
 0x106   : > { %v819_v31 = vpop.f32.mrf.mxu1  ;;  %v794_v1 = vadd.f32 %v793_v29, %v592_v13  ;;  %v806_v2 = vadd.f32 %v805_v30, %v604_v14 }
 0x107   : > { %v820_v3 = vadd.f32 %v819_v31, %v618_v15 }
 0x10c   : > { %v833_v32 = vpop.f32.mrf.mxu2 }
 0x10d   : > { %v847_v33 = vpop.f32.mrf.mxu3  ;;  %v807_v35 = vpop.f32.mrf.mxu0  ;;  %v834_v15 = vadd.f32 %v833_v32, %v1854_v16 }
 0x10e   : > { %v821_v36 = vpop.f32.mrf.mxu1  ;;  %v848_v23 = vadd.f32 %v847_v33, %v1856_v17  ;;  %v808_v24 = vadd.f32 %v807_v35, %v1858_v18 }
 0x10f   : > { %v822_v25 = vadd.f32 %v821_v36, %v1860_v19 }
 0x114   : > { %v1868_v40 = vpop.f32.mrf.mxu2 }
 0x115   : > { %v1870_v41 = vpop.f32.mrf.mxu3  ;;  %v919_v34 = vpop.f32.mrf.mxu0  ;;  %v836_v33 = vadd.f32 %v1868_v40, %v1862_v20 }
 0x116   : > { %v933_v42 = vpop.f32.mrf.mxu1  ;;  %v1022_v43 = vadd.f32 %v919_v34, %v750_v38  ;;  %v850_v35 = vadd.f32 %v1870_v41, %v1864_v21 }
 0x117   : > { %v1023_v44 = vadd.f32 %v933_v42, %v764_v39 }
 0x118   : > { %v1050_v45 = vadd.f32 %v1866_v37, %v1022_v43 }
 0x119   : > { %v1051_v46 = vadd.f32 %v1866_v37, %v1023_v44 }
 0x11a   : > { %1066 = vst [vmem:[%s1875_s18] sm:$0xff] %v1050_v45 }
 0x11b   : > { %1067 = vst [vmem:[%s1875_s18 + $0x8] sm:$0xff] %v1051_v46 }
 0x11c   : > { %v947_v52 = vpop.f32.mrf.mxu2 }
 0x11d   : > { %v961_v53 = vpop.f32.mrf.mxu3  ;;  %v1024_v54 = vadd.f32 %v947_v52, %v778_v47  ;;  %v921_v56 = vpop.f32.mrf.mxu0 }
 0x11e   : > { %v1025_v55 = vadd.f32 %v961_v53, %v792_v48  ;;  %v935_v57 = vpop.f32.mrf.mxu1  ;;  %v1030_v58 = vadd.f32 %v921_v56, %v752_v50 }
 0x11f   : > { %v1031_v59 = vadd.f32 %v935_v57, %v766_v51  ;;  %v1052_v60 = vadd.f32 %v1866_v37, %v1024_v54 }
 0x120   : > { %v1053_v61 = vadd.f32 %v1866_v37, %v1025_v55  ;;  %v1058_v62 = vadd.f32 %v1879_v49, %v1030_v58 }
 0x121   : > { %v1059_v63 = vadd.f32 %v1879_v49, %v1031_v59  ;;  %1068 = vst [vmem:[%s1875_s18 + $0x10] sm:$0xff] %v1052_v60  ;;  %v1106_v20 = vld [vmem:[%s1875_s18] sm:$0xff] (%p1690_p6) }
 0x122   : > { %1069 = vst [vmem:[%s1875_s18 + $0x18] sm:$0xff] %v1053_v61  ;;  %v1108_v21 = vld [vmem:[%s1875_s18 + $0x8] sm:$0xff] (%p1690_p6) }
 0x123   : > { %1074 = vst [vmem:[%s1875_s18 + $0x40] sm:$0xff] %v1058_v62 }
 0x124   : > { %1075 = vst [vmem:[%s1875_s18 + $0x48] sm:$0xff] %v1059_v63  ;;  %v949_v4 = vpop.f32.mrf.mxu2 }
 0x125   : > { %v963_v5 = vpop.f32.mrf.mxu3  ;;  %v1032_v6 = vadd.f32 %v949_v4, %v780_v0  ;;  %v975_v8 = vpop.f32.mrf.mxu0  ;;  %1107 = vst [vmem:[%s1093_s22] sm:$0xff] (%p1690_p6), %v1106_v20 }
 0x126   : > { %v1033_v7 = vadd.f32 %v963_v5, %v794_v1  ;;  %v989_v9 = vpop.f32.mrf.mxu1  ;;  %v1026_v10 = vadd.f32 %v975_v8, %v806_v2  ;;  %1109 = vst [vmem:[%s1093_s22 + $0x8] sm:$0xff] (%p1690_p6), %v1108_v21 }
 0x127   : > { %v1027_v11 = vadd.f32 %v989_v9, %v820_v3  ;;  %v1060_v22 = vadd.f32 %v1879_v49, %v1032_v6 }
 0x128   : > { %v1061_v12 = vadd.f32 %v1879_v49, %v1033_v7  ;;  %v1054_v13 = vadd.f32 %v1866_v37, %v1026_v10  ;;  %v1110_v40 = vld [vmem:[%s1875_s18 + $0x10] sm:$0xff] (%p1690_p6) }
 0x129   : > { %v1055_v14 = vadd.f32 %v1866_v37, %v1027_v11  ;;  %1076 = vst [vmem:[%s1875_s18 + $0x50] sm:$0xff] %v1060_v22  ;;  %v1112_v41 = vld [vmem:[%s1875_s18 + $0x18] sm:$0xff] (%p1690_p6) }
 0x12a   : > { %1077 = vst [vmem:[%s1875_s18 + $0x58] sm:$0xff] %v1061_v12  ;;  %v1122_v48 = vld [vmem:[%s1875_s18 + $0x40] sm:$0xff] (%p1690_p6) }
 0x12b   : > { %1070 = vst [vmem:[%s1875_s18 + $0x20] sm:$0xff] %v1054_v13 }
 0x12c   : > { %1071 = vst [vmem:[%s1875_s18 + $0x28] sm:$0xff] %v1055_v14  ;;  %v1003_v26 = vpop.f32.mrf.mxu2 }
 0x12d   : > { %v1017_v27 = vpop.f32.mrf.mxu3  ;;  %v1028_v28 = vadd.f32 %v1003_v26, %v834_v15  ;;  %v977_v30 = vpop.f32.mrf.mxu0  ;;  %1111 = vst [vmem:[%s1093_s22 + $0x10] sm:$0xff] (%p1690_p6), %v1110_v40 }
 0x12e   : > { %v1029_v29 = vadd.f32 %v1017_v27, %v848_v23  ;;  %v991_v31 = vpop.f32.mrf.mxu1  ;;  %v1034_v38 = vadd.f32 %v977_v30, %v808_v24  ;;  %1113 = vst [vmem:[%s1093_s22 + $0x18] sm:$0xff] (%p1690_p6), %v1112_v41 }
 0x12f   : > { %v1035_v16 = vadd.f32 %v991_v31, %v822_v25  ;;  %v1056_v17 = vadd.f32 %v1866_v37, %v1028_v28  ;;  %1123 = vst [vmem:[%s1093_s22 + $0x100] sm:$0xff] (%p1690_p6), %v1122_v48 }
 0x130   : > { %v1057_v32 = vadd.f32 %v1866_v37, %v1029_v29  ;;  %v1062_v18 = vadd.f32 %v1879_v49, %v1034_v38  ;;  %v1126_v50 = vld [vmem:[%s1875_s18 + $0x50] sm:$0xff] (%p1690_p6) }
 0x131   : > { %v1063_v19 = vadd.f32 %v1879_v49, %v1035_v16  ;;  %1072 = vst [vmem:[%s1875_s18 + $0x30] sm:$0xff] %v1056_v17  ;;  %v1128_v51 = vld [vmem:[%s1875_s18 + $0x58] sm:$0xff] (%p1690_p6) }
 0x132   : > { %1073 = vst [vmem:[%s1875_s18 + $0x38] sm:$0xff] %v1057_v32  ;;  %v1114_v44 = vld [vmem:[%s1875_s18 + $0x20] sm:$0xff] (%p1690_p6) }
 0x133   : > { %1078 = vst [vmem:[%s1875_s18 + $0x60] sm:$0xff] %v1062_v18  ;;  %v1116_v45 = vld [vmem:[%s1875_s18 + $0x28] sm:$0xff] (%p1690_p6) }
 0x134   : > { %1079 = vst [vmem:[%s1875_s18 + $0x68] sm:$0xff] %v1063_v19  ;;  %v1005_v36 = vpop.f32.mrf.mxu2 }
 0x135   : > { %v1019_v39 = vpop.f32.mrf.mxu3  ;;  %v1036_v34 = vadd.f32 %v1005_v36, %v836_v33  ;;  %1115 = vst [vmem:[%s1093_s22 + $0x20] sm:$0xff] (%p1690_p6), %v1114_v44 }
 0x136   : > { %v1037_v42 = vadd.f32 %v1019_v39, %v850_v35  ;;  %1088 = sbr.rel (!%p1690_p6) target bundleno = 323 (0x143), region = 121  ;;  %1117 = vst [vmem:[%s1093_s22 + $0x28] sm:$0xff] (%p1690_p6), %v1116_v45 }
 0x137   : > { %v1064_v37 = vadd.f32 %v1879_v49, %v1036_v34  ;;  %1127 = vst [vmem:[%s1093_s22 + $0x110] sm:$0xff] (%p1690_p6), %v1126_v50 }
 0x138   : > { %v1065_v43 = vadd.f32 %v1879_v49, %v1037_v42  ;;  %v1118_v46 = vld [vmem:[%s1875_s18 + $0x30] sm:$0xff] (%p1690_p6)  ;;  %v1124_v49 = vld [vmem:[%s1875_s18 + $0x48] sm:$0xff] (%p1690_p6)  ;;  %1129 = vst [vmem:[%s1093_s22 + $0x118] sm:$0xff] (%p1690_p6), %v1128_v51 }
 0x139   : > { %1080 = vst [vmem:[%s1875_s18 + $0x70] sm:$0xff] %v1064_v37  ;;  %v1120_v47 = vld [vmem:[%s1875_s18 + $0x38] sm:$0xff] (%p1690_p6) }
 0x13a   : > { %1081 = vst [vmem:[%s1875_s18 + $0x78] sm:$0xff] %v1065_v43  ;;  %v1130_v52 = vld [vmem:[%s1875_s18 + $0x60] sm:$0xff] (%p1690_p6) }
 0x13b   : > { %1119 = vst [vmem:[%s1093_s22 + $0x30] sm:$0xff] %v1118_v46  ;;  %v1132_v53 = vld [vmem:[%s1875_s18 + $0x68] sm:$0xff] }
 0x13c   : > { %1121 = vst [vmem:[%s1093_s22 + $0x38] sm:$0xff] %v1120_v47 }
 0x13d   : > { %1125 = vst [vmem:[%s1093_s22 + $0x108] sm:$0xff] %v1124_v49 }
 0x13e   : > { %1131 = vst [vmem:[%s1093_s22 + $0x120] sm:$0xff] %v1130_v52 }
 0x13f   : > { %1133 = vst [vmem:[%s1093_s22 + $0x128] sm:$0xff] %v1132_v53 }
 0x140   : > { %v1134_v54 = vld [vmem:[%s1875_s18 + $0x70] sm:$0xff] }
 0x141   : > { %v1136_v55 = vld [vmem:[%s1875_s18 + $0x78] sm:$0xff]  ;;  %1135 = vst [vmem:[%s1093_s22 + $0x130] sm:$0xff] %v1134_v54 }
 0x142   : > { %1137 = vst [vmem:[%s1093_s22 + $0x138] sm:$0xff] %v1136_v55 }
 0x143 PF: > { %s17_s30 = sadd.s32 1, %s1595_s30   ;;  %s1971_s24 = smov %s1575_s25 }
 0x144   : > { %p14_p12 = scmp.ge.s32.totalorder %s17_s30, 10   ;;  %s1972_s25 = smov %s1698_s17 }
 0x145   : > { %s1973_s26 = smov %s1587_s28  ;;  %s1974_s27 = smov %s1591_s29 }
 0x146   : > { %s1975_s28 = smov %s1978_s8  ;;  %s1976_s29 = smov %s1982_s9 }
 0x147   :  { %16 = sbr.rel (!%p14_p12) target bundleno = 4 (0x4), region = 191 }

</bundles_post_ra>
